<compile_context>
chip_gen: v7x
topology: tpu7x:2x2x1
jax: 0.10.0
libtpu: 0.0.40
codegen_flags: <defaults>
</compile_context>

<pallas_src>
import math
from functools import partial

import jax
import jax.numpy as jnp
from jax import lax
from jax.experimental import pallas as pl
from jax.experimental.pallas import tpu as pltpu

DIM = 32                  # opts.dim
N_ITERATIONS = 2          # opts.n_iterations
GATE = 128                # lane-aligned stride for fused GRU gates (r | z | n)
ACT_GAIN = math.sqrt(2.0)                 # nn.init.calculate_gain('relu')
INIT_NORM = math.sqrt(DIM) / ACT_GAIN


# ---------------------------------------------------------------------------
# shared math (used by the Pallas kernel body and the pure-JAX reference)
# ---------------------------------------------------------------------------
def _bdot(x, w):
    """bf16 x bf16 matmul with f32 accumulation (native MXU rate)."""
    return jnp.dot(x.astype(jnp.bfloat16), w.astype(jnp.bfloat16),
                   preferred_element_type=jnp.float32)


def _block_forward(l_emb, c_emb, a, a_t, w_gru, w_mlp, bias, lg, roll):
    """Message passing + readout for ONE block of G equal-size graphs.

    l_emb: (G*Lg, D)  c_emb: (G*Cg, D)
    a    : (G*Cg, G*Lg) block-diagonal incidence, pre-scaled by 1/clause-degree
    a_t  : (G*Lg, G*Cg) block-diagonal transpose,  pre-scaled by 1/literal-degree
    Returns (G, D) per-graph readout logits (only column 0 is meaningful).
    """
    D = DIM
    GL = l_emb.shape[0]
    G = GL // lg

    # ---- unpack parameter slabs (static slices, sublane offsets % 8 == 0) ----
    c_wi, c_wh = w_gru[0 * D:1 * D], w_gru[1 * D:2 * D]              # c_update GRU
    l_wa, l_wb, l_wh = w_gru[2 * D:3 * D], w_gru[3 * D:4 * D], w_gru[4 * D:5 * D]
    l2c_w1, l2c_w2 = w_mlp[0 * D:1 * D], w_mlp[1 * D:2 * D]
    c2l_w1, c2l_w2 = w_mlp[2 * D:3 * D], w_mlp[3 * D:4 * D]
    ro_w1, ro_w2 = w_mlp[4 * D:5 * D], w_mlp[5 * D:6 * D]            # ro_w2 zero-padded
    c_bi, c_bh = bias[0:1, :], bias[1:2, :]
    l_bi, l_bh = bias[2:3, :], bias[3:4, :]
    l2c_b1, l2c_b2 = bias[4:5, 0:D], bias[5:6, 0:D]
    c2l_b1, c2l_b2 = bias[6:7, 0:D], bias[7:8, 0:D]
    ro_b1, ro_b2 = bias[8:9, 0:D], bias[9:10, 0:D]

    def mlp(x, w1, b1, w2, b2):
        h = jnp.maximum(_bdot(x, w1) + b1, 0.0)
        return _bdot(h, w2) + b2

    def gru(gx, h, wh, bh):
        # gx: fused input-side pre-activations (incl. input bias); gate columns
        # live at lane offsets 0 / GATE / 2*GATE so slices are vreg-aligned.
        gh = _bdot(h, wh) + bh
        r = jax.nn.sigmoid(gx[:, 0:D] + gh[:, 0:D])
        z = jax.nn.sigmoid(gx[:, GATE:GATE + D] + gh[:, GATE:GATE + D])
        n = jnp.tanh(gx[:, 2 * GATE:2 * GATE + D] + r * gh[:, 2 * GATE:2 * GATE + D])
        return (1.0 - z) * n + z * h

    row = lax.broadcasted_iota(jnp.int32, (GL, D), 0)
    even_row = jnp.bitwise_and(row, 1) == 0

    for _ in range(N_ITERATIONS):
        # literal -> clause messages, mean aggregation (scale pre-folded into a)
        l2c_feat = mlp(l_emb, l2c_w1, l2c_b1, l2c_w2, l2c_b2)        # (G*Lg, D)
        l2c_aggr = _bdot(a, l2c_feat)                                # (G*Cg, D)
        c_gx = _bdot(l2c_aggr, c_wi) + c_bi                          # (G*Cg, 3*GATE)
        c_emb = gru(c_gx, c_emb, c_wh, c_bh)

        # clause -> literal messages, mean aggregation (scale pre-folded into a_t)
        c2l_feat = mlp(c_emb, c2l_w1, c2l_b1, c2l_w2, c2l_b2)        # (G*Cg, D)
        c2l_aggr = _bdot(a_t, c2l_feat)                              # (G*Lg, D)

        # literal <-> negated-literal pair swap (rows 2i <-> 2i+1).  Each graph's
        # Lg (even) rows are contiguous, so pairs never cross graph boundaries;
        # the circular-roll wrap rows are masked out by the even/odd select.
        up = roll(l_emb, GL - 1)    # out[i] = in[i + 1]
        dn = roll(l_emb, 1)         # out[i] = in[i - 1]
        l2l = jnp.where(even_row, up, dn)

        # l_update GRU; input concat replaced by split input-side weights
        l_gx = _bdot(c2l_aggr, l_wa) + _bdot(l2l, l_wb) + l_bi       # (G*Lg, 3*GATE)
        l_emb = gru(l_gx, l_emb, l_wh, l_bh)

    # Readout MLP + per-graph mean pooling.  Pooling commutes with the second
    # (linear) readout layer, so pool hidden activations with one small MXU
    # matmul against a block-structured selector built from iota (no gathers).
    h = jnp.maximum(_bdot(l_emb, ro_w1) + ro_b1, 0.0)                # (G*Lg, D)
    gid = lax.broadcasted_iota(jnp.int32, (G, GL), 0)
    col = lax.broadcasted_iota(jnp.int32, (G, GL), 1)
    lo = gid * lg
    pool = jnp.where(jnp.logical_and(col >= lo, col < lo + lg), 1.0, 0.0)
    pooled = _bdot(pool, h) * (1.0 / lg)                             # (G, D)
    return _bdot(pooled, ro_w2) + ro_b2                              # (G, D); col 0


# ---------------------------------------------------------------------------
# Pallas kernel (one grid step == one block of G graphs)
# ---------------------------------------------------------------------------
def gnn_kernel(init_ref, a_ref, at_ref, wg_ref, wm_ref, bias_ref, out_ref, *, lg):
    GL = at_ref.shape[0]                 # G * Lg
    GC = a_ref.shape[0]                  # G * Cg
    init = init_ref[...]                 # (2, D) f32
    l_emb = jnp.broadcast_to(init[0:1, :], (GL, DIM))
    c_emb = jnp.broadcast_to(init[1:2, :], (GC, DIM))
    out_ref[...] = _block_forward(
        l_emb, c_emb, a_ref[...], at_ref[...],
        wg_ref[...], wm_ref[...], bias_ref[...], lg,
        roll=lambda x, s: pltpu.roll(x, s, 0))


# ---------------------------------------------------------------------------
# host-side packing: block-diagonal, degree-pre-scaled incidences (bf16)
# ---------------------------------------------------------------------------
def pack_incidence_blocks(a_cl, c_dinv, l_dinv, graphs_per_block):
    B, Cg, Lg = a_cl.shape
    G = graphs_per_block
    assert B % G == 0, "TODO(synk): pad/mask batches not a multiple of G"
    NB = B // G
    a_s = (a_cl * c_dinv).astype(jnp.bfloat16).reshape(NB, G, Cg, Lg)
    at_s = (jnp.swapaxes(a_cl, 1, 2) * l_dinv).astype(jnp.bfloat16).reshape(NB, G, Lg, Cg)
    a_blk = jnp.zeros((NB, G * Cg, G * Lg), jnp.bfloat16)
    at_blk = jnp.zeros((NB, G * Lg, G * Cg), jnp.bfloat16)
    for g in range(G):
        a_blk = a_blk.at[:, g * Cg:(g + 1) * Cg, g * Lg:(g + 1) * Lg].set(a_s[:, g])
        at_blk = at_blk.at[:, g * Lg:(g + 1) * Lg, g * Cg:(g + 1) * Cg].set(at_s[:, g])
    return a_blk, at_blk


# ---------------------------------------------------------------------------
# wrapper
# ---------------------------------------------------------------------------
@partial(jax.jit, static_argnames=("graphs_per_block",))
def gnn_pallas(init_emb, a_cl, c_dinv, l_dinv, w_gru, w_mlp, bias,
               graphs_per_block=16):
    B, Cg, Lg = a_cl.shape
    G = graphs_per_block
    NB = B // G
    GL, GC = G * Lg, G * Cg
    a_blk, at_blk = pack_incidence_blocks(a_cl, c_dinv, l_dinv, G)

    # advisory cost estimate (per-block matmuls + EUP transcendentals)
    D, G3 = DIM, 3 * GATE
    per_iter = (4 * GL * D * D + 2 * GC * GL * D + 4 * GC * D * G3
                + 4 * GC * D * D + 2 * GL * GC * D + 6 * GL * D * G3)
    readout = 2 * GL * D * D + 2 * G * GL * D + 2 * G * D * D
    flops = NB * (N_ITERATIONS * per_iter + readout)
    transcend = NB * N_ITERATIONS * 3 * D * (GL + GC)
    bytes_acc = (2 * D * 4 + NB * GC * GL * 2 + NB * GL * GC * 2
                 + 5 * D * G3 * 2 + 6 * D * D * 2 + 10 * G3 * 4 + NB * G * D * 4)

    out = pl.pallas_call(
        partial(gnn_kernel, lg=Lg),
        out_shape=jax.ShapeDtypeStruct((NB, G, DIM), jnp.float32),
        grid=(NB,),
        in_specs=[
            pl.BlockSpec((2, DIM), lambda b: (0, 0)),              # learned init rows
            pl.BlockSpec((None, GC, GL), lambda b: (b, 0, 0)),     # scaled A (block-diag)
            pl.BlockSpec((None, GL, GC), lambda b: (b, 0, 0)),     # scaled A^T (block-diag)
            pl.BlockSpec((5 * DIM, 3 * GATE), lambda b: (0, 0)),   # GRU weight slab
            pl.BlockSpec((6 * DIM, DIM), lambda b: (0, 0)),        # MLP weight slab
            pl.BlockSpec((10, 3 * GATE), lambda b: (0, 0)),        # bias slab
        ],
        out_specs=pl.BlockSpec((None, G, DIM), lambda b: (b, 0, 0)),
        compiler_params=pltpu.CompilerParams(
            dimension_semantics=("parallel",)),
        cost_estimate=pl.CostEstimate(
            flops=flops, transcendentals=transcend, bytes_accessed=bytes_acc),
    )(init_emb, a_blk, at_blk, w_gru, w_mlp, bias)

    # column 0 holds the per-graph logit (1/Lg already applied via the pooler);
    # sigmoid kept in the wrapper so the kernel output stays a dense slab.
    return jax.nn.sigmoid(out[:, :, 0].reshape(B))


# ---------------------------------------------------------------------------
# pure-JAX reference (identical math, lowered through XLA)
# ---------------------------------------------------------------------------
def gnn_reference(init_emb, a_cl, c_dinv, l_dinv, w_gru, w_mlp, bias,
                  graphs_per_block=16):
    B, Cg, Lg = a_cl.shape
    G = graphs_per_block
    NB = B // G
    GL, GC = G * Lg, G * Cg
    a_blk, at_blk = pack_incidence_blocks(a_cl, c_dinv, l_dinv, G)
    l0 = jnp.broadcast_to(init_emb[0:1, :], (GL, DIM))
    c0 = jnp.broadcast_to(init_emb[1:2, :], (GC, DIM))
    outs = []
    for nb in range(NB):
        logit = _block_forward(l0, c0, a_blk[nb], at_blk[nb],
                               w_gru, w_mlp, bias, Lg,
                               roll=lambda x, s: jnp.roll(x, s, axis=0))
        outs.append(logit[:, 0])
    return jax.nn.sigmoid(jnp.concatenate(outs).reshape(B))


# ---------------------------------------------------------------------------
# deterministic data / parameter construction (glue)
# ---------------------------------------------------------------------------
def build_inputs(key, n_graphs=32, n_vars=4, n_clauses=4, k_lits=3):
    D = DIM
    Lg = 2 * n_vars          # literals per graph
    Cg = n_clauses           # clauses per graph
    keys = jax.random.split(key, 4)

    # per-graph clause->literal incidence counts
    lits = jax.random.randint(keys[0], (n_graphs, Cg, k_lits), 0, Lg)
    a = jnp.zeros((n_graphs, Cg, Lg), jnp.float32)
    a = a.at[jnp.arange(n_graphs)[:, None, None],
             jnp.arange(Cg)[None, :, None], lits].add(1.0)
    c_dinv = 1.0 / jnp.maximum(a.sum(axis=2, keepdims=True), 1.0)    # (B, Cg, 1)
    l_dinv = 1.0 / jnp.maximum(a.sum(axis=1), 1.0)[..., None]        # (B, Lg, 1)

    # learned init embeddings: row 0 = literal init, row 1 = clause init
    init_emb = jnp.concatenate(
        [jax.random.normal(keys[1], (1, D), jnp.float32),
         jax.random.normal(keys[2], (1, D), jnp.float32)], axis=0) / INIT_NORM

    def lin_w(k, d_in, d_out):
        return jax.random.normal(k, (d_in, d_out), jnp.float32) / math.sqrt(d_in)

    def lin_b(k, d_out):
        return jax.random.uniform(k, (1, d_out), jnp.float32, -0.1, 0.1)

    kk = jax.random.split(keys[3], 20)
    # MLPs (Linear -> ReLU -> Linear)
    l2c_w1, l2c_w2 = lin_w(kk[0], D, D), lin_w(kk[1], D, D)
    c2l_w1, c2l_w2 = lin_w(kk[2], D, D), lin_w(kk[3], D, D)
    ro_w1, ro_w2 = lin_w(kk[4], D, D), lin_w(kk[5], D, 1)
    l2c_b1, l2c_b2 = lin_b(kk[6], D), lin_b(kk[7], D)
    c2l_b1, c2l_b2 = lin_b(kk[8], D), lin_b(kk[9], D)
    ro_b1, ro_b2 = lin_b(kk[10], D), lin_b(kk[11], 1)
    # fused-gate GRUs (columns ordered r | z | n, matching nn.GRUCell math)
    s = 1.0 / math.sqrt(D)
    c_wi = jax.random.normal(kk[12], (D, 3 * D), jnp.float32) * s
    c_wh = jax.random.normal(kk[13], (D, 3 * D), jnp.float32) * s
    l_wi = jax.random.normal(kk[14], (2 * D, 3 * D), jnp.float32) * s
    l_wh = jax.random.normal(kk[15], (D, 3 * D), jnp.float32) * s
    c_bi = jax.random.uniform(kk[16], (1, 3 * D), jnp.float32, -s, s)
    c_bh = jax.random.uniform(kk[17], (1, 3 * D), jnp.float32, -s, s)
    l_bi = jax.random.uniform(kk[18], (1, 3 * D), jnp.float32, -s, s)
    l_bh = jax.random.uniform(kk[19], (1, 3 * D), jnp.float32, -s, s)

    def gate_align(m):   # (rows, 3D) -> (rows, 3*GATE): each gate padded to 128 lanes
        out = jnp.zeros((m.shape[0], 3 * GATE), m.dtype)
        out = out.at[:, 0:D].set(m[:, 0:D])
        out = out.at[:, GATE:GATE + D].set(m[:, D:2 * D])
        out = out.at[:, 2 * GATE:2 * GATE + D].set(m[:, 2 * D:3 * D])
        return out

    # ---- pack parameter slabs ----
    w_gru = jnp.concatenate(
        [gate_align(c_wi), gate_align(c_wh),
         gate_align(l_wi[:D]), gate_align(l_wi[D:]), gate_align(l_wh)],
        axis=0).astype(jnp.bfloat16)                                  # (5D, 3*128)

    ro_w2_pad = jnp.pad(ro_w2, ((0, 0), (0, D - 1)))
    w_mlp = jnp.concatenate([l2c_w1, l2c_w2, c2l_w1, c2l_w2, ro_w1, ro_w2_pad],
                            axis=0).astype(jnp.bfloat16)              # (6D, D)

    def pad_row(b):
        return jnp.pad(b, ((0, 0), (0, 3 * GATE - b.shape[1])))

    bias = jnp.concatenate(
        [gate_align(c_bi), gate_align(c_bh), gate_align(l_bi), gate_align(l_bh),
         pad_row(l2c_b1), pad_row(l2c_b2), pad_row(c2l_b1), pad_row(c2l_b2),
         pad_row(ro_b1), pad_row(ro_b2)], axis=0)                     # (10, 3*128) f32

    return init_emb, a, c_dinv, l_dinv, w_gru, w_mlp, bias


if __name__ == "__main__":
    # 32 graphs, 16 graphs per grid step -> grid=(2,), 128 literal rows / block.
    args = build_inputs(jax.random.PRNGKey(0), n_graphs=32)

    out = jax.block_until_ready(gnn_pallas(*args, graphs_per_block=16))
    ref = jax.block_until_ready(gnn_reference(*args, graphs_per_block=16))

    assert out.shape == (32,), out.shape
    assert jnp.allclose(out, ref, atol=2e-3, rtol=2e-3), (out, ref)
    print("KERNEL_OK")
</pallas_src>

<mosaic_0001>
module attributes {stable_mosaic.version = 11 : i64} {
  func.func @gnn_kernel(%arg0: i32, %arg1: memref<2x32xf32, #tpu.memory_space<vmem>>, %arg2: memref<1x64x128xbf16, #tpu.memory_space<vmem>>, %arg3: memref<1x128x64xbf16, #tpu.memory_space<vmem>>, %arg4: memref<160x384xbf16, #tpu.memory_space<vmem>>, %arg5: memref<192x32xbf16, #tpu.memory_space<vmem>>, %arg6: memref<10x384xf32, #tpu.memory_space<vmem>>, %arg7: memref<1x16x32xf32, #tpu.memory_space<vmem>>) attributes {dimension_semantics = [#tpu.dimension_semantics<parallel>], iteration_bounds = array<i64: 2>, scalar_prefetch = 0 : i64, scratch_operands = 0 : i64, tpu.core_type = #tpu.core_type<tc>, window_params = [{pipeline_mode = #tpu.pipeline_mode<synchronous>, transform_indices = @transform_0, window_bounds = array<i64: 2, 32>}, {transform_indices = @transform_1, window_bounds = array<i64: 1, 64, 128>}, {transform_indices = @transform_2, window_bounds = array<i64: 1, 128, 64>}, {pipeline_mode = #tpu.pipeline_mode<synchronous>, transform_indices = @transform_3, window_bounds = array<i64: 160, 384>}, {pipeline_mode = #tpu.pipeline_mode<synchronous>, transform_indices = @transform_4, window_bounds = array<i64: 192, 32>}, {pipeline_mode = #tpu.pipeline_mode<synchronous>, transform_indices = @transform_5, window_bounds = array<i64: 10, 384>}, {transform_indices = @transform_6, window_bounds = array<i64: 1, 16, 32>}]} {
    %c0 = arith.constant 0 : index
    %c0_0 = arith.constant 0 : index
    %0 = vector.load %arg1[%c0, %c0_0] : memref<2x32xf32, #tpu.memory_space<vmem>>, vector<2x32xf32>
    %1 = vector.extract_strided_slice %0 {offsets = [0, 0], sizes = [1, 32], strides = [1, 1]} : vector<2x32xf32> to vector<1x32xf32>
    %2 = vector.shape_cast %1 : vector<1x32xf32> to vector<1x32xf32>
    %3 = vector.broadcast %2 : vector<1x32xf32> to vector<128x32xf32>
    %4 = vector.extract_strided_slice %0 {offsets = [1, 0], sizes = [1, 32], strides = [1, 1]} : vector<2x32xf32> to vector<1x32xf32>
    %5 = vector.shape_cast %4 : vector<1x32xf32> to vector<1x32xf32>
    %6 = vector.broadcast %5 : vector<1x32xf32> to vector<64x32xf32>
    %c0_1 = arith.constant 0 : index
    %c0_2 = arith.constant 0 : index
    %c0_3 = arith.constant 0 : index
    %7 = vector.load %arg2[%c0_1, %c0_2, %c0_3] : memref<1x64x128xbf16, #tpu.memory_space<vmem>>, vector<1x64x128xbf16>
    %8 = vector.shape_cast %7 : vector<1x64x128xbf16> to vector<64x128xbf16>
    %c0_4 = arith.constant 0 : index
    %c0_5 = arith.constant 0 : index
    %c0_6 = arith.constant 0 : index
    %9 = vector.load %arg3[%c0_4, %c0_5, %c0_6] : memref<1x128x64xbf16, #tpu.memory_space<vmem>>, vector<1x128x64xbf16>
    %10 = vector.shape_cast %9 : vector<1x128x64xbf16> to vector<128x64xbf16>
    %c0_7 = arith.constant 0 : index
    %c0_8 = arith.constant 0 : index
    %11 = vector.load %arg4[%c0_7, %c0_8] : memref<160x384xbf16, #tpu.memory_space<vmem>>, vector<160x384xbf16>
    %c0_9 = arith.constant 0 : index
    %c0_10 = arith.constant 0 : index
    %12 = vector.load %arg5[%c0_9, %c0_10] : memref<192x32xbf16, #tpu.memory_space<vmem>>, vector<192x32xbf16>
    %c0_11 = arith.constant 0 : index
    %c0_12 = arith.constant 0 : index
    %13 = vector.load %arg6[%c0_11, %c0_12] : memref<10x384xf32, #tpu.memory_space<vmem>>, vector<10x384xf32>
    %14 = vector.extract_strided_slice %11 {offsets = [0, 0], sizes = [32, 384], strides = [1, 1]} : vector<160x384xbf16> to vector<32x384xbf16>
    %15 = vector.extract_strided_slice %11 {offsets = [32, 0], sizes = [32, 384], strides = [1, 1]} : vector<160x384xbf16> to vector<32x384xbf16>
    %16 = vector.extract_strided_slice %11 {offsets = [64, 0], sizes = [32, 384], strides = [1, 1]} : vector<160x384xbf16> to vector<32x384xbf16>
    %17 = vector.extract_strided_slice %11 {offsets = [96, 0], sizes = [32, 384], strides = [1, 1]} : vector<160x384xbf16> to vector<32x384xbf16>
    %18 = vector.extract_strided_slice %11 {offsets = [128, 0], sizes = [32, 384], strides = [1, 1]} : vector<160x384xbf16> to vector<32x384xbf16>
    %19 = vector.extract_strided_slice %12 {offsets = [0, 0], sizes = [32, 32], strides = [1, 1]} : vector<192x32xbf16> to vector<32x32xbf16>
    %20 = vector.extract_strided_slice %12 {offsets = [32, 0], sizes = [32, 32], strides = [1, 1]} : vector<192x32xbf16> to vector<32x32xbf16>
    %21 = vector.extract_strided_slice %12 {offsets = [64, 0], sizes = [32, 32], strides = [1, 1]} : vector<192x32xbf16> to vector<32x32xbf16>
    %22 = vector.extract_strided_slice %12 {offsets = [96, 0], sizes = [32, 32], strides = [1, 1]} : vector<192x32xbf16> to vector<32x32xbf16>
    %23 = vector.extract_strided_slice %12 {offsets = [128, 0], sizes = [32, 32], strides = [1, 1]} : vector<192x32xbf16> to vector<32x32xbf16>
    %24 = vector.extract_strided_slice %12 {offsets = [160, 0], sizes = [32, 32], strides = [1, 1]} : vector<192x32xbf16> to vector<32x32xbf16>
    %25 = vector.extract_strided_slice %13 {offsets = [0, 0], sizes = [1, 384], strides = [1, 1]} : vector<10x384xf32> to vector<1x384xf32>
    %26 = vector.extract_strided_slice %13 {offsets = [1, 0], sizes = [1, 384], strides = [1, 1]} : vector<10x384xf32> to vector<1x384xf32>
    %27 = vector.extract_strided_slice %13 {offsets = [2, 0], sizes = [1, 384], strides = [1, 1]} : vector<10x384xf32> to vector<1x384xf32>
    %28 = vector.extract_strided_slice %13 {offsets = [3, 0], sizes = [1, 384], strides = [1, 1]} : vector<10x384xf32> to vector<1x384xf32>
    %29 = vector.extract_strided_slice %13 {offsets = [4, 0], sizes = [1, 32], strides = [1, 1]} : vector<10x384xf32> to vector<1x32xf32>
    %30 = vector.extract_strided_slice %13 {offsets = [5, 0], sizes = [1, 32], strides = [1, 1]} : vector<10x384xf32> to vector<1x32xf32>
    %31 = vector.extract_strided_slice %13 {offsets = [6, 0], sizes = [1, 32], strides = [1, 1]} : vector<10x384xf32> to vector<1x32xf32>
    %32 = vector.extract_strided_slice %13 {offsets = [7, 0], sizes = [1, 32], strides = [1, 1]} : vector<10x384xf32> to vector<1x32xf32>
    %33 = vector.extract_strided_slice %13 {offsets = [8, 0], sizes = [1, 32], strides = [1, 1]} : vector<10x384xf32> to vector<1x32xf32>
    %34 = vector.extract_strided_slice %13 {offsets = [9, 0], sizes = [1, 32], strides = [1, 1]} : vector<10x384xf32> to vector<1x32xf32>
    %35 = tpu.iota {dimensions = array<i32: 0>} : vector<128x32xi32>
    %c1_i32 = arith.constant 1 : i32
    %36 = vector.broadcast %c1_i32 : i32 to vector<128x32xi32>
    %37 = arith.andi %35, %36 : vector<128x32xi32>
    %c0_i32 = arith.constant 0 : i32
    %38 = vector.broadcast %c0_i32 : i32 to vector<128x32xi32>
    %39 = arith.cmpi eq, %37, %38 : vector<128x32xi32>
    %40 = arith.truncf %3 : vector<128x32xf32> to vector<128x32xbf16>
    %cst = arith.constant dense<0.000000e+00> : vector<128x32xf32>
    %41 = tpu.matmul %40, %19, %cst {dimension_numbers = #tpu.dot_dimension_numbers<[1], [0], [0], [1], [0, 0, 1, 1], [], []>} : vector<128x32xbf16>, vector<32x32xbf16>, vector<128x32xf32> -> vector<128x32xf32>
    %42 = vector.broadcast %29 : vector<1x32xf32> to vector<128x32xf32>
    %43 = arith.addf %41, %42 : vector<128x32xf32>
    %cst_13 = arith.constant 0.000000e+00 : f32
    %44 = vector.broadcast %cst_13 : f32 to vector<128x32xf32>
    %45 = arith.maximumf %43, %44 : vector<128x32xf32>
    %46 = arith.truncf %45 : vector<128x32xf32> to vector<128x32xbf16>
    %cst_14 = arith.constant dense<0.000000e+00> : vector<128x32xf32>
    %47 = tpu.matmul %46, %20, %cst_14 {dimension_numbers = #tpu.dot_dimension_numbers<[1], [0], [0], [1], [0, 0, 1, 1], [], []>} : vector<128x32xbf16>, vector<32x32xbf16>, vector<128x32xf32> -> vector<128x32xf32>
    %48 = vector.broadcast %30 : vector<1x32xf32> to vector<128x32xf32>
    %49 = arith.addf %47, %48 : vector<128x32xf32>
    %50 = arith.truncf %49 : vector<128x32xf32> to vector<128x32xbf16>
    %cst_15 = arith.constant dense<0.000000e+00> : vector<64x32xf32>
    %51 = tpu.matmul %8, %50, %cst_15 {dimension_numbers = #tpu.dot_dimension_numbers<[1], [0], [0], [1], [0, 0, 1, 1], [], []>} : vector<64x128xbf16>, vector<128x32xbf16>, vector<64x32xf32> -> vector<64x32xf32>
    %52 = arith.truncf %51 : vector<64x32xf32> to vector<64x32xbf16>
    %cst_16 = arith.constant dense<0.000000e+00> : vector<64x384xf32>
    %53 = tpu.matmul %52, %14, %cst_16 {dimension_numbers = #tpu.dot_dimension_numbers<[1], [0], [0], [1], [0, 0, 1, 1], [], []>} : vector<64x32xbf16>, vector<32x384xbf16>, vector<64x384xf32> -> vector<64x384xf32>
    %54 = vector.broadcast %25 : vector<1x384xf32> to vector<64x384xf32>
    %55 = arith.addf %53, %54 : vector<64x384xf32>
    %56 = arith.truncf %6 : vector<64x32xf32> to vector<64x32xbf16>
    %cst_17 = arith.constant dense<0.000000e+00> : vector<64x384xf32>
    %57 = tpu.matmul %56, %15, %cst_17 {dimension_numbers = #tpu.dot_dimension_numbers<[1], [0], [0], [1], [0, 0, 1, 1], [], []>} : vector<64x32xbf16>, vector<32x384xbf16>, vector<64x384xf32> -> vector<64x384xf32>
    %58 = vector.broadcast %26 : vector<1x384xf32> to vector<64x384xf32>
    %59 = arith.addf %57, %58 : vector<64x384xf32>
    %60 = vector.extract_strided_slice %55 {offsets = [0, 0], sizes = [64, 32], strides = [1, 1]} : vector<64x384xf32> to vector<64x32xf32>
    %61 = vector.extract_strided_slice %59 {offsets = [0, 0], sizes = [64, 32], strides = [1, 1]} : vector<64x384xf32> to vector<64x32xf32>
    %62 = arith.addf %60, %61 : vector<64x32xf32>
    %63 = arith.negf %62 : vector<64x32xf32>
    %64 = math.exp %63 : vector<64x32xf32>
    %cst_18 = arith.constant 1.000000e+00 : f32
    %65 = vector.broadcast %cst_18 : f32 to vector<64x32xf32>
    %66 = arith.addf %65, %64 : vector<64x32xf32>
    %67 = arith.divf %65, %66 : vector<64x32xf32>
    %68 = vector.extract_strided_slice %55 {offsets = [0, 128], sizes = [64, 32], strides = [1, 1]} : vector<64x384xf32> to vector<64x32xf32>
    %69 = vector.extract_strided_slice %59 {offsets = [0, 128], sizes = [64, 32], strides = [1, 1]} : vector<64x384xf32> to vector<64x32xf32>
    %70 = arith.addf %68, %69 : vector<64x32xf32>
    %71 = arith.negf %70 : vector<64x32xf32>
    %72 = math.exp %71 : vector<64x32xf32>
    %cst_19 = arith.constant 1.000000e+00 : f32
    %73 = vector.broadcast %cst_19 : f32 to vector<64x32xf32>
    %74 = arith.addf %73, %72 : vector<64x32xf32>
    %75 = arith.divf %73, %74 : vector<64x32xf32>
    %76 = vector.extract_strided_slice %55 {offsets = [0, 256], sizes = [64, 32], strides = [1, 1]} : vector<64x384xf32> to vector<64x32xf32>
    %77 = vector.extract_strided_slice %59 {offsets = [0, 256], sizes = [64, 32], strides = [1, 1]} : vector<64x384xf32> to vector<64x32xf32>
    %78 = arith.mulf %67, %77 : vector<64x32xf32>
    %79 = arith.addf %76, %78 : vector<64x32xf32>
    %80 = math.tanh %79 : vector<64x32xf32>
    %cst_20 = arith.constant 1.000000e+00 : f32
    %81 = vector.broadcast %cst_20 : f32 to vector<64x32xf32>
    %82 = arith.subf %81, %75 : vector<64x32xf32>
    %83 = arith.mulf %82, %80 : vector<64x32xf32>
    %84 = arith.mulf %75, %6 : vector<64x32xf32>
    %85 = arith.addf %83, %84 : vector<64x32xf32>
    %86 = arith.truncf %85 : vector<64x32xf32> to vector<64x32xbf16>
    %cst_21 = arith.constant dense<0.000000e+00> : vector<64x32xf32>
    %87 = tpu.matmul %86, %21, %cst_21 {dimension_numbers = #tpu.dot_dimension_numbers<[1], [0], [0], [1], [0, 0, 1, 1], [], []>} : vector<64x32xbf16>, vector<32x32xbf16>, vector<64x32xf32> -> vector<64x32xf32>
    %88 = vector.broadcast %31 : vector<1x32xf32> to vector<64x32xf32>
    %89 = arith.addf %87, %88 : vector<64x32xf32>
    %cst_22 = arith.constant 0.000000e+00 : f32
    %90 = vector.broadcast %cst_22 : f32 to vector<64x32xf32>
    %91 = arith.maximumf %89, %90 : vector<64x32xf32>
    %92 = arith.truncf %91 : vector<64x32xf32> to vector<64x32xbf16>
    %cst_23 = arith.constant dense<0.000000e+00> : vector<64x32xf32>
    %93 = tpu.matmul %92, %22, %cst_23 {dimension_numbers = #tpu.dot_dimension_numbers<[1], [0], [0], [1], [0, 0, 1, 1], [], []>} : vector<64x32xbf16>, vector<32x32xbf16>, vector<64x32xf32> -> vector<64x32xf32>
    %94 = vector.broadcast %32 : vector<1x32xf32> to vector<64x32xf32>
    %95 = arith.addf %93, %94 : vector<64x32xf32>
    %96 = arith.truncf %95 : vector<64x32xf32> to vector<64x32xbf16>
    %cst_24 = arith.constant dense<0.000000e+00> : vector<128x32xf32>
    %97 = tpu.matmul %10, %96, %cst_24 {dimension_numbers = #tpu.dot_dimension_numbers<[1], [0], [0], [1], [0, 0, 1, 1], [], []>} : vector<128x64xbf16>, vector<64x32xbf16>, vector<128x32xf32> -> vector<128x32xf32>
    %c127_i32 = arith.constant 127 : i32
    %98 = tpu.dynamic_rotate %3 by %c127_i32 dim 0 : vector<128x32xf32>, i32 -> vector<128x32xf32>
    %c1_i32_25 = arith.constant 1 : i32
    %99 = tpu.dynamic_rotate %3 by %c1_i32_25 dim 0 : vector<128x32xf32>, i32 -> vector<128x32xf32>
    %100 = arith.select %39, %98, %99 : vector<128x32xi1>, vector<128x32xf32>
    %101 = arith.truncf %97 : vector<128x32xf32> to vector<128x32xbf16>
    %cst_26 = arith.constant dense<0.000000e+00> : vector<128x384xf32>
    %102 = tpu.matmul %101, %16, %cst_26 {dimension_numbers = #tpu.dot_dimension_numbers<[1], [0], [0], [1], [0, 0, 1, 1], [], []>} : vector<128x32xbf16>, vector<32x384xbf16>, vector<128x384xf32> -> vector<128x384xf32>
    %103 = arith.truncf %100 : vector<128x32xf32> to vector<128x32xbf16>
    %cst_27 = arith.constant dense<0.000000e+00> : vector<128x384xf32>
    %104 = tpu.matmul %103, %17, %cst_27 {dimension_numbers = #tpu.dot_dimension_numbers<[1], [0], [0], [1], [0, 0, 1, 1], [], []>} : vector<128x32xbf16>, vector<32x384xbf16>, vector<128x384xf32> -> vector<128x384xf32>
    %105 = arith.addf %102, %104 : vector<128x384xf32>
    %106 = vector.broadcast %27 : vector<1x384xf32> to vector<128x384xf32>
    %107 = arith.addf %105, %106 : vector<128x384xf32>
    %108 = arith.truncf %3 : vector<128x32xf32> to vector<128x32xbf16>
    %cst_28 = arith.constant dense<0.000000e+00> : vector<128x384xf32>
    %109 = tpu.matmul %108, %18, %cst_28 {dimension_numbers = #tpu.dot_dimension_numbers<[1], [0], [0], [1], [0, 0, 1, 1], [], []>} : vector<128x32xbf16>, vector<32x384xbf16>, vector<128x384xf32> -> vector<128x384xf32>
    %110 = vector.broadcast %28 : vector<1x384xf32> to vector<128x384xf32>
    %111 = arith.addf %109, %110 : vector<128x384xf32>
    %112 = vector.extract_strided_slice %107 {offsets = [0, 0], sizes = [128, 32], strides = [1, 1]} : vector<128x384xf32> to vector<128x32xf32>
    %113 = vector.extract_strided_slice %111 {offsets = [0, 0], sizes = [128, 32], strides = [1, 1]} : vector<128x384xf32> to vector<128x32xf32>
    %114 = arith.addf %112, %113 : vector<128x32xf32>
    %115 = arith.negf %114 : vector<128x32xf32>
    %116 = math.exp %115 : vector<128x32xf32>
    %cst_29 = arith.constant 1.000000e+00 : f32
    %117 = vector.broadcast %cst_29 : f32 to vector<128x32xf32>
    %118 = arith.addf %117, %116 : vector<128x32xf32>
    %119 = arith.divf %117, %118 : vector<128x32xf32>
    %120 = vector.extract_strided_slice %107 {offsets = [0, 128], sizes = [128, 32], strides = [1, 1]} : vector<128x384xf32> to vector<128x32xf32>
    %121 = vector.extract_strided_slice %111 {offsets = [0, 128], sizes = [128, 32], strides = [1, 1]} : vector<128x384xf32> to vector<128x32xf32>
    %122 = arith.addf %120, %121 : vector<128x32xf32>
    %123 = arith.negf %122 : vector<128x32xf32>
    %124 = math.exp %123 : vector<128x32xf32>
    %cst_30 = arith.constant 1.000000e+00 : f32
    %125 = vector.broadcast %cst_30 : f32 to vector<128x32xf32>
    %126 = arith.addf %125, %124 : vector<128x32xf32>
    %127 = arith.divf %125, %126 : vector<128x32xf32>
    %128 = vector.extract_strided_slice %107 {offsets = [0, 256], sizes = [128, 32], strides = [1, 1]} : vector<128x384xf32> to vector<128x32xf32>
    %129 = vector.extract_strided_slice %111 {offsets = [0, 256], sizes = [128, 32], strides = [1, 1]} : vector<128x384xf32> to vector<128x32xf32>
    %130 = arith.mulf %119, %129 : vector<128x32xf32>
    %131 = arith.addf %128, %130 : vector<128x32xf32>
    %132 = math.tanh %131 : vector<128x32xf32>
    %cst_31 = arith.constant 1.000000e+00 : f32
    %133 = vector.broadcast %cst_31 : f32 to vector<128x32xf32>
    %134 = arith.subf %133, %127 : vector<128x32xf32>
    %135 = arith.mulf %134, %132 : vector<128x32xf32>
    %136 = arith.mulf %127, %3 : vector<128x32xf32>
    %137 = arith.addf %135, %136 : vector<128x32xf32>
    %138 = arith.truncf %137 : vector<128x32xf32> to vector<128x32xbf16>
    %cst_32 = arith.constant dense<0.000000e+00> : vector<128x32xf32>
    %139 = tpu.matmul %138, %19, %cst_32 {dimension_numbers = #tpu.dot_dimension_numbers<[1], [0], [0], [1], [0, 0, 1, 1], [], []>} : vector<128x32xbf16>, vector<32x32xbf16>, vector<128x32xf32> -> vector<128x32xf32>
    %140 = vector.broadcast %29 : vector<1x32xf32> to vector<128x32xf32>
    %141 = arith.addf %139, %140 : vector<128x32xf32>
    %cst_33 = arith.constant 0.000000e+00 : f32
    %142 = vector.broadcast %cst_33 : f32 to vector<128x32xf32>
    %143 = arith.maximumf %141, %142 : vector<128x32xf32>
    %144 = arith.truncf %143 : vector<128x32xf32> to vector<128x32xbf16>
    %cst_34 = arith.constant dense<0.000000e+00> : vector<128x32xf32>
    %145 = tpu.matmul %144, %20, %cst_34 {dimension_numbers = #tpu.dot_dimension_numbers<[1], [0], [0], [1], [0, 0, 1, 1], [], []>} : vector<128x32xbf16>, vector<32x32xbf16>, vector<128x32xf32> -> vector<128x32xf32>
    %146 = vector.broadcast %30 : vector<1x32xf32> to vector<128x32xf32>
    %147 = arith.addf %145, %146 : vector<128x32xf32>
    %148 = arith.truncf %147 : vector<128x32xf32> to vector<128x32xbf16>
    %cst_35 = arith.constant dense<0.000000e+00> : vector<64x32xf32>
    %149 = tpu.matmul %8, %148, %cst_35 {dimension_numbers = #tpu.dot_dimension_numbers<[1], [0], [0], [1], [0, 0, 1, 1], [], []>} : vector<64x128xbf16>, vector<128x32xbf16>, vector<64x32xf32> -> vector<64x32xf32>
    %150 = arith.truncf %149 : vector<64x32xf32> to vector<64x32xbf16>
    %cst_36 = arith.constant dense<0.000000e+00> : vector<64x384xf32>
    %151 = tpu.matmul %150, %14, %cst_36 {dimension_numbers = #tpu.dot_dimension_numbers<[1], [0], [0], [1], [0, 0, 1, 1], [], []>} : vector<64x32xbf16>, vector<32x384xbf16>, vector<64x384xf32> -> vector<64x384xf32>
    %152 = vector.broadcast %25 : vector<1x384xf32> to vector<64x384xf32>
    %153 = arith.addf %151, %152 : vector<64x384xf32>
    %154 = arith.truncf %85 : vector<64x32xf32> to vector<64x32xbf16>
    %cst_37 = arith.constant dense<0.000000e+00> : vector<64x384xf32>
    %155 = tpu.matmul %154, %15, %cst_37 {dimension_numbers = #tpu.dot_dimension_numbers<[1], [0], [0], [1], [0, 0, 1, 1], [], []>} : vector<64x32xbf16>, vector<32x384xbf16>, vector<64x384xf32> -> vector<64x384xf32>
    %156 = vector.broadcast %26 : vector<1x384xf32> to vector<64x384xf32>
    %157 = arith.addf %155, %156 : vector<64x384xf32>
    %158 = vector.extract_strided_slice %153 {offsets = [0, 0], sizes = [64, 32], strides = [1, 1]} : vector<64x384xf32> to vector<64x32xf32>
    %159 = vector.extract_strided_slice %157 {offsets = [0, 0], sizes = [64, 32], strides = [1, 1]} : vector<64x384xf32> to vector<64x32xf32>
    %160 = arith.addf %158, %159 : vector<64x32xf32>
    %161 = arith.negf %160 : vector<64x32xf32>
    %162 = math.exp %161 : vector<64x32xf32>
    %cst_38 = arith.constant 1.000000e+00 : f32
    %163 = vector.broadcast %cst_38 : f32 to vector<64x32xf32>
    %164 = arith.addf %163, %162 : vector<64x32xf32>
    %165 = arith.divf %163, %164 : vector<64x32xf32>
    %166 = vector.extract_strided_slice %153 {offsets = [0, 128], sizes = [64, 32], strides = [1, 1]} : vector<64x384xf32> to vector<64x32xf32>
    %167 = vector.extract_strided_slice %157 {offsets = [0, 128], sizes = [64, 32], strides = [1, 1]} : vector<64x384xf32> to vector<64x32xf32>
    %168 = arith.addf %166, %167 : vector<64x32xf32>
    %169 = arith.negf %168 : vector<64x32xf32>
    %170 = math.exp %169 : vector<64x32xf32>
    %cst_39 = arith.constant 1.000000e+00 : f32
    %171 = vector.broadcast %cst_39 : f32 to vector<64x32xf32>
    %172 = arith.addf %171, %170 : vector<64x32xf32>
    %173 = arith.divf %171, %172 : vector<64x32xf32>
    %174 = vector.extract_strided_slice %153 {offsets = [0, 256], sizes = [64, 32], strides = [1, 1]} : vector<64x384xf32> to vector<64x32xf32>
    %175 = vector.extract_strided_slice %157 {offsets = [0, 256], sizes = [64, 32], strides = [1, 1]} : vector<64x384xf32> to vector<64x32xf32>
    %176 = arith.mulf %165, %175 : vector<64x32xf32>
    %177 = arith.addf %174, %176 : vector<64x32xf32>
    %178 = math.tanh %177 : vector<64x32xf32>
    %cst_40 = arith.constant 1.000000e+00 : f32
    %179 = vector.broadcast %cst_40 : f32 to vector<64x32xf32>
    %180 = arith.subf %179, %173 : vector<64x32xf32>
    %181 = arith.mulf %180, %178 : vector<64x32xf32>
    %182 = arith.mulf %173, %85 : vector<64x32xf32>
    %183 = arith.addf %181, %182 : vector<64x32xf32>
    %184 = arith.truncf %183 : vector<64x32xf32> to vector<64x32xbf16>
    %cst_41 = arith.constant dense<0.000000e+00> : vector<64x32xf32>
    %185 = tpu.matmul %184, %21, %cst_41 {dimension_numbers = #tpu.dot_dimension_numbers<[1], [0], [0], [1], [0, 0, 1, 1], [], []>} : vector<64x32xbf16>, vector<32x32xbf16>, vector<64x32xf32> -> vector<64x32xf32>
    %186 = vector.broadcast %31 : vector<1x32xf32> to vector<64x32xf32>
    %187 = arith.addf %185, %186 : vector<64x32xf32>
    %cst_42 = arith.constant 0.000000e+00 : f32
    %188 = vector.broadcast %cst_42 : f32 to vector<64x32xf32>
    %189 = arith.maximumf %187, %188 : vector<64x32xf32>
    %190 = arith.truncf %189 : vector<64x32xf32> to vector<64x32xbf16>
    %cst_43 = arith.constant dense<0.000000e+00> : vector<64x32xf32>
    %191 = tpu.matmul %190, %22, %cst_43 {dimension_numbers = #tpu.dot_dimension_numbers<[1], [0], [0], [1], [0, 0, 1, 1], [], []>} : vector<64x32xbf16>, vector<32x32xbf16>, vector<64x32xf32> -> vector<64x32xf32>
    %192 = vector.broadcast %32 : vector<1x32xf32> to vector<64x32xf32>
    %193 = arith.addf %191, %192 : vector<64x32xf32>
    %194 = arith.truncf %193 : vector<64x32xf32> to vector<64x32xbf16>
    %cst_44 = arith.constant dense<0.000000e+00> : vector<128x32xf32>
    %195 = tpu.matmul %10, %194, %cst_44 {dimension_numbers = #tpu.dot_dimension_numbers<[1], [0], [0], [1], [0, 0, 1, 1], [], []>} : vector<128x64xbf16>, vector<64x32xbf16>, vector<128x32xf32> -> vector<128x32xf32>
    %c127_i32_45 = arith.constant 127 : i32
    %196 = tpu.dynamic_rotate %137 by %c127_i32_45 dim 0 : vector<128x32xf32>, i32 -> vector<128x32xf32>
    %c1_i32_46 = arith.constant 1 : i32
    %197 = tpu.dynamic_rotate %137 by %c1_i32_46 dim 0 : vector<128x32xf32>, i32 -> vector<128x32xf32>
    %198 = arith.select %39, %196, %197 : vector<128x32xi1>, vector<128x32xf32>
    %199 = arith.truncf %195 : vector<128x32xf32> to vector<128x32xbf16>
    %cst_47 = arith.constant dense<0.000000e+00> : vector<128x384xf32>
    %200 = tpu.matmul %199, %16, %cst_47 {dimension_numbers = #tpu.dot_dimension_numbers<[1], [0], [0], [1], [0, 0, 1, 1], [], []>} : vector<128x32xbf16>, vector<32x384xbf16>, vector<128x384xf32> -> vector<128x384xf32>
    %201 = arith.truncf %198 : vector<128x32xf32> to vector<128x32xbf16>
    %cst_48 = arith.constant dense<0.000000e+00> : vector<128x384xf32>
    %202 = tpu.matmul %201, %17, %cst_48 {dimension_numbers = #tpu.dot_dimension_numbers<[1], [0], [0], [1], [0, 0, 1, 1], [], []>} : vector<128x32xbf16>, vector<32x384xbf16>, vector<128x384xf32> -> vector<128x384xf32>
    %203 = arith.addf %200, %202 : vector<128x384xf32>
    %204 = vector.broadcast %27 : vector<1x384xf32> to vector<128x384xf32>
    %205 = arith.addf %203, %204 : vector<128x384xf32>
    %206 = arith.truncf %137 : vector<128x32xf32> to vector<128x32xbf16>
    %cst_49 = arith.constant dense<0.000000e+00> : vector<128x384xf32>
    %207 = tpu.matmul %206, %18, %cst_49 {dimension_numbers = #tpu.dot_dimension_numbers<[1], [0], [0], [1], [0, 0, 1, 1], [], []>} : vector<128x32xbf16>, vector<32x384xbf16>, vector<128x384xf32> -> vector<128x384xf32>
    %208 = vector.broadcast %28 : vector<1x384xf32> to vector<128x384xf32>
    %209 = arith.addf %207, %208 : vector<128x384xf32>
    %210 = vector.extract_strided_slice %205 {offsets = [0, 0], sizes = [128, 32], strides = [1, 1]} : vector<128x384xf32> to vector<128x32xf32>
    %211 = vector.extract_strided_slice %209 {offsets = [0, 0], sizes = [128, 32], strides = [1, 1]} : vector<128x384xf32> to vector<128x32xf32>
    %212 = arith.addf %210, %211 : vector<128x32xf32>
    %213 = arith.negf %212 : vector<128x32xf32>
    %214 = math.exp %213 : vector<128x32xf32>
    %cst_50 = arith.constant 1.000000e+00 : f32
    %215 = vector.broadcast %cst_50 : f32 to vector<128x32xf32>
    %216 = arith.addf %215, %214 : vector<128x32xf32>
    %217 = arith.divf %215, %216 : vector<128x32xf32>
    %218 = vector.extract_strided_slice %205 {offsets = [0, 128], sizes = [128, 32], strides = [1, 1]} : vector<128x384xf32> to vector<128x32xf32>
    %219 = vector.extract_strided_slice %209 {offsets = [0, 128], sizes = [128, 32], strides = [1, 1]} : vector<128x384xf32> to vector<128x32xf32>
    %220 = arith.addf %218, %219 : vector<128x32xf32>
    %221 = arith.negf %220 : vector<128x32xf32>
    %222 = math.exp %221 : vector<128x32xf32>
    %cst_51 = arith.constant 1.000000e+00 : f32
    %223 = vector.broadcast %cst_51 : f32 to vector<128x32xf32>
    %224 = arith.addf %223, %222 : vector<128x32xf32>
    %225 = arith.divf %223, %224 : vector<128x32xf32>
    %226 = vector.extract_strided_slice %205 {offsets = [0, 256], sizes = [128, 32], strides = [1, 1]} : vector<128x384xf32> to vector<128x32xf32>
    %227 = vector.extract_strided_slice %209 {offsets = [0, 256], sizes = [128, 32], strides = [1, 1]} : vector<128x384xf32> to vector<128x32xf32>
    %228 = arith.mulf %217, %227 : vector<128x32xf32>
    %229 = arith.addf %226, %228 : vector<128x32xf32>
    %230 = math.tanh %229 : vector<128x32xf32>
    %cst_52 = arith.constant 1.000000e+00 : f32
    %231 = vector.broadcast %cst_52 : f32 to vector<128x32xf32>
    %232 = arith.subf %231, %225 : vector<128x32xf32>
    %233 = arith.mulf %232, %230 : vector<128x32xf32>
    %234 = arith.mulf %225, %137 : vector<128x32xf32>
    %235 = arith.addf %233, %234 : vector<128x32xf32>
    %236 = arith.truncf %235 : vector<128x32xf32> to vector<128x32xbf16>
    %cst_53 = arith.constant dense<0.000000e+00> : vector<128x32xf32>
    %237 = tpu.matmul %236, %23, %cst_53 {dimension_numbers = #tpu.dot_dimension_numbers<[1], [0], [0], [1], [0, 0, 1, 1], [], []>} : vector<128x32xbf16>, vector<32x32xbf16>, vector<128x32xf32> -> vector<128x32xf32>
    %238 = vector.broadcast %33 : vector<1x32xf32> to vector<128x32xf32>
    %239 = arith.addf %237, %238 : vector<128x32xf32>
    %cst_54 = arith.constant 0.000000e+00 : f32
    %240 = vector.broadcast %cst_54 : f32 to vector<128x32xf32>
    %241 = arith.maximumf %239, %240 : vector<128x32xf32>
    %242 = tpu.iota {dimensions = array<i32: 0>} : vector<16x128xi32>
    %243 = tpu.iota {dimensions = array<i32: 1>} : vector<16x128xi32>
    %c8_i32 = arith.constant 8 : i32
    %244 = vector.broadcast %c8_i32 : i32 to vector<16x128xi32>
    %245 = arith.muli %242, %244 : vector<16x128xi32>
    %246 = arith.cmpi sge, %243, %245 : vector<16x128xi32>
    %c8_i32_55 = arith.constant 8 : i32
    %247 = vector.broadcast %c8_i32_55 : i32 to vector<16x128xi32>
    %248 = arith.addi %245, %247 : vector<16x128xi32>
    %249 = arith.cmpi slt, %243, %248 : vector<16x128xi32>
    %250 = arith.andi %246, %249 : vector<16x128xi1>
    %cst_56 = arith.constant 1.000000e+00 : f32
    %cst_57 = arith.constant 0.000000e+00 : f32
    %251 = vector.broadcast %cst_56 : f32 to vector<16x128xf32>
    %252 = vector.broadcast %cst_57 : f32 to vector<16x128xf32>
    %253 = arith.select %250, %251, %252 : vector<16x128xi1>, vector<16x128xf32>
    %254 = arith.truncf %253 : vector<16x128xf32> to vector<16x128xbf16>
    %255 = arith.truncf %241 : vector<128x32xf32> to vector<128x32xbf16>
    %cst_58 = arith.constant dense<0.000000e+00> : vector<16x32xf32>
    %256 = tpu.matmul %254, %255, %cst_58 {dimension_numbers = #tpu.dot_dimension_numbers<[1], [0], [0], [1], [0, 0, 1, 1], [], []>} : vector<16x128xbf16>, vector<128x32xbf16>, vector<16x32xf32> -> vector<16x32xf32>
    %cst_59 = arith.constant 1.250000e-01 : f32
    %257 = vector.broadcast %cst_59 : f32 to vector<16x32xf32>
    %258 = arith.mulf %256, %257 : vector<16x32xf32>
    %259 = arith.truncf %258 : vector<16x32xf32> to vector<16x32xbf16>
    %cst_60 = arith.constant dense<0.000000e+00> : vector<16x32xf32>
    %260 = tpu.matmul %259, %24, %cst_60 {dimension_numbers = #tpu.dot_dimension_numbers<[1], [0], [0], [1], [0, 0, 1, 1], [], []>} : vector<16x32xbf16>, vector<32x32xbf16>, vector<16x32xf32> -> vector<16x32xf32>
    %261 = vector.broadcast %34 : vector<1x32xf32> to vector<16x32xf32>
    %262 = arith.addf %260, %261 : vector<16x32xf32>
    %c0_61 = arith.constant 0 : index
    %c0_62 = arith.constant 0 : index
    %c0_63 = arith.constant 0 : index
    %263 = vector.load %arg7[%c0_61, %c0_62, %c0_63] : memref<1x16x32xf32, #tpu.memory_space<vmem>>, vector<1x16x32xf32>
    %264 = vector.shape_cast %263 : vector<1x16x32xf32> to vector<16x32xf32>
    %265 = vector.shape_cast %262 : vector<16x32xf32> to vector<1x16x32xf32>
    tpu.vector_store %arg7[%c0_61, %c0_62, %c0_63], %265 {strides = array<i32>} : memref<1x16x32xf32, #tpu.memory_space<vmem>>, vector<1x16x32xf32>,
    return
  }
  func.func @transform_0(%arg0: i32) -> (i32, i32) {
    %c0_i32 = arith.constant 0 : i32
    %c0_i32_0 = arith.constant 0 : i32
    %c0_i32_1 = arith.constant 0 : i32
    return %c0_i32, %c0_i32_0 : i32, i32
  }
  func.func @transform_1(%arg0: i32) -> (i32, i32, i32) {
    %c0_i32 = arith.constant 0 : i32
    %c0_i32_0 = arith.constant 0 : i32
    %c0_i32_1 = arith.constant 0 : i32
    return %arg0, %c0_i32, %c0_i32_0 : i32, i32, i32
  }
  func.func @transform_2(%arg0: i32) -> (i32, i32, i32) {
    %c0_i32 = arith.constant 0 : i32
    %c0_i32_0 = arith.constant 0 : i32
    %c0_i32_1 = arith.constant 0 : i32
    return %arg0, %c0_i32, %c0_i32_0 : i32, i32, i32
  }
  func.func @transform_3(%arg0: i32) -> (i32, i32) {
    %c0_i32 = arith.constant 0 : i32
    %c0_i32_0 = arith.constant 0 : i32
    %c0_i32_1 = arith.constant 0 : i32
    return %c0_i32, %c0_i32_0 : i32, i32
  }
  func.func @transform_4(%arg0: i32) -> (i32, i32) {
    %c0_i32 = arith.constant 0 : i32
    %c0_i32_0 = arith.constant 0 : i32
    %c0_i32_1 = arith.constant 0 : i32
    return %c0_i32, %c0_i32_0 : i32, i32
  }
  func.func @transform_5(%arg0: i32) -> (i32, i32) {
    %c0_i32 = arith.constant 0 : i32
    %c0_i32_0 = arith.constant 0 : i32
    %c0_i32_1 = arith.constant 0 : i32
    return %c0_i32, %c0_i32_0 : i32, i32
  }
  func.func @transform_6(%arg0: i32) -> (i32, i32, i32) {
    %c0_i32 = arith.constant 0 : i32
    %c0_i32_0 = arith.constant 0 : i32
    %c0_i32_1 = arith.constant 0 : i32
    return %arg0, %c0_i32, %c0_i32_0 : i32, i32, i32
  }
}

</mosaic_0001>

<bundles_post_ra>
// kernel: gnn_pallas.1
= control target key start
LH: loop header
LB: loop body
LE: loop exit
PB: predicated region body
PF: predicated region fallthrough
CT: control target
= control target key end

     0   :  { %s7601_s21 = smov 0   ;;  %s9524_s0 = inlined_call_operand.vmem [shape: f32[2,32], index: 0, kind: input, shape index: {}]   ;;  %s9525_s1 = inlined_call_operand.vmem [shape: bf16[2,64,128], index: 1, kind: input, shape index: {}]   ;;  %s9526_s2 = inlined_call_operand.vmem [shape: bf16[2,128,64], index: 2, kind: input, shape index: {}]   ;;  %s9527_s3 = inlined_call_operand.vmem [shape: bf16[160,384], index: 3, kind: input, shape index: {}]   ;;  %s9528_s4 = inlined_call_operand.vmem [shape: bf16[192,32], index: 4, kind: input, shape index: {}]   ;;  %s9529_s5 = inlined_call_operand.vmem [shape: f32[10,384], index: 5, kind: input, shape index: {}]   ;;  %s9530_s6 = inlined_call_operand.vmem [shape: f32[2,16,32], index: 6, kind: output, shape index: {}]  }
   0x1 LB: > { %s5530_s22 = sadd.s32 4294967295, %s7560_s21   ;;  %p5534_p0 = scmp.ge.s32.totalorder %s7560_s21, 1  ;;  %s7560_s21 = sphi %s7601_s21, %s16_s21  }
   0x2   : > { %p222_p1 = scmp.lt.s32.totalorder %s7560_s21, 3 }
   0x4   : > { %p223_p2 = pnand %p5534_p0, %p222_p1 }
   0x6   : > { %226 = sbr.rel (%p223_p2) target bundleno = 4795 (0x12bb), region = 44 }
   0xd   : > { %v6957_v0 = vld [vmem:[%s9528_s4] sm:$0xff]   ;;  %v9535_v1 = vlaneseq  ;;  %v6958_v2 = vld [vmem:[%s9528_s4 + $0x8] sm:$0xff]   ;;  %vm9532_vm0 = vcmask 261120   ;;  %v6959_v8 = vld [vmem:[%s9528_s4 + $0x10] sm:$0xff]   ;;  %p257_p3 = scmp.lt.s32.totalorder %s5530_s22, 1  ;;  %vm9531_vm1 = vcmask 523264  }
   0xe   : > { %6117 = vmatprep.subr.bf16.mxu0 %v6957_v0  ;;  %v7618_v3 = vld [vmem:[%s9524_s0] sm:$0x3]  ;;  %6137 = vmatprep.subr.bf16.mxu1 %v6959_v8  ;;  %v6960_v9 = vld [vmem:[%s9528_s4 + $0x18] sm:$0xff]  }
   0xf   : > { %v7621_v4 = vshrl.u32 %v9535_v1, 7  ;;  %6118 = vmatpush3.bf16.msra.mxu0 %v6957_v0  ;;  %6138 = vmatpush3.bf16.msra.mxu1 %v6959_v8  ;;  %v7660_v11 = vld [vmem:[%s9529_s5] sm:$0xff]  ;;  %s9887_s22 = smov (!%p257_p3, %s5530_s22), 1 }
  0x10   : > { %6119 = vmatprep.subr.bf16.mxu0 %v6958_v2  ;;  %6139 = vmatprep.subr.bf16.mxu1 %v6960_v9  ;;  %s5896_s11 = sshll.u32 %s9887_s22, 5  ;;  %s5897_s15 = sshll.u32 %s9887_s22, 6 }
  0x11   : > { %9603 = vst [vmem:[#allocation2_spill] sm:$0xff] %v7621_v4  ;;  %v7624_v5 = vsub.s32 0, %v7621_v4  ;;  %v426_v10 = vsub.s32 4, %v7621_v4  ;;  %s7699_s14 = scalar_lea.vmem %s9525_s1, %s5896_s11  ;;  %s7706_s18 = scalar_lea.vmem %s9526_s2, %s5897_s15 }
  0x12   : > { %s5898_s19 = sshll.u32 %s9887_s22, 4 }
  0x13   : > { %9604 = vst [vmem:[#allocation3_spill] sm:$0xff] %v7624_v5  ;;  %v7628_v6 = vrot.slane %v7618_v3, %v7624_v5  ;;  %6120 = vmatpush3.bf16.msra.mxu0 %v6958_v2  ;;  %6140 = vmatpush3.bf16.msra.mxu1 %v6960_v9  ;;  %v7663_v12 = vrot.slane %v7660_v11, %v426_v10 }
  0x15   : > { %v7632_v7 = vpack.c.bf16 %v7628_v6, %v7628_v6 }
  0x17   : > { %6121 = vmatprep.mubr.msk.bf16.mxu0 %vm9532_vm0, %v7632_v7 }
  0x18   : > { %6122 = vmatmul.mubr.msk.bf16.vlgmr.msra.gmra.mrb[0].mxu0 %vm9532_vm0, %v7632_v7 }
  0x19   : > { %6125 = vmatprep.mubr.msk.bf16.mxu0 %vm9532_vm0, %v7632_v7 }
  0x20   : > { %6126 = vmatmul.mubr.msk.bf16.gmra.mrb[4].mxu0 %vm9532_vm0, %v7632_v7 }
  0x21   : > { %6129 = vmatprep.mubr.msk.bf16.mxu0 %vm9532_vm0, %v7632_v7 }
  0x28   : > { %6130 = vmatmul.mubr.msk.bf16.gmra.mrb[8].mxu0 %vm9532_vm0, %v7632_v7 }
  0x29   : > { %6133 = vmatprep.mubr.msk.bf16.mxu0 %vm9532_vm0, %v7632_v7 }
  0x30   : > { %6134 = vmatmul.mubr.msk.bf16.gmra.mrb[12].mxu0 %vm9532_vm0, %v7632_v7 }
  0xeb   : > { %v6123_v13 = vpop.f32.mrb[0].mxu0 }
  0xec   : > { %v487_v14 = vadd.f32 %v6123_v13, %v7663_v12  ;;  %v478_v15 = vpop.f32.mrb[1].mxu0  ;;  %v6961_v13 = vld [vmem:[%s7699_s14] sm:$0xff]  }
  0xed   : > { %v479_v16 = vadd.f32 %v478_v15, %v7663_v12  ;;  %v6124_v17 = vpop.f32.mrb[2].mxu0  ;;  %6173 = vmatprep.mubr.bf16.mxu0 %v6961_v13  ;;  %v7716_v15 = vld [vmem:[%s9527_s3 + $0x4] ss:$12 sps:$4 sm:$0xff]  }
  0xee   : > { %v490_v18 = vadd.f32 %v6124_v17, %v7663_v12  ;;  %v481_v19 = vpop.f32.mrb[3].mxu0  ;;  %v543_v21 = vmax.f32 %v487_v14, 0.0  ;;  %v7711_v14 = vld [vmem:[%s9527_s3] ss:$12 sps:$4 sm:$0xff]   ;;  %6557 = vmatprep.subr.bf16.mxu1 %v7716_v15  ;;  %v7728_v17 = vld [vmem:[%s9527_s3 + $0x18] ss:$12 sps:$4 sm:$0xff]  }
  0xef   : > { %v482_v20 = vadd.f32 %v481_v19, %v7663_v12  ;;  %v541_v23 = vmax.f32 %v479_v16, 0.0  ;;  %v7721_v16 = vld [vmem:[%s9527_s3 + $0x1c] ss:$12 sps:$4 sm:$0xff]  }
  0xf0   : > { %v544_v22 = vmax.f32 %v490_v18, 0.0  ;;  %v567_v18 = vsub.s32 5, %v7621_v4 }
  0xf1   : > { %v542_v24 = vmax.f32 %v482_v20, 0.0 }
  0xf2   : > { %v558_v25 = vpack.c.bf16 %v544_v22, %v543_v21  ;;  %v7734_v19 = vrot.slane %v7660_v11, %v567_v18  ;;  %v6978_v18 = vld [vmem:[%s9527_s3 + $0x4c] ss:$12 sps:$4 sm:$0xff]  }
  0xf3   : > { %v6127_v26 = vpop.f32.mrb[4].mxu0  ;;  %v557_v27 = vpack.c.bf16 %v542_v24, %v541_v23 }
  0xf4   : > { %v503_v28 = vadd.f32 %v6127_v26, %v7663_v12  ;;  %v494_v29 = vpop.f32.mrb[5].mxu0 }
  0xf5   : > { %v495_v30 = vadd.f32 %v494_v29, %v7663_v12  ;;  %v6128_v31 = vpop.f32.mrb[6].mxu0  ;;  %6141 = vmatprep.mubr.msk.bf16.mxu1 %vm9532_vm0, %v557_v27 }
  0xf6   : > { %v506_v32 = vadd.f32 %v6128_v31, %v7663_v12  ;;  %v497_v33 = vpop.f32.mrb[7].mxu0  ;;  %6142 = vmatmul.mubr.msk.bf16.vlgmr.msra.gmra.mrb[0].mxu1 %vm9532_vm0, %v558_v25  ;;  %v547_v35 = vmax.f32 %v503_v28, 0.0 }
  0xf7   : > { %v498_v34 = vadd.f32 %v497_v33, %v7663_v12  ;;  %v545_v37 = vmax.f32 %v495_v30, 0.0  ;;  %6559 = vmatpush1.bf16.msra.mxu1 %v7711_v14 }
  0xf8   : > { %v548_v36 = vmax.f32 %v506_v32, 0.0  ;;  %6558 = vmatprep.subr.bf16.mxu1 %v7721_v16 }
  0xf9   : > { %v546_v38 = vmax.f32 %v498_v34, 0.0 }
  0xfa   : > { %v560_v39 = vpack.c.bf16 %v548_v36, %v547_v35 }
  0xfb   : > { %v559_v40 = vpack.c.bf16 %v546_v38, %v545_v37  ;;  %v6131_v41 = vpop.f32.mrb[8].mxu0  ;;  %6560 = vmatpush1.bf16.msra.mxu1 %v7728_v17 }
  0xfc   : > { %v519_v42 = vadd.f32 %v6131_v41, %v7663_v12  ;;  %v510_v43 = vpop.f32.mrb[9].mxu0 }
  0xfd   : > { %v511_v44 = vadd.f32 %v510_v43, %v7663_v12  ;;  %v6132_v45 = vpop.f32.mrb[10].mxu0  ;;  %6145 = vmatprep.mubr.msk.bf16.mxu1 %vm9532_vm0, %v559_v40 }
  0xfe   : > { %v522_v46 = vadd.f32 %v6132_v45, %v7663_v12  ;;  %v513_v47 = vpop.f32.mrb[11].mxu0  ;;  %6146 = vmatmul.mubr.msk.bf16.gmra.mrb[4].mxu1 %vm9532_vm0, %v560_v39  ;;  %v551_v49 = vmax.f32 %v519_v42, 0.0 }
  0xff   : > { %v514_v48 = vadd.f32 %v513_v47, %v7663_v12  ;;  %v549_v51 = vmax.f32 %v511_v44, 0.0 }
 0x100   : > { %v552_v50 = vmax.f32 %v522_v46, 0.0 }
 0x101   : > { %v550_v52 = vmax.f32 %v514_v48, 0.0 }
 0x102   : > { %v562_v53 = vpack.c.bf16 %v552_v50, %v551_v49 }
 0x103   : > { %v561_v54 = vpack.c.bf16 %v550_v52, %v549_v51  ;;  %v6135_v55 = vpop.f32.mrb[12].mxu0 }
 0x104   : > { %v535_v56 = vadd.f32 %v6135_v55, %v7663_v12  ;;  %v526_v57 = vpop.f32.mrb[13].mxu0 }
 0x105   : > { %v527_v58 = vadd.f32 %v526_v57, %v7663_v12  ;;  %v6136_v59 = vpop.f32.mrb[14].mxu0  ;;  %6149 = vmatprep.mubr.msk.bf16.mxu1 %vm9532_vm0, %v561_v54 }
 0x106   : > { %v538_v60 = vadd.f32 %v6136_v59, %v7663_v12  ;;  %v529_v61 = vpop.f32.mrb[15].mxu0  ;;  %6150 = vmatmul.mubr.msk.bf16.gmra.mrb[8].mxu1 %vm9532_vm0, %v562_v53  ;;  %v555_v63 = vmax.f32 %v535_v56, 0.0 }
 0x107   : > { %v530_v62 = vadd.f32 %v529_v61, %v7663_v12  ;;  %v553_v2 = vmax.f32 %v527_v58, 0.0  ;;  %v6963_v61 = vld [vmem:[%s7699_s14 + $0x10] sm:$0xff]  }
 0x108   : > { %v556_v0 = vmax.f32 %v538_v60, 0.0  ;;  %v6962_v60 = vld [vmem:[%s7699_s14 + $0x8] sm:$0xff]  }
 0x109   : > { %v554_v8 = vmax.f32 %v530_v62, 0.0  ;;  %v6964_v62 = vld [vmem:[%s7699_s14 + $0x18] sm:$0xff]  }
 0x10a   : > { %v564_v9 = vpack.c.bf16 %v556_v0, %v555_v63  ;;  %v9536_v63 = vmov 0   ;;  %v6971_v0 = vld [vmem:[%s9527_s3 + $0x8] ss:$12 sps:$4 sm:$0xff]  }
 0x10b   : > { %v563_v10 = vpack.c.bf16 %v554_v8, %v553_v2  ;;  %v6975_v2 = vld [vmem:[%s9527_s3 + $0x34] ss:$12 sps:$4 sm:$0xff]  }
 0x10c   : > { %1045 = vmatprep.subr.bf16.mxu1 %v6975_v2 }
 0x10d   : > { %6153 = vmatprep.mubr.msk.bf16.mxu1 %vm9532_vm0, %v563_v10 }
 0x10e   : > { %6154 = vmatmul.mubr.msk.bf16.gmra.mrb[12].mxu1 %vm9532_vm0, %v564_v9 }
 0x10f   : > { %901 = vmatprep.mubr.bf16.mxu1 %v9536_v63 }
 0x1c9   : > { %v6143_v20 = vpop.f32.mrb[0].mxu1 }
 0x1ca   : > { %v639_v21 = vpop.f32.mrb[1].mxu1  ;;  %v648_v23 = vadd.f32 %v6143_v20, %v7734_v19 }
 0x1cb   : > { %v6144_v22 = vpop.f32.mrb[2].mxu1  ;;  %v640_v26 = vadd.f32 %v639_v21, %v7734_v19  ;;  %v6976_v21 = vld [vmem:[%s9527_s3 + $0x48] ss:$12 sps:$4 sm:$0xff]  }
 0x1cc   : > { %v651_v24 = vadd.f32 %v6144_v22, %v7734_v19  ;;  %v642_v25 = vpop.f32.mrb[3].mxu1  ;;  %v6979_v22 = vld [vmem:[%s9527_s3 + $0x38] ss:$12 sps:$4 sm:$0xff]  }
 0x1cd   : > { %v643_v27 = vadd.f32 %v642_v25, %v7734_v19 }
 0x1ce   : > { %v703_v28 = vpack.c.bf16 %v651_v24, %v648_v23 }
 0x1cf   : > { %v702_v29 = vpack.c.bf16 %v643_v27, %v640_v26 }
 0x1d1   : > { %v6147_v30 = vpop.f32.mrb[4].mxu1  ;;  %6157 = vmatprep.subr.bf16.mxu0 %v702_v29 }
 0x1d2   : > { %v655_v31 = vpop.f32.mrb[5].mxu1  ;;  %6158 = vmatpush3.bf16.msra.mxu0 %v702_v29  ;;  %v664_v33 = vadd.f32 %v6147_v30, %v7734_v19  ;;  %v6980_v29 = vld [vmem:[%s9527_s3 + $0x50] ss:$12 sps:$4 sm:$0xff]  }
 0x1d3   : > { %v6148_v32 = vpop.f32.mrb[6].mxu1  ;;  %6159 = vmatprep.subr.bf16.mxu0 %v703_v28  ;;  %v656_v36 = vadd.f32 %v655_v31, %v7734_v19 }
 0x1d4   : > { %v667_v34 = vadd.f32 %v6148_v32, %v7734_v19  ;;  %v658_v35 = vpop.f32.mrb[7].mxu1  ;;  %v6982_v32 = vld [vmem:[%s9528_s4 + $0x28] sm:$0xff]  }
 0x1d5   : > { %v659_v37 = vadd.f32 %v658_v35, %v7734_v19 }
 0x1d6   : > { %v705_v38 = vpack.c.bf16 %v667_v34, %v664_v33  ;;  %6160 = vmatpush3.bf16.msra.mxu0 %v703_v28  ;;  %v7787_v28 = vsub.s32 1, %v7621_v4 }
 0x1d7   : > { %v704_v39 = vpack.c.bf16 %v659_v37, %v656_v36 }
 0x1d8   : > { %9605 = vst [vmem:[#allocation4_spill] sm:$0xff] %v7787_v28  ;;  %v7798_v30 = vrot.slane %v7618_v3, %v7787_v28  ;;  %v6981_v3 = vld [vmem:[%s9528_s4 + $0x20] sm:$0xff]  }
 0x1d9   : > { %v6151_v40 = vpop.f32.mrb[8].mxu1  ;;  %6161 = vmatprep.subr.bf16.mxu0 %v704_v39 }
 0x1da   : > { %v671_v41 = vpop.f32.mrb[9].mxu1  ;;  %6162 = vmatpush3.bf16.msra.mxu0 %v704_v39  ;;  %v680_v43 = vadd.f32 %v6151_v40, %v7734_v19  ;;  %v997_v31 = vpack.c.bf16 %v7798_v30, %v7798_v30 }
 0x1db   : > { %v6152_v42 = vpop.f32.mrb[10].mxu1  ;;  %6163 = vmatprep.subr.bf16.mxu0 %v705_v38  ;;  %v672_v46 = vadd.f32 %v671_v41, %v7734_v19  ;;  %v371_v41 = vld [vmem:[%s9529_s5 + $0x8] sm:$0xff] }
 0x1dc   : > { %v683_v44 = vadd.f32 %v6152_v42, %v7734_v19  ;;  %v674_v45 = vpop.f32.mrb[11].mxu1  ;;  %v806_v42 = vrot.slane %v7660_v11, %v7624_v5 }
 0x1dd   : > { %v675_v47 = vadd.f32 %v674_v45, %v7734_v19 }
 0x1de   : > { %v707_v48 = vpack.c.bf16 %v683_v44, %v680_v43  ;;  %6164 = vmatpush3.bf16.msra.mxu0 %v705_v38  ;;  %v810_v43 = vrot.slane %v371_v41, %v7624_v5 }
 0x1df   : > { %v706_v49 = vpack.c.bf16 %v675_v47, %v672_v46 }
 0x1e1   : > { %v6155_v50 = vpop.f32.mrb[12].mxu1  ;;  %6165 = vmatprep.subr.bf16.mxu0 %v706_v49 }
 0x1e2   : > { %v687_v51 = vpop.f32.mrb[13].mxu1  ;;  %6166 = vmatpush3.bf16.msra.mxu0 %v706_v49  ;;  %v696_v53 = vadd.f32 %v6155_v50, %v7734_v19  ;;  %v1001_v49 = vrot.slane %v7660_v11, %v7787_v28 }
 0x1e3   : > { %v6156_v52 = vpop.f32.mrb[14].mxu1  ;;  %6167 = vmatprep.subr.bf16.mxu0 %v707_v48  ;;  %v688_v56 = vadd.f32 %v687_v51, %v7734_v19  ;;  %v1005_v51 = vrot.slane %v371_v41, %v7787_v28 }
 0x1e4   : > { %v699_v54 = vadd.f32 %v6156_v52, %v7734_v19  ;;  %v690_v55 = vpop.f32.mrb[15].mxu1 }
 0x1e5   : > { %v691_v57 = vadd.f32 %v690_v55, %v7734_v19 }
 0x1e6   : > { %v709_v58 = vpack.c.bf16 %v699_v54, %v696_v53  ;;  %6168 = vmatpush3.bf16.msra.mxu0 %v707_v48 }
 0x1e7   : > { %v708_v59 = vpack.c.bf16 %v691_v57, %v688_v56 }
 0x1e9   : > { %6169 = vmatprep.subr.bf16.mxu0 %v708_v59 }
 0x1ea   : > { %6170 = vmatpush3.bf16.msra.mxu0 %v708_v59 }
 0x1eb   : > { %6171 = vmatprep.subr.bf16.mxu0 %v709_v58 }
 0x1ee   : > { %6172 = vmatpush3.bf16.msra.mxu0 %v709_v58 }
 0x1ef   : > { %859 = vmatprep.subr.bf16.mxu0 %v7716_v15 }
 0x1f1   : > { %6174 = vmatmul.mubr.bf16.vlgmr.msra.gmra.mrb[16].mxu0 %v6962_v60 }
 0x1f2   : > { %6177 = vmatprep.mubr.bf16.mxu0 %v6963_v61  ;;  %860 = vmatpush1.bf16.msra.mxu0 %v7711_v14 }
 0x1f3   : > { %861 = vmatprep.subr.bf16.mxu0 %v7721_v16  ;;  %v6972_v16 = vld [vmem:[%s9527_s3 + $0x20] ss:$12 sps:$4 sm:$0xff]  }
 0x1f6   : > { %862 = vmatpush1.bf16.msra.mxu0 %v7728_v17  ;;  %v6973_v17 = vld [vmem:[%s9527_s3 + $0x30] ss:$12 sps:$4 sm:$0xff]  }
 0x1f7   : > { %6181 = vmatprep.subr.bf16.mxu0 %v6971_v0 }
 0x1f9   : > { %6178 = vmatmul.mubr.bf16.gmra.mrb[20].mxu0 %v6964_v62 }
 0x1fa   : > { %891 = vmatprep.mubr.bf16.mxu0 %v9536_v63 }
 0x2c4   : > { %v6175_v8 = vpop.f32.mrb[16].mxu0 }
 0x2c5   : > { %v768_v9 = vpop.f32.mrb[17].mxu0 }
 0x2c6   : > { %v6176_v10 = vpop.f32.mrb[18].mxu0 }
 0x2c7   : > { %v800_v13 = vpack.c.bf16 %v6176_v10, %v6175_v8  ;;  %v771_v14 = vpop.f32.mrb[19].mxu0 }
 0x2c8   : > { %v799_v15 = vpack.c.bf16 %v771_v14, %v768_v9 }
 0x2c9   : > { %5572 = vmatmul.mubr.msk.bf16.vlgmr.msra.gmra.mrb[16].mxu1 %vm9532_vm0, %v800_v13 }
 0x2ca   : > { %5571 = vmatmul.mubr.msk.bf16.vlgmr.msra.gmra.mrb[24].mxu0 %vm9532_vm0, %v799_v15  ;;  %911 = vmatprep.mubr.bf16.mxu1 %v9536_v63 }
 0x2cb   : > { %6182 = vmatpush3.bf16.msra.mxu0 %v6971_v0  ;;  %6185 = vmatprep.mubr.msk.bf16.mxu0 %vm9532_vm0, %v799_v15 }
 0x2cc   : > { %v6179_v20 = vpop.f32.mrb[20].mxu0  ;;  %6183 = vmatprep.subr.bf16.mxu0 %v6972_v16  ;;  %1046 = vmatpush1.bf16.msra.mxu1 %v6973_v17  ;;  %v7855_v17 = vadd.f32 %v1001_v49, %v806_v42 }
 0x2cd   : > { %v784_v23 = vpop.f32.mrb[21].mxu0  ;;  %1047 = vmatprep.subr.bf16.mxu1 %v6978_v18 }
 0x2ce   : > { %v6180_v24 = vpop.f32.mrb[22].mxu0  ;;  %9606 = vst [vmem:[#allocation5_spill] sm:$0xff] %v7855_v17 }
 0x2cf   : > { %v802_v25 = vpack.c.bf16 %v6180_v24, %v6179_v20  ;;  %v787_v26 = vpop.f32.mrb[23].mxu0  ;;  %6184 = vmatpush3.bf16.msra.mxu0 %v6972_v16  ;;  %v7857_v20 = vadd.f32 %v1005_v51, %v810_v43 }
 0x2d0   : > { %v801_v27 = vpack.c.bf16 %v787_v26, %v784_v23  ;;  %1048 = vmatpush1.bf16.msra.mxu1 %v6976_v21  ;;  %6193 = vmatprep.subr.bf16.mxu0 %v6979_v22 }
 0x2d1   : > { %9607 = vst [vmem:[#allocation6_spill] sm:$0xff] %v7857_v20 }
 0x2d2   : > { %5573 = vmatmul.mubr.msk.bf16.gmra.mrb[20].mxu1 %vm9532_vm0, %v801_v27  ;;  %6186 = vmatmul.mubr.msk.bf16.vlgmr.msra.gmra.mrb[28].mxu0 %vm9532_vm0, %v800_v13 }
 0x2d3   : > { %6189 = vmatprep.mubr.msk.bf16.mxu0 %vm9532_vm0, %v801_v27  ;;  %921 = vmatprep.mubr.bf16.mxu1 %v9536_v63 }
 0x2d4   : > { %6194 = vmatpush3.bf16.msra.mxu0 %v6979_v22 }
 0x2d5   : > { %6195 = vmatprep.subr.bf16.mxu0 %v6980_v29 }
 0x2d8   : > { %6196 = vmatpush3.bf16.msra.mxu0 %v6980_v29 }
 0x2d9   : > { %6205 = vmatprep.subr.bf16.mxu0 %v6981_v3 }
 0x2da   : > { %5574 = vmatmul.mubr.msk.bf16.gmra.mrb[24].mxu1 %vm9532_vm0, %v802_v25  ;;  %6190 = vmatmul.mubr.msk.bf16.gmra.mrb[32].mxu0 %vm9532_vm0, %v802_v25 }
 0x2db   : > { %1077 = vmatprep.mubr.bf16.mxu1 %v9536_v63  ;;  %6197 = vmatprep.mubr.msk.bf16.mxu0 %vm9532_vm0, %v997_v31 }
 0x2e2   : > { %5585 = vmatmul.mubr.msk.bf16.vlgmr.msra.gmra.mrb[28].mxu1 %vm9532_vm0, %v997_v31  ;;  %6198 = vmatmul.mubr.msk.bf16.vlgmr.msra.gmra.mrb[36].mxu0 %vm9532_vm0, %v997_v31 }
 0x2e3   : > { %1087 = vmatprep.mubr.bf16.mxu1 %v9536_v63  ;;  %6201 = vmatprep.mubr.msk.bf16.mxu0 %vm9532_vm0, %v997_v31 }
 0x2e4   : > { %6206 = vmatpush3.bf16.msra.mxu0 %v6981_v3 }
 0x2e5   : > { %6207 = vmatprep.subr.bf16.mxu0 %v6982_v32 }
 0x2e8   : > { %6208 = vmatpush3.bf16.msra.mxu0 %v6982_v32 }
 0x2ea   : > { %5586 = vmatmul.mubr.msk.bf16.gmra.mrb[16].mxu1 %vm9532_vm0, %v997_v31  ;;  %6202 = vmatmul.mubr.msk.bf16.gmra.mrb[40].mxu0 %vm9532_vm0, %v997_v31 }
 0x2eb   : > { %1097 = vmatprep.mubr.bf16.mxu1 %v9536_v63 }
 0x2f2   : > { %5587 = vmatmul.mubr.msk.bf16.gmra.mrb[20].mxu1 %vm9532_vm0, %v997_v31 }
 0x2f3   : > { %1107 = vmatprep.mubr.bf16.mxu1 %v9536_v63 }
 0x2fa   : > { %5588 = vmatmul.mubr.msk.bf16.gmra.mrb[24].mxu1 %vm9532_vm0, %v997_v31 }
 0x39d   : > { %v893_v33 = vpop.f32.mrb[24].mxu0 }
 0x39e   : > { %v895_v34 = vpop.f32.mrb[25].mxu0  ;;  %v894_v47 = vadd.f32 %v893_v33, %v806_v42 }
 0x39f   : > { %v897_v35 = vpop.f32.mrb[26].mxu0  ;;  %v896_v50 = vadd.f32 %v895_v34, %v810_v43 }
 0x3a0   : > { %v899_v36 = vpop.f32.mrb[27].mxu0  ;;  %v898_v52 = vadd.f32 %v897_v35, %v806_v42  ;;  %v6562_v54 = vadd.f32 %v1001_v49, %v894_v47 }
 0x3a1   : > { %v900_v53 = vadd.f32 %v899_v36, %v810_v43  ;;  %v6565_v56 = vadd.f32 %v1005_v51, %v896_v50 }
 0x3a2   : > { %v6568_v60 = vadd.f32 %v1001_v49, %v898_v52 }
 0x3a3   : > { %v6571_v2 = vadd.f32 %v1005_v51, %v900_v53 }
 0x3a5   : > { %v7822_v37 = vpop.f32.mrb[28].mxu0 }
 0x3a6   : > { %v7824_v38 = vpop.f32.mrb[29].mxu0 }
 0x3a7   : > { %v7826_v39 = vpop.f32.mrb[30].mxu0 }
 0x3a8   : > { %v7828_v40 = vpop.f32.mrb[31].mxu0 }
 0x3ad   : > { %v7836_v44 = vpop.f32.mrb[32].mxu0 }
 0x3ae   : > { %v7838_v45 = vpop.f32.mrb[33].mxu0 }
 0x3af   : > { %v7840_v46 = vpop.f32.mrb[34].mxu0 }
 0x3b0   : > { %v7842_v48 = vpop.f32.mrb[35].mxu0 }
 0x3b5   : > { %v1079_v55 = vpop.f32.mrb[28].mxu1  ;;  %v7847_v57 = vpop.f32.mrb[36].mxu0 }
 0x3b6   : > { %v6563_v58 = vadd.f32 %v6562_v54, %v1079_v55  ;;  %v1081_v59 = vpop.f32.mrb[29].mxu1  ;;  %v7849_v61 = vpop.f32.mrb[37].mxu0 }
 0x3b7   : > { %v6566_v62 = vadd.f32 %v6565_v56, %v1081_v59  ;;  %v1083_v0 = vpop.f32.mrb[30].mxu1  ;;  %v7851_v8 = vpop.f32.mrb[38].mxu0 }
 0x3b8   : > { %v5593_v9 = vmul.f32 -1.442695, %v6563_v58  ;;  %v6569_v10 = vadd.f32 %v6568_v60, %v1083_v0  ;;  %v1085_v13 = vpop.f32.mrb[31].mxu1  ;;  %v7853_v14 = vpop.f32.mrb[39].mxu0 }
 0x3b9   : > { %v5601_v15 = vmul.f32 -1.442695, %v6566_v62  ;;  %v6572_v16 = vadd.f32 %v6571_v2, %v1085_v13  ;;  %v372_v62 = vld [vmem:[%s9529_s5 + $0x10] sm:$0xff] }
 0x3ba   : > { %7021 = vpow2.f32 %v5593_v9  ;;  %v5594_v18 = vmul.f32 -1.442695, %v6569_v10  ;;  %v7878_v0 = vrot.slane %v372_v62, %v7787_v28 }
 0x3bb   : > { %v5602_v21 = vmul.f32 -1.442695, %v6572_v16 }
 0x3bc   : > { %7023 = vpow2.f32 %v5594_v18  ;;  %9608 = vst [vmem:[#allocation7_spill] sm:$0xff] %v7878_v0  ;;  %v7882_v18 = vrot.slane %v372_v62, %v7624_v5 }
 0x3bd   : > { %7025 = vpow2.f32 %v5601_v15  ;;  %v1089_v22 = vpop.f32.mrb[16].mxu1  ;;  %v7859_v23 = vpop.f32.mrb[40].mxu0 }
 0x3be   : > { %v6574_v24 = vadd.f32 %v7855_v17, %v1089_v22  ;;  %v1091_v25 = vpop.f32.mrb[17].mxu1  ;;  %v7862_v26 = vpop.f32.mrb[41].mxu0  ;;  %7027 = vpow2.f32 %v5602_v21  ;;  %9609 = vst [vmem:[#allocation8_spill] sm:$0xff] %v7882_v18 }
 0x3bf   : > { %v6576_v27 = vadd.f32 %v7857_v20, %v1091_v25  ;;  %v1093_v29 = vpop.f32.mrb[18].mxu1  ;;  %v7865_v31 = vpop.f32.mrb[42].mxu0 }
 0x3c0   : > { %v5595_v3 = vmul.f32 -1.442695, %v6574_v24  ;;  %v6578_v32 = vadd.f32 %v7855_v17, %v1093_v29  ;;  %v1095_v33 = vpop.f32.mrb[19].mxu1  ;;  %v7868_v34 = vpop.f32.mrb[43].mxu0 }
 0x3c1   : > { %v5603_v35 = vmul.f32 -1.442695, %v6576_v27  ;;  %v6580_v42 = vadd.f32 %v7857_v20, %v1095_v33 }
 0x3c2   : > { %7029 = vpow2.f32 %v5595_v3  ;;  %v5596_v36 = vmul.f32 -1.442695, %v6578_v32  ;;  %v1153_v3 = vadd.f32 %v7849_v61, %v7878_v0  ;;  %v967_v61 = vadd.f32 %v7824_v38, %v7882_v18 }
 0x3c3   : > { %v5604_v55 = vmul.f32 -1.442695, %v6580_v42  ;;  %v1161_v38 = vadd.f32 %v7847_v57, %v7878_v0 }
 0x3c4   : > { %v7022_v41 = vpop.eup %7021  ;;  %7031 = vpow2.f32 %v5596_v36 }
 0x3c5   : > { %v1215_v43 = vadd.f32 1.0, %v7022_v41  ;;  %v1099_v47 = vpop.f32.mrb[20].mxu1  ;;  %7033 = vpow2.f32 %v5603_v35  ;;  %v1156_v35 = vadd.f32 %v7853_v14, %v7878_v0 }
 0x3c6   : > { %v7024_v49 = vpop.eup %7023  ;;  %v6582_v50 = vadd.f32 %v7855_v17, %v1099_v47  ;;  %v1101_v51 = vpop.f32.mrb[21].mxu1 }
 0x3c7   : > { %v7026_v52 = vpop.eup %7025  ;;  %7035 = vrcp.f32 %v1215_v43  ;;  %v1216_v53 = vadd.f32 1.0, %v7024_v49  ;;  %v1103_v54 = vpop.f32.mrb[22].mxu1  ;;  %v6584_v58 = vadd.f32 %v7857_v20, %v1101_v51 }
 0x3c8   : > { %v5597_v56 = vmul.f32 -1.442695, %v6582_v50  ;;  %v6586_v59 = vadd.f32 %v7855_v17, %v1103_v54  ;;  %v1105_v60 = vpop.f32.mrb[23].mxu1  ;;  %v1271_v2 = vadd.f32 1.0, %v7026_v52  ;;  %v7028_v10 = vpop.eup %7027 }
 0x3c9   : > { %7037 = vrcp.f32 %v1216_v53  ;;  %v5605_v15 = vmul.f32 -1.442695, %v6584_v58  ;;  %v6588_v16 = vadd.f32 %v7857_v20, %v1105_v60  ;;  %v1272_v25 = vadd.f32 1.0, %v7028_v10 }
 0x3ca   : > { %v5598_v9 = vmul.f32 -1.442695, %v6586_v59  ;;  %7039 = vpow2.f32 %v5597_v56 }
 0x3cb   : > { %7041 = vpow2.f32 %v5604_v55  ;;  %v5606_v41 = vmul.f32 -1.442695, %v6588_v16  ;;  %v970_v55 = vadd.f32 %v7828_v40, %v7882_v18  ;;  %v1164_v40 = vadd.f32 %v7851_v8, %v7878_v0 }
 0x3cc   : > { %v7030_v13 = vpop.eup %7029  ;;  %7043 = vpow2.f32 %v5598_v9 }
 0x3cd   : > { %v1217_v21 = vadd.f32 1.0, %v7030_v13  ;;  %v1109_v22 = vpop.f32.mrb[24].mxu1  ;;  %7045 = vrcp.f32 %v1271_v2 }
 0x3ce   : > { %v7032_v24 = vpop.eup %7031  ;;  %v6590_v27 = vadd.f32 %v7855_v17, %v1109_v22  ;;  %v1111_v29 = vpop.f32.mrb[25].mxu1 }
 0x3cf   : > { %7047 = vrcp.f32 %v1217_v21  ;;  %v1218_v32 = vadd.f32 1.0, %v7032_v24  ;;  %v1113_v33 = vpop.f32.mrb[26].mxu1  ;;  %v7034_v36 = vpop.eup %7033  ;;  %v6592_v50 = vadd.f32 %v7857_v20, %v1111_v29  ;;  %v975_v24 = vadd.f32 %v7822_v37, %v7882_v18 }
 0x3d0   : > { %7049 = vpow2.f32 %v5605_v15  ;;  %v5599_v42 = vmul.f32 -1.442695, %v6590_v27  ;;  %v6594_v43 = vadd.f32 %v7855_v17, %v1113_v33  ;;  %v1115_v47 = vpop.f32.mrb[27].mxu1  ;;  %v1273_v54 = vadd.f32 1.0, %v7034_v36 }
 0x3d1   : > { %v7036_v49 = vpop.eup %7035  ;;  %7051 = vrcp.f32 %v1218_v32  ;;  %v6596_v14 = vadd.f32 %v7857_v20, %v1115_v47  ;;  %v5607_v60 = vmul.f32 -1.442695, %v6592_v50  ;;  %v1169_v37 = vadd.f32 %v7862_v26, %v7878_v0 }
 0x3d2   : > { %7053 = vrcp.f32 %v1272_v25  ;;  %v5600_v51 = vmul.f32 -1.442695, %v6594_v43  ;;  %v1295_v52 = vmul.f32 %v7036_v49, %v1153_v3  ;;  %v978_v3 = vadd.f32 %v7826_v39, %v7882_v18 }
 0x3d3   : > { %v7038_v53 = vpop.eup %7037  ;;  %7055 = vpow2.f32 %v5599_v42  ;;  %v5608_v13 = vmul.f32 -1.442695, %v6596_v14  ;;  %v1172_v39 = vadd.f32 %v7868_v34, %v7878_v0  ;;  %v986_v34 = vadd.f32 %v7842_v48, %v7882_v18 }
 0x3d4   : > { %7057 = vpow2.f32 %v5606_v41  ;;  %v1303_v56 = vadd.f32 %v1295_v52, %v967_v61  ;;  %v1296_v58 = vmul.f32 %v7038_v53, %v1156_v35  ;;  %v7040_v59 = vpop.eup %7039 }
 0x3d5   : > { %7059 = vpow2.f32 %v5600_v51  ;;  %v7042_v62 = vpop.eup %7041  ;;  %v1219_v2 = vadd.f32 1.0, %v7040_v59 }
 0x3d6   : > { %7061 = vtanh.f32 %v1303_v56  ;;  %v1304_v9 = vadd.f32 %v1296_v58, %v970_v55  ;;  %v7044_v10 = vpop.eup %7043  ;;  %v1274_v27 = vadd.f32 1.0, %v7042_v62  ;;  %v983_v55 = vadd.f32 %v7838_v45, %v7882_v18 }
 0x3d7   : > { %7063 = vrcp.f32 %v1273_v54  ;;  %v7046_v15 = vpop.eup %7045  ;;  %v1220_v16 = vadd.f32 1.0, %v7044_v10 }
 0x3d8   : > { %7065 = vrcp.f32 %v1219_v2  ;;  %v1319_v47 = vsub.f32 1.0, %v7046_v15  ;;  %v1335_v53 = vmul.f32 %v7046_v15, %v7798_v30 }
 0x3d9   : > { %v7048_v21 = vpop.eup %7047  ;;  %7067 = vpow2.f32 %v5607_v60 }
 0x3da   : > { %v7050_v22 = vpop.eup %7049  ;;  %7069 = vrcp.f32 %v1220_v16  ;;  %v1297_v25 = vmul.f32 %v7048_v21, %v1161_v38  ;;  %v1177_v21 = vadd.f32 %v7859_v23, %v7878_v0 }
 0x3db   : > { %v7052_v57 = vpop.eup %7051  ;;  %7071 = vpow2.f32 %v5608_v13  ;;  %v1275_v8 = vadd.f32 1.0, %v7050_v22 }
 0x3dc   : > { %v7054_v29 = vpop.eup %7053  ;;  %v1305_v32 = vadd.f32 %v1297_v25, %v975_v24  ;;  %v1298_v33 = vmul.f32 %v7052_v57, %v1164_v40  ;;  %7073 = vtanh.f32 %v1304_v9 }
 0x3dd   : > { %v7056_v35 = vpop.eup %7055  ;;  %v1320_v2 = vsub.f32 1.0, %v7054_v29  ;;  %v1336_v10 = vmul.f32 %v7054_v29, %v7798_v30  ;;  %v1180_v29 = vadd.f32 %v7865_v31, %v7878_v0 }
 0x3de   : > { %v7058_v36 = vpop.eup %7057  ;;  %v1221_v41 = vadd.f32 1.0, %v7056_v35  ;;  %7075 = vtanh.f32 %v1305_v32  ;;  %v1306_v42 = vadd.f32 %v1298_v33, %v978_v3 }
 0x3df   : > { %v7060_v43 = vpop.eup %7059  ;;  %7077 = vrcp.f32 %v1274_v27  ;;  %v1276_v51 = vadd.f32 1.0, %v7058_v36  ;;  %v991_v27 = vadd.f32 %v7836_v44, %v7882_v18 }
 0x3e0   : > { %v7062_v49 = vpop.eup %7061  ;;  %7079 = vrcp.f32 %v1221_v41  ;;  %v1222_v50 = vadd.f32 1.0, %v7060_v43  ;;  %v994_v41 = vadd.f32 %v7840_v46, %v7882_v18 }
 0x3e1   : > { %v7064_v61 = vpop.eup %7063  ;;  %7081 = vrcp.f32 %v1275_v8  ;;  %v1327_v52 = vmul.f32 %v7062_v49, %v1319_v47 }
 0x3e2   : > { %v7066_v54 = vpop.eup %7065  ;;  %7083 = vrcp.f32 %v1222_v50  ;;  %v1321_v9 = vsub.f32 1.0, %v7064_v61  ;;  %v1337_v40 = vmul.f32 %v7064_v61, %v7798_v30 }
 0x3e3   : > { %v7068_v14 = vpop.eup %7067  ;;  %7085 = vtanh.f32 %v1306_v42  ;;  %v1299_v26 = vmul.f32 %v7066_v54, %v1169_v37  ;;  %v7911_v56 = vadd.f32 %v1335_v53, %v1327_v52 }
 0x3e4   : > { %v7070_v58 = vpop.eup %7069  ;;  %7087 = vrcp.f32 %v1276_v51  ;;  %v1277_v13 = vadd.f32 1.0, %v7068_v14 }
 0x3e5   : > { %9610 = vst [vmem:[#allocation9_spill] sm:$0xff] %v7911_v56  ;;  %v7072_v59 = vpop.eup %7071  ;;  %v1307_v60 = vadd.f32 %v1299_v26, %v983_v55  ;;  %v1300_v62 = vmul.f32 %v7070_v58, %v1172_v39 }
 0x3e6   : > { %v7074_v38 = vpop.eup %7073  ;;  %v1278_v24 = vadd.f32 1.0, %v7072_v59 }
 0x3e7   : > { %7089 = vtanh.f32 %v1307_v60  ;;  %v1308_v45 = vadd.f32 %v1300_v62, %v986_v34  ;;  %v1328_v15 = vmul.f32 %v7074_v38, %v1320_v2 }
 0x3e8   : > { %v7076_v16 = vpop.eup %7075 }
 0x3e9   : > { %v7078_v48 = vpop.eup %7077  ;;  %v1329_v22 = vmul.f32 %v7076_v16, %v1321_v9  ;;  %7091 = vtanh.f32 %v1308_v45  ;;  %v7919_v25 = vadd.f32 %v1336_v10, %v1328_v15 }
 0x3ea   : > { %v7080_v57 = vpop.eup %7079  ;;  %7093 = vrcp.f32 %v1277_v13  ;;  %v1322_v8 = vsub.f32 1.0, %v7078_v48  ;;  %v1338_v31 = vmul.f32 %v7078_v48, %v7798_v30  ;;  %v1357_v48 = vsub.s32 6, %v7621_v4 }
 0x3eb   : > { %9611 = vst [vmem:[#allocation10_spill] sm:$0xff] %v7919_v25  ;;  %v7082_v3 = vpop.eup %7081  ;;  %v7925_v32 = vadd.f32 %v1337_v40, %v1329_v22  ;;  %v1301_v33 = vmul.f32 %v7080_v57, %v1177_v21  ;;  %v7929_v23 = vpack.c.bf16 %v7919_v25, %v7911_v56  ;;  %7095 = vrcp.f32 %v1278_v24  ;;  %v6983_v21 = vld [vmem:[%s9528_s4 + $0x30] sm:$0xff]  }
 0x3ec   : > { %v7084_v35 = vpop.eup %7083  ;;  %v1323_v50 = vsub.f32 1.0, %v7082_v3  ;;  %v1339_v52 = vmul.f32 %v7082_v3, %v7798_v30  ;;  %6217 = vmatprep.subr.bf16.mxu0 %v6983_v21  ;;  %v7976_v22 = vrot.slane %v7660_v11, %v1357_v48  ;;  %v378_v48 = vadd.s32 24, %v7621_v4 }
 0x3ed   : > { %9612 = vst [vmem:[#allocation11_spill] sm:$0xff] %v7925_v32  ;;  %v7086_v36 = vpop.eup %7085  ;;  %v1309_v44 = vadd.f32 %v1301_v33, %v991_v27  ;;  %v1302_v42 = vmul.f32 %v7084_v35, %v1180_v29  ;;  %6209 = vmatprep.mubr.msk.bf16.mxu0 %vm9532_vm0, %v7929_v23 }
 0x3ee   : > { %v1330_v43 = vmul.f32 %v7086_v36, %v1322_v8  ;;  %v7088_v37 = vpop.eup %7087  ;;  %9619 = vst [vmem:[#allocation18_spill] sm:$0xff] %v7976_v22 }
 0x3ef   : > { %7097 = vtanh.f32 %v1309_v44  ;;  %v1310_v47 = vadd.f32 %v1302_v42, %v994_v41  ;;  %v1324_v61 = vsub.f32 1.0, %v7088_v37  ;;  %v1340_v14 = vmul.f32 %v7088_v37, %v7798_v30 }
 0x3f0   : > { %v7936_v49 = vadd.f32 %v1338_v31, %v1330_v43 }
 0x3f1   : > { %v7090_v39 = vpop.eup %7089  ;;  %7099 = vtanh.f32 %v1310_v47 }
 0x3f2   : > { %9613 = vst [vmem:[#allocation12_spill] sm:$0xff] %v7936_v49  ;;  %v7940_v46 = vpack.c.bf16 %v7936_v49, %v7925_v32  ;;  %v1331_v51 = vmul.f32 %v7090_v39, %v1323_v50 }
 0x3f3   : > { %v7092_v53 = vpop.eup %7091 }
 0x3f4   : > { %6210 = vmatmul.mubr.msk.bf16.vlgmr.msra.gmra.mrb[44].mxu0 %vm9532_vm0, %v7940_v46  ;;  %v1332_v54 = vmul.f32 %v7092_v53, %v1324_v61  ;;  %v7946_v55 = vadd.f32 %v1339_v52, %v1331_v51  ;;  %v7094_v26 = vpop.eup %7093 }
 0x3f5   : > { %v7096_v34 = vpop.eup %7095  ;;  %v1325_v60 = vsub.f32 1.0, %v7094_v26  ;;  %v1341_v9 = vmul.f32 %v7094_v26, %v7798_v30  ;;  %6218 = vmatpush3.bf16.msra.mxu0 %v6983_v21  ;;  %v8010_v21 = vrot.slane %v7628_v6, 7 }
 0x3f6   : > { %9614 = vst [vmem:[#allocation13_spill] sm:$0xff] %v7946_v55  ;;  %v7948_v58 = vadd.f32 %v1340_v14, %v1332_v54  ;;  %v1326_v2 = vsub.f32 1.0, %v7096_v34  ;;  %v1342_v45 = vmul.f32 %v7096_v34, %v7798_v30  ;;  %v6984_v30 = vld [vmem:[%s9528_s4 + $0x38] sm:$0xff]  }
 0x3f7   : > { %6219 = vmatprep.subr.bf16.mxu0 %v6984_v30 }
 0x3f8   : > { %9615 = vst [vmem:[#allocation14_spill] sm:$0xff] %v7948_v58  ;;  %v7952_v59 = vpack.c.bf16 %v7948_v58, %v7946_v55 }
 0x3f9   : > { %v7098_v62 = vpop.eup %7097  ;;  %6220 = vmatpush3.bf16.msra.mxu0 %v6984_v30  ;;  %v377_v30 = vadd.s32 16, %v7621_v4 }
 0x3fa   : > { %6213 = vmatprep.mubr.msk.bf16.mxu0 %vm9532_vm0, %v7952_v59  ;;  %v1333_v38 = vmul.f32 %v7098_v62, %v1325_v60  ;;  %v6985_v62 = vld [vmem:[%s7706_s18] sm:$0xff]  }
 0x3fb   : > { %v7100_v10 = vpop.eup %7099  ;;  %6237 = vmatprep.mubr.msk.bf16.mxu1 %vm9531_vm1, %v6985_v62 }
 0x3fc   : > { %v1334_v13 = vmul.f32 %v7100_v10, %v1326_v2  ;;  %v7958_v15 = vadd.f32 %v1341_v9, %v1333_v38  ;;  %v6993_v2 = vld [vmem:[%s9527_s3 + $0x90] ss:$12 sps:$4 sm:$0xff]   ;;  %v6995_v38 = vld [vmem:[%s9527_s3 + $0x94] ss:$12 sps:$4 sm:$0xff]   ;;  %v6998_v9 = vld [vmem:[%s9527_s3 + $0xac] ss:$12 sps:$4 sm:$0xff]  }
 0x3fd   : > { %v8003_v10 = vadd.s32 8, %v7621_v4  ;;  %1811 = vmatprep.subr.bf16.mxu0 %v6995_v38 }
 0x3fe   : > { %9616 = vst [vmem:[#allocation15_spill] sm:$0xff] %v7958_v15  ;;  %v7960_v16 = vadd.f32 %v1342_v45, %v1334_v13  ;;  %v391_v13 = vand.u32 1, %v7621_v4  ;;  %v8007_v45 = vrot.slane %v7628_v6, 1 }
 0x3ff   : > { %9620 = vst [vmem:[#allocation19_spill] sm:$0xff] %v8003_v10 }
 0x400   : > { %9617 = vst [vmem:[#allocation16_spill] sm:$0xff] %v7960_v16  ;;  %v7964_v40 = vpack.c.bf16 %v7960_v16, %v7958_v15  ;;  %vm8018_vm2 = vcmp.eq.s32.totalorder %v391_v13, 0  ;;  %v9642_v13 = vmov 0 }
 0x402   : > { %9618 = vst [vmem:[#allocation17_spill] sm:$0xff] %v7964_v40  ;;  %6214 = vmatmul.mubr.msk.bf16.gmra.mrb[48].mxu0 %vm9532_vm0, %v7964_v40 }
 0x4c7   : > { %v6211_v24 = vpop.f32.mrb[44].mxu0 }
 0x4c8   : > { %v1426_v57 = vadd.f32 %v6211_v24, %v7976_v22  ;;  %v1417_v27 = vpop.f32.mrb[45].mxu0  ;;  %v6996_v24 = vld [vmem:[%s9527_s3 + $0xa8] ss:$12 sps:$4 sm:$0xff]  }
 0x4c9   : > { %v1418_v29 = vadd.f32 %v1417_v27, %v7976_v22  ;;  %v6212_v3 = vpop.f32.mrb[46].mxu0  ;;  %v9621_v27 = vmov 0 }
 0x4ca   : > { %v1429_v33 = vadd.f32 %v6212_v3, %v7976_v22  ;;  %v1420_v35 = vpop.f32.mrb[47].mxu0  ;;  %v1450_v36 = vmax.f32 %v1426_v57, 0.0  ;;  %v392_v57 = vand.u32 1, %v8003_v10  ;;  %v9622_v27 = vsel %vm8018_vm2, 4294967295, %v9621_v27 }
 0x4cb   : > { %v1421_v8 = vadd.f32 %v1420_v35, %v7976_v22  ;;  %v1448_v44 = vmax.f32 %v1418_v29, 0.0  ;;  %9623 = vst [vmem:[#allocation20_spill] sm:$0xff] %v9622_v27  ;;  %v1723_v29 = vsel %vm8018_vm2, %v8007_v45, %v8010_v21  ;;  %v393_v3 = vand.u32 1, %v377_v30  ;;  %v7001_v35 = vld [vmem:[%s9527_s3 + $0x64] ss:$12 sps:$4 sm:$0xff]  }
 0x4cc   : > { %v1451_v41 = vmax.f32 %v1429_v33, 0.0  ;;  %v394_v33 = vand.u32 1, %v378_v48  ;;  %vm8029_vm3 = vcmp.eq.s32.totalorder %v392_v57, 0  ;;  %v383_v30 = vadd.s32 64, %v7621_v4 }
 0x4cd   : > { %v1449_v42 = vmax.f32 %v1421_v8, 0.0  ;;  %v9624_v8 = vmov 0  ;;  %vm8042_vm4 = vcmp.eq.s32.totalorder %v393_v3, 0  ;;  %v384_v48 = vadd.s32 72, %v7621_v4 }
 0x4ce   : > { %v1457_v31 = vpack.c.bf16 %v1451_v41, %v1450_v36  ;;  %v9625_v8 = vsel %vm8029_vm3, 4294967295, %v9624_v8  ;;  %v1724_v36 = vsel %vm8029_vm3, %v8007_v45, %v8010_v21  ;;  %vm8046_vm5 = vcmp.eq.s32.totalorder %v394_v33, 0 }
 0x4cf   : > { %v1456_v43 = vpack.c.bf16 %v1449_v42, %v1448_v44  ;;  %9626 = vst [vmem:[#allocation21_spill] sm:$0xff] %v9625_v8  ;;  %v8037_v41 = vpack.c.bf16 %v1724_v36, %v1723_v29  ;;  %v6999_v44 = vld [vmem:[%s9527_s3 + $0x60] ss:$12 sps:$4 sm:$0xff]   ;;  %v9627_v42 = vmov 0  ;;  %v399_v29 = vand.u32 1, %v383_v30 }
 0x4d0   : > { %v9628_v42 = vsel %vm8042_vm4, 4294967295, %v9627_v42  ;;  %v400_v3 = vand.u32 1, %v384_v48  ;;  %v9648_v36 = vmov 0  ;;  %v9657_v48 = vmov 0 }
 0x4d1   : > { %6221 = vmatprep.mubr.msk.bf16.mxu0 %vm9532_vm0, %v1456_v43  ;;  %9629 = vst [vmem:[#allocation22_spill] sm:$0xff] %v9628_v42  ;;  %v379_v43 = vadd.s32 32, %v7621_v4  ;;  %vm8117_vm10 = vcmp.eq.s32.totalorder %v399_v29, 0  ;;  %v390_v29 = vadd.s32 120, %v7621_v4 }
 0x4d2   : > { %6222 = vmatmul.mubr.msk.bf16.vlgmr.msra.gmra.mrb[52].mxu0 %vm9532_vm0, %v1457_v31  ;;  %v9630_v31 = vmov 0  ;;  %vm8121_vm11 = vcmp.eq.s32.totalorder %v400_v3, 0 }
 0x4d3   : > { %1812 = vmatpush1.bf16.msra.mxu0 %v6993_v2  ;;  %v9631_v31 = vsel %vm8046_vm5, 4294967295, %v9630_v31  ;;  %v9649_v36 = vsel %vm8121_vm11, 4294967295, %v9648_v36 }
 0x4d4   : > { %1813 = vmatprep.subr.bf16.mxu0 %v6998_v9  ;;  %9632 = vst [vmem:[#allocation23_spill] sm:$0xff] %v9631_v31  ;;  %v9639_v9 = vmov 0  ;;  %9650 = vst [vmem:[#allocation29_spill] sm:$0xff] %v9649_v36 }
 0x4d5   : > { %v6215_v11 = vpop.f32.mrb[48].mxu0 }
 0x4d6   : > { %v1442_v37 = vadd.f32 %v6215_v11, %v7976_v22  ;;  %v1433_v47 = vpop.f32.mrb[49].mxu0  ;;  %v380_v11 = vadd.s32 40, %v7621_v4 }
 0x4d7   : > { %v1434_v50 = vadd.f32 %v1433_v47, %v7976_v22  ;;  %v6216_v39 = vpop.f32.mrb[50].mxu0  ;;  %1814 = vmatpush1.bf16.msra.mxu0 %v6996_v24  ;;  %v1725_v47 = vsel %vm8042_vm4, %v8007_v45, %v8010_v21 }
 0x4d8   : > { %v1445_v61 = vadd.f32 %v6216_v39, %v7976_v22  ;;  %v1436_v51 = vpop.f32.mrb[51].mxu0  ;;  %v1454_v53 = vmax.f32 %v1442_v37, 0.0  ;;  %2077 = vmatprep.subr.bf16.mxu0 %v7001_v35  ;;  %v7006_v37 = vld [vmem:[%s9527_s3 + $0x7c] ss:$12 sps:$4 sm:$0xff]   ;;  %v7004_v39 = vld [vmem:[%s9527_s3 + $0x78] ss:$12 sps:$4 sm:$0xff]  }
 0x4d9   : > { %v1437_v52 = vadd.f32 %v1436_v51, %v7976_v22  ;;  %v1452_v14 = vmax.f32 %v1434_v50, 0.0  ;;  %v1726_v50 = vsel %vm8046_vm5, %v8007_v45, %v8010_v21  ;;  %v396_v51 = vand.u32 1, %v380_v11 }
 0x4da   : > { %v1455_v54 = vmax.f32 %v1445_v61, 0.0  ;;  %v395_v61 = vand.u32 1, %v379_v43  ;;  %v9645_v35 = vmov 0  ;;  %v386_v43 = vadd.s32 88, %v7621_v4 }
 0x4db   : > { %v1453_v26 = vmax.f32 %v1437_v52, 0.0  ;;  %v8069_v52 = vpack.c.bf16 %v1726_v50, %v1725_v47  ;;  %vm8075_vm7 = vcmp.eq.s32.totalorder %v396_v51, 0  ;;  %v9646_v35 = vsel %vm8117_vm10, 4294967295, %v9645_v35 }
 0x4dc   : > { %v1459_v34 = vpack.c.bf16 %v1455_v54, %v1454_v53  ;;  %vm8071_vm6 = vcmp.eq.s32.totalorder %v395_v61, 0  ;;  %v9633_v53 = vmov 0  ;;  %v9636_v54 = vmov 0  ;;  %9647 = vst [vmem:[#allocation28_spill] sm:$0xff] %v9646_v35 }
 0x4dd   : > { %v1458_v60 = vpack.c.bf16 %v1453_v26, %v1452_v14  ;;  %v9634_v53 = vsel %vm8071_vm6, 4294967295, %v9633_v53  ;;  %v9637_v54 = vsel %vm8075_vm7, 4294967295, %v9636_v54  ;;  %v381_v14 = vadd.s32 48, %v7621_v4 }
 0x4de   : > { %9635 = vst [vmem:[#allocation24_spill] sm:$0xff] %v9634_v53  ;;  %9638 = vst [vmem:[#allocation25_spill] sm:$0xff] %v9637_v54  ;;  %v382_v26 = vadd.s32 56, %v7621_v4  ;;  %v1731_v11 = vsel %vm8117_vm10, %v8007_v45, %v8010_v21  ;;  %v402_v50 = vand.u32 1, %v386_v43  ;;  %v9651_v61 = vmov 0 }
 0x4df   : > { %6225 = vmatprep.mubr.msk.bf16.mxu0 %vm9532_vm0, %v1458_v60  ;;  %v1728_v60 = vsel %vm8075_vm7, %v8007_v45, %v8010_v21  ;;  %v397_v62 = vand.u32 1, %v381_v14  ;;  %v9654_v51 = vmov 0  ;;  %v387_v14 = vadd.s32 96, %v7621_v4 }
 0x4e0   : > { %6226 = vmatmul.mubr.msk.bf16.gmra.mrb[56].mxu0 %vm9532_vm0, %v1459_v34  ;;  %v1727_v34 = vsel %vm8071_vm6, %v8007_v45, %v8010_v21  ;;  %v398_v2 = vand.u32 1, %v382_v26  ;;  %vm8144_vm13 = vcmp.eq.s32.totalorder %v402_v50, 0  ;;  %v388_v26 = vadd.s32 104, %v7621_v4 }
 0x4e1   : > { %1843 = vmatprep.mubr.bf16.mxu0 %v9536_v63  ;;  %v8092_v38 = vpack.c.bf16 %v1728_v60, %v1727_v34  ;;  %vm8094_vm8 = vcmp.eq.s32.totalorder %v397_v62, 0  ;;  %v9655_v51 = vsel %vm8144_vm13, 4294967295, %v9654_v51  ;;  %v1734_v60 = vsel %vm8144_vm13, %v8007_v45, %v8010_v21 }
 0x4e2   : > { %v9640_v9 = vsel %vm8094_vm8, 4294967295, %v9639_v9  ;;  %vm8098_vm9 = vcmp.eq.s32.totalorder %v398_v2, 0  ;;  %v1729_v24 = vsel %vm8094_vm8, %v8007_v45, %v8010_v21  ;;  %9656 = vst [vmem:[#allocation31_spill] sm:$0xff] %v9655_v51  ;;  %v403_v62 = vand.u32 1, %v387_v14 }
 0x4e3   : > { %9641 = vst [vmem:[#allocation26_spill] sm:$0xff] %v9640_v9  ;;  %v9643_v13 = vsel %vm8098_vm9, 4294967295, %v9642_v13  ;;  %v1730_v57 = vsel %vm8098_vm9, %v8007_v45, %v8010_v21  ;;  %v404_v2 = vand.u32 1, %v388_v26  ;;  %v9666_v50 = vmov 0 }
 0x4e4   : > { %9644 = vst [vmem:[#allocation27_spill] sm:$0xff] %v9643_v13  ;;  %v8115_v33 = vpack.c.bf16 %v1730_v57, %v1729_v24  ;;  %vm8163_vm14 = vcmp.eq.s32.totalorder %v403_v62, 0  ;;  %v9660_v24 = vmov 0  ;;  %v389_v57 = vadd.s32 112, %v7621_v4  ;;  %v8214_v62 = vld [vmem:[%s9529_s5] sm:$0xff]  ;;  %v7510_v13 = vld [vmem:[%s9529_s5 + $0x8] sm:$0xff] }
 0x4e5   : > { %v9658_v48 = vsel %vm8163_vm14, 4294967295, %v9657_v48  ;;  %vm8167_vm15 = vcmp.eq.s32.totalorder %v404_v2, 0  ;;  %v1735_v3 = vsel %vm8163_vm14, %v8007_v45, %v8010_v21  ;;  %vm9679_vm13 = vcmask 261120  }
 0x4e6   : > { %9659 = vst [vmem:[#allocation32_spill] sm:$0xff] %v9658_v48  ;;  %v9661_v24 = vsel %vm8167_vm15, 4294967295, %v9660_v24  ;;  %v405_v43 = vand.u32 1, %v389_v57  ;;  %vm9680_vm10 = vmmov %vm9679_vm13  ;;  %v8438_v51 = vsub.s32 2, %v7621_v4 }
 0x4e7   : > { %9662 = vst [vmem:[#allocation33_spill] sm:$0xff] %v9661_v24 }
 0x4e8   : > { %5643 = vmatmul.mubr.msk.bf16.vlgmr.msra.gmra.mrb[60].mxu0 %vm9532_vm0, %v8037_v41  ;;  %vm8186_vm1 = vcmp.eq.s32.totalorder %v405_v43, 0  ;;  %v2290_v35 = vrot.slane %v8214_v62, %v8438_v51  ;;  %v2294_v53 = vrot.slane %v7510_v13, %v8438_v51 }
 0x4e9   : > { %1853 = vmatprep.mubr.bf16.mxu0 %v9536_v63  ;;  %2078 = vmatpush1.bf16.msra.mxu0 %v6999_v44  ;;  %v385_v44 = vadd.s32 80, %v7621_v4  ;;  %v1737_v14 = vsel %vm8186_vm1, %v8007_v45, %v8010_v21 }
 0x4ea   : > { %2079 = vmatprep.subr.bf16.mxu0 %v7006_v37  ;;  %v1732_v37 = vsel %vm8121_vm11, %v8007_v45, %v8010_v21  ;;  %vm9681_vm11 = vmmov %vm9680_vm10 }
 0x4eb   : > { %v401_v47 = vand.u32 1, %v385_v44  ;;  %v1736_v44 = vsel %vm8167_vm15, %v8007_v45, %v8010_v21 }
 0x4ed   : > { %2080 = vmatpush1.bf16.msra.mxu0 %v7004_v39  ;;  %v8138_v39 = vpack.c.bf16 %v1732_v37, %v1731_v11  ;;  %vm8140_vm12 = vcmp.eq.s32.totalorder %v401_v47, 0  ;;  %v406_v11 = vand.u32 1, %v390_v29  ;;  %v8184_v37 = vpack.c.bf16 %v1736_v44, %v1735_v3 }
 0x4ee   : > { %v9652_v61 = vsel %vm8140_vm12, 4294967295, %v9651_v61  ;;  %v1733_v34 = vsel %vm8140_vm12, %v8007_v45, %v8010_v21  ;;  %v9663_v47 = vmov 0  ;;  %vm9669_vm12 = vcmask 261120  }
 0x4ef   : > { %9653 = vst [vmem:[#allocation30_spill] sm:$0xff] %v9652_v61  ;;  %v8161_v30 = vpack.c.bf16 %v1734_v60, %v1733_v34  ;;  %v9664_v47 = vsel %vm8186_vm1, 4294967295, %v9663_v47  ;;  %vm9670_vm14 = vmmov %vm9669_vm12  ;;  %v1462_v60 = vsub.s32 7, %v7621_v4  ;;  %v8435_v61 = vsub.s32 3, %v7621_v4 }
 0x4f0   : > { %5644 = vmatmul.mubr.msk.bf16.gmra.mrb[64].mxu0 %vm9532_vm0, %v8069_v52  ;;  %9665 = vst [vmem:[#allocation34_spill] sm:$0xff] %v9664_v47 }
 0x4f1   : > { %1863 = vmatprep.mubr.bf16.mxu0 %v9536_v63  ;;  %v8217_v2 = vrot.slane %v8214_v62, %v1462_v60  ;;  %v2350_v36 = vrot.slane %v8214_v62, %v8435_v61  ;;  %v2354_v54 = vrot.slane %v7510_v13, %v8435_v61 }
 0x4f3   : > { %9671 = vst [vmem:[#allocation36_spill] sm:$0xff] %v8217_v2  ;;  %v8457_v27 = vadd.f32 %v2350_v36, %v2290_v35  ;;  %v8459_v4 = vadd.f32 %v2354_v54, %v2294_v53 }
 0x4f5   : > { %9716 = vst [vmem:[#allocation37_spill] sm:$0xff] %v8457_v27  ;;  %9717 = vst [vmem:[#allocation38_spill] sm:$0xff] %v8459_v4 }
 0x4f8   : > { %5645 = vmatmul.mubr.msk.bf16.gmra.mrb[68].mxu0 %vm9532_vm0, %v8092_v38 }
 0x4f9   : > { %1873 = vmatprep.mubr.bf16.mxu0 %v9536_v63 }
 0x500   : > { %5646 = vmatmul.mubr.msk.bf16.gmra.mrb[72].mxu0 %vm9532_vm0, %v8115_v33 }
 0x501   : > { %1883 = vmatprep.mubr.bf16.mxu0 %v9536_v63 }
 0x508   : > { %5647 = vmatmul.mubr.msk.bf16.gmra.mrb[76].mxu0 %vm9532_vm0, %v8138_v39 }
 0x509   : > { %1893 = vmatprep.mubr.bf16.mxu0 %v9536_v63 }
 0x510   : > { %5648 = vmatmul.mubr.msk.bf16.gmra.mrb[80].mxu0 %vm9532_vm0, %v8161_v30  ;;  %vm8190_vm0 = vcmp.eq.s32.totalorder %v406_v11, 0 }
 0x511   : > { %1903 = vmatprep.mubr.bf16.mxu0 %v9536_v63  ;;  %v9667_v50 = vsel %vm8190_vm0, 4294967295, %v9666_v50  ;;  %v1738_v26 = vsel %vm8190_vm0, %v8007_v45, %v8010_v21 }
 0x512   : > { %9668 = vst [vmem:[#allocation35_spill] sm:$0xff] %v9667_v50  ;;  %v8205_v34 = vpack.c.bf16 %v1738_v26, %v1737_v14 }
 0x518   : > { %5649 = vmatmul.mubr.msk.bf16.gmra.mrb[84].mxu0 %vm9669_vm12, %v8184_v37  ;;  %vm9672_vm12 = vcmask 523264  }
 0x519   : > { %1913 = vmatprep.mubr.bf16.mxu0 %v9536_v63  ;;  %vm9674_vm0 = vmmov %vm9672_vm12 }
 0x51a   : > { %vm9675_vm1 = vmmov %vm9674_vm0 }
 0x51b   : > { %vm9676_vm15 = vmmov %vm9674_vm0 }
 0x520   : > { %5650 = vmatmul.mubr.msk.bf16.gmra.mrb[88].mxu0 %vm9670_vm14, %v8205_v34  ;;  %vm9673_vm14 = vmmov %vm9672_vm12 }
 0x521   : > { %2109 = vmatprep.mubr.bf16.mxu0 %v9536_v63 }
 0x5a5   : > { %v6223_v57 = vpop.f32.mrb[52].mxu0 }
 0x5a6   : > { %v1522_v29 = vpop.f32.mrb[53].mxu0  ;;  %v1531_v21 = vadd.f32 %v6223_v57, %v8217_v2 }
 0x5a7   : > { %v6224_v45 = vpop.f32.mrb[54].mxu0  ;;  %v1523_v43 = vadd.f32 %v1522_v29, %v8217_v2 }
 0x5a8   : > { %v1534_v3 = vadd.f32 %v6224_v45, %v8217_v2  ;;  %v1525_v44 = vpop.f32.mrb[55].mxu0 }
 0x5a9   : > { %v1526_v11 = vadd.f32 %v1525_v44, %v8217_v2 }
 0x5aa   : > { %v1554_v14 = vpack.c.bf16 %v1534_v3, %v1531_v21 }
 0x5ab   : > { %v1553_v26 = vpack.c.bf16 %v1526_v11, %v1523_v43  ;;  %v7002_v43 = vld [vmem:[%s9527_s3 + $0x98] ss:$12 sps:$4 sm:$0xff]   ;;  %v6986_v11 = vld [vmem:[%s7706_s18 + $0x8] sm:$0xff]  }
 0x5ad   : > { %6229 = vmatprep.subr.bf16.mxu1 %v1553_v26 }
 0x5ae   : > { %6230 = vmatpush3.bf16.msra.mxu1 %v1553_v26  ;;  %v6989_v26 = vld [vmem:[%s7706_s18 + $0x20] sm:$0xff]  }
 0x5af   : > { %6231 = vmatprep.subr.bf16.mxu1 %v1554_v14 }
 0x5b2   : > { %6232 = vmatpush3.bf16.msra.mxu1 %v1554_v14  ;;  %v6988_v14 = vld [vmem:[%s7706_s18 + $0x18] sm:$0xff]  }
 0x5b3   : > { %v6227_v60 = vpop.f32.mrb[56].mxu0 }
 0x5b4   : > { %v1538_v1 = vpop.f32.mrb[57].mxu0  ;;  %v1547_v57 = vadd.f32 %v6227_v60, %v8217_v2  ;;  %v6990_v60 = vld [vmem:[%s7706_s18 + $0x28] sm:$0xff]  }
 0x5b5   : > { %v6228_v63 = vpop.f32.mrb[58].mxu0  ;;  %v1539_v29 = vadd.f32 %v1538_v1, %v8217_v2  ;;  %v7003_v1 = vld [vmem:[%s9527_s3 + $0xb0] ss:$12 sps:$4 sm:$0xff]  }
 0x5b6   : > { %v1550_v45 = vadd.f32 %v6228_v63, %v8217_v2  ;;  %v1541_v28 = vpop.f32.mrb[59].mxu0  ;;  %v6987_v63 = vld [vmem:[%s7706_s18 + $0x10] sm:$0xff]  }
 0x5b7   : > { %v1542_v44 = vadd.f32 %v1541_v28, %v8217_v2  ;;  %v7007_v28 = vld [vmem:[%s9527_s3 + $0x68] ss:$12 sps:$4 sm:$0xff]  }
 0x5b8   : > { %v1556_v21 = vpack.c.bf16 %v1550_v45, %v1547_v57  ;;  %v6991_v57 = vld [vmem:[%s7706_s18 + $0x30] sm:$0xff]   ;;  %v6992_v45 = vld [vmem:[%s7706_s18 + $0x38] sm:$0xff]  }
 0x5b9   : > { %v1555_v3 = vpack.c.bf16 %v1542_v44, %v1539_v29  ;;  %v7009_v44 = vld [vmem:[%s9527_s3 + $0xc0] ss:$12 sps:$4 sm:$0xff]  }
 0x5bb   : > { %6233 = vmatprep.subr.bf16.mxu1 %v1555_v3 }
 0x5bc   : > { %6234 = vmatpush3.bf16.msra.mxu1 %v1555_v3  ;;  %v7016_v3 = vld [vmem:[%s9527_s3 + $0xe0] ss:$12 sps:$4 sm:$0xff]  }
 0x5bd   : > { %6235 = vmatprep.subr.bf16.mxu1 %v1556_v21 }
 0x5c0   : > { %6236 = vmatpush3.bf16.msra.mxu1 %v1556_v21  ;;  %v7014_v21 = vld [vmem:[%s9527_s3 + $0xdc] ss:$12 sps:$4 sm:$0xff]  }
 0x5c1   : > { %6253 = vmatprep.subr.bf16.mxu1 %v7002_v43 }
 0x5c3   : > { %6238 = vmatmul.mubr.msk.bf16.vlgmr.msra.gmra.mrb[32].mxu1 %vm9672_vm12, %v6986_v11  ;;  %vm9677_vm12 = vmmov %vm9674_vm0 }
 0x5c4   : > { %6241 = vmatprep.mubr.msk.bf16.mxu1 %vm9673_vm14, %v6987_v63  ;;  %6254 = vmatpush3.bf16.msra.mxu1 %v7002_v43  ;;  %vm9678_vm14 = vmmov %vm9674_vm0  ;;  %v9690_v43 = vmov 0   ;;  %v7012_v63 = vld [vmem:[%s9527_s3 + $0xd8] ss:$12 sps:$4 sm:$0xff]  }
 0x5c5   : > { %6255 = vmatprep.subr.bf16.mxu1 %v7003_v1 }
 0x5c8   : > { %6256 = vmatpush3.bf16.msra.mxu1 %v7003_v1 }
 0x5c9   : > { %6273 = vmatprep.subr.bf16.mxu1 %v7007_v28 }
 0x5cb   : > { %6242 = vmatmul.mubr.msk.bf16.gmra.mrb[36].mxu1 %vm9674_vm0, %v6988_v14  ;;  %vm9682_vm0 = vmmov %vm9680_vm10 }
 0x5cc   : > { %6245 = vmatprep.mubr.msk.bf16.mxu1 %vm9675_vm1, %v6989_v26  ;;  %vm9683_vm1 = vmmov %vm9682_vm0 }
 0x5d3   : > { %6246 = vmatmul.mubr.msk.bf16.gmra.mrb[40].mxu1 %vm9676_vm15, %v6990_v60  ;;  %vm9684_vm15 = vmmov %vm9682_vm0 }
 0x5d4   : > { %6249 = vmatprep.mubr.msk.bf16.mxu1 %vm9677_vm12, %v6991_v57  ;;  %vm9685_vm12 = vmmov %vm9682_vm0  ;;  %v7502_v57 = vld [vmem:[%s9528_s4] sm:$0xff]  }
 0x5db   : > { %6250 = vmatmul.mubr.msk.bf16.gmra.mrb[44].mxu1 %vm9678_vm14, %v6992_v45  ;;  %vm9689_vm14 = vmmov %vm9682_vm0  ;;  %v7503_v45 = vld [vmem:[%s9527_s3 + $0x4] ss:$12 sps:$4 sm:$0xff]  }
 0x5dc   : > { %6257 = vmatprep.mubr.msk.bf16.mxu1 %vm9679_vm13, %v8037_v41  ;;  %vm9686_vm13 = vmmov %vm9682_vm0  ;;  %v7008_v41 = vld [vmem:[%s9527_s3 + $0x80] ss:$12 sps:$4 sm:$0xff]  }
 0x5e3   : > { %6258 = vmatmul.mubr.msk.bf16.vlgmr.msra.gmra.mrb[48].mxu1 %vm9680_vm10, %v8069_v52  ;;  %v7011_v52 = vld [vmem:[%s9527_s3 + $0xc4] ss:$12 sps:$4 sm:$0xff]   ;;  %vm9687_vm10 = vmmov %vm9682_vm0 }
 0x5e4   : > { %6261 = vmatprep.mubr.msk.bf16.mxu1 %vm9681_vm11, %v8092_v38  ;;  %6274 = vmatpush3.bf16.msra.mxu1 %v7007_v28  ;;  %v7015_v38 = vld [vmem:[%s9527_s3 + $0xc8] ss:$12 sps:$4 sm:$0xff]   ;;  %vm9688_vm11 = vmmov %vm9682_vm0 }
 0x5e5   : > { %6275 = vmatprep.subr.bf16.mxu1 %v7008_v41  ;;  %2391 = vmatprep.subr.bf16.mxu0 %v7011_v52 }
 0x5e8   : > { %6276 = vmatpush3.bf16.msra.mxu1 %v7008_v41 }
 0x5e9   : > { %6293 = vmatprep.subr.bf16.mxu1 %v7015_v38 }
 0x5eb   : > { %6262 = vmatmul.mubr.msk.bf16.gmra.mrb[52].mxu1 %vm9682_vm0, %v8115_v33 }
 0x5ec   : > { %6265 = vmatprep.mubr.msk.bf16.mxu1 %vm9683_vm1, %v8138_v39  ;;  %vm9691_vm1 = vmmov %vm9682_vm0 }
 0x5f3   : > { %6266 = vmatmul.mubr.msk.bf16.gmra.mrb[56].mxu1 %vm9684_vm15, %v8161_v30  ;;  %vm9692_vm15 = vmmov %vm9682_vm0 }
 0x5f4   : > { %6269 = vmatprep.mubr.msk.bf16.mxu1 %vm9685_vm12, %v8184_v37  ;;  %vm9693_vm12 = vmmov %vm9682_vm0 }
 0x5fb   : > { %6270 = vmatmul.mubr.msk.bf16.gmra.mrb[60].mxu1 %vm9686_vm13, %v8205_v34  ;;  %vm9694_vm13 = vmmov %vm9682_vm0 }
 0x696   : > { %v6239_v33 = vpop.f32.mrb[32].mxu1 }
 0x697   : > { %v1656_v39 = vpop.f32.mrb[33].mxu1 }
 0x698   : > { %v6240_v30 = vpop.f32.mrb[34].mxu1 }
 0x699   : > { %v1740_v37 = vpack.c.bf16 %v6240_v30, %v6239_v33  ;;  %v1659_v34 = vpop.f32.mrb[35].mxu1 }
 0x69a   : > { %v1739_v29 = vpack.c.bf16 %v1659_v34, %v1656_v39 }
 0x69c   : > { %5665 = vmatmul.mubr.msk.bf16.vlgmr.msra.gmra.mrb[60].mxu0 %vm9687_vm10, %v1739_v29  ;;  %6277 = vmatprep.mubr.msk.bf16.mxu1 %vm9688_vm11, %v1739_v29  ;;  %vm9695_vm10 = vmmov %vm9682_vm0 }
 0x69d   : > { %6278 = vmatmul.mubr.msk.bf16.vlgmr.msra.gmra.mrb[48].mxu1 %vm9689_vm14, %v1740_v37  ;;  %2119 = vmatprep.mubr.bf16.mxu0 %v9690_v43  ;;  %vm9696_vm11 = vmmov %vm9682_vm0 }
 0x69e   : > { %v6243_v11 = vpop.f32.mrb[36].mxu1  ;;  %2392 = vmatpush1.bf16.msra.mxu0 %v7009_v44  ;;  %6294 = vmatpush3.bf16.msra.mxu1 %v7015_v38  ;;  %vm9697_vm14 = vmmov %vm9682_vm0 }
 0x69f   : > { %v1672_v1 = vpop.f32.mrb[37].mxu1  ;;  %2393 = vmatprep.subr.bf16.mxu0 %v7014_v21  ;;  %6295 = vmatprep.subr.bf16.mxu1 %v7016_v3 }
 0x6a0   : > { %v6244_v28 = vpop.f32.mrb[38].mxu1 }
 0x6a1   : > { %v1742_v14 = vpack.c.bf16 %v6244_v28, %v6243_v11  ;;  %v1675_v26 = vpop.f32.mrb[39].mxu1  ;;  %v7504_v11 = vld [vmem:[%s9528_s4 + $0x8] sm:$0xff]  }
 0x6a2   : > { %v1741_v60 = vpack.c.bf16 %v1675_v26, %v1672_v1  ;;  %2394 = vmatpush1.bf16.msra.mxu0 %v7012_v63  ;;  %6296 = vmatpush3.bf16.msra.mxu1 %v7016_v3  ;;  %v8323_v63 = vld [vmem:[%s9528_s4 + $0x10] sm:$0xff]   ;;  %v7506_v1 = vld [vmem:[%s9527_s3] ss:$12 sps:$4 sm:$0xff]   ;;  %v7507_v28 = vld [vmem:[%s9527_s3 + $0x1c] ss:$12 sps:$4 sm:$0xff]  }
 0x6a3   : > { %6313 = vmatprep.subr.bf16.mxu1 %v7502_v57  ;;  %3300 = vmatprep.subr.bf16.mxu0 %v7503_v45  ;;  %v7509_v26 = vld [vmem:[%s9527_s3 + $0x34] ss:$12 sps:$4 sm:$0xff]  }
 0x6a4   : > { %5666 = vmatmul.mubr.msk.bf16.gmra.mrb[64].mxu0 %vm9682_vm0, %v1740_v37  ;;  %6281 = vmatprep.mubr.msk.bf16.mxu1 %vm9691_vm1, %v1741_v60  ;;  %vm9698_vm1 = vmmov %vm9682_vm0 }
 0x6a5   : > { %6282 = vmatmul.mubr.msk.bf16.gmra.mrb[52].mxu1 %vm9692_vm15, %v1742_v14  ;;  %2129 = vmatprep.mubr.bf16.mxu0 %v9690_v43  ;;  %vm9699_vm15 = vmmov %vm9682_vm0 }
 0x6a6   : > { %v6247_v41 = vpop.f32.mrb[40].mxu1 }
 0x6a7   : > { %v1688_v52 = vpop.f32.mrb[41].mxu1 }
 0x6a8   : > { %v6248_v38 = vpop.f32.mrb[42].mxu1 }
 0x6a9   : > { %v1744_v33 = vpack.c.bf16 %v6248_v38, %v6247_v41  ;;  %v1691_v39 = vpop.f32.mrb[43].mxu1 }
 0x6aa   : > { %v1743_v30 = vpack.c.bf16 %v1691_v39, %v1688_v52 }
 0x6ac   : > { %5667 = vmatmul.mubr.msk.bf16.gmra.mrb[68].mxu0 %vm9693_vm12, %v1741_v60  ;;  %6285 = vmatprep.mubr.msk.bf16.mxu1 %vm9694_vm13, %v1743_v30  ;;  %vm9700_vm12 = vmmov %vm9682_vm0 }
 0x6ad   : > { %2139 = vmatprep.mubr.bf16.mxu0 %v9690_v43  ;;  %6286 = vmatmul.mubr.msk.bf16.gmra.mrb[56].mxu1 %vm9695_vm10, %v1744_v33  ;;  %vm9701_vm13 = vmmov %vm9682_vm0 }
 0x6ae   : > { %v6251_v37 = vpop.f32.mrb[44].mxu1  ;;  %vm9702_vm10 = vmmov %vm9682_vm0 }
 0x6af   : > { %v1704_v34 = vpop.f32.mrb[45].mxu1 }
 0x6b0   : > { %v6252_v29 = vpop.f32.mrb[46].mxu1 }
 0x6b1   : > { %v1746_v44 = vpack.c.bf16 %v6252_v29, %v6251_v37  ;;  %v1707_v21 = vpop.f32.mrb[47].mxu1 }
 0x6b2   : > { %v1745_v3 = vpack.c.bf16 %v1707_v21, %v1704_v34 }
 0x6b4   : > { %5668 = vmatmul.mubr.msk.bf16.gmra.mrb[72].mxu0 %vm9696_vm11, %v1742_v14  ;;  %6289 = vmatprep.mubr.msk.bf16.mxu1 %vm9697_vm14, %v1745_v3  ;;  %vm9703_vm11 = vmmov %vm9682_vm0  ;;  %v7508_v14 = vld [vmem:[%s9527_s3 + $0x18] ss:$12 sps:$4 sm:$0xff]  }
 0x6b5   : > { %2149 = vmatprep.mubr.bf16.mxu0 %v9690_v43  ;;  %6290 = vmatmul.mubr.msk.bf16.gmra.mrb[60].mxu1 %vm9682_vm0, %v1746_v44  ;;  %vm9704_vm14 = vmmov %vm9682_vm0 }
 0x6b6   : > { %6297 = vmatprep.mubr.msk.bf16.mxu1 %vm9698_vm1, %v7632_v7  ;;  %vm9705_vm1 = vmmov %vm9682_vm0 }
 0x6bc   : > { %5669 = vmatmul.mubr.msk.bf16.gmra.mrb[76].mxu0 %vm9699_vm15, %v1743_v30  ;;  %vm9706_vm15 = vmmov %vm9682_vm0 }
 0x6bd   : > { %2159 = vmatprep.mubr.bf16.mxu0 %v9690_v43  ;;  %6298 = vmatmul.mubr.msk.bf16.vlgmr.msra.gmra.mrb[64].mxu1 %vm9700_vm12, %v7632_v7  ;;  %vm9707_vm12 = vmmov %vm9682_vm0 }
 0x6be   : > { %6301 = vmatprep.mubr.msk.bf16.mxu1 %vm9701_vm13, %v7632_v7  ;;  %6314 = vmatpush3.bf16.msra.mxu1 %v7502_v57  ;;  %vm9708_vm13 = vmmov %vm9682_vm0 }
 0x6bf   : > { %6315 = vmatprep.subr.bf16.mxu1 %v7504_v11 }
 0x6c2   : > { %6316 = vmatpush3.bf16.msra.mxu1 %v7504_v11 }
 0x6c3   : > { %6333 = vmatprep.subr.bf16.mxu1 %v8323_v63 }
 0x6c4   : > { %5670 = vmatmul.mubr.msk.bf16.gmra.mrb[80].mxu0 %vm9702_vm10, %v1744_v33  ;;  %vm9709_vm10 = vmmov %vm9682_vm0 }
 0x6c5   : > { %2169 = vmatprep.mubr.bf16.mxu0 %v9690_v43  ;;  %6302 = vmatmul.mubr.msk.bf16.gmra.mrb[68].mxu1 %vm9703_vm11, %v7632_v7  ;;  %vm9710_vm11 = vmmov %vm9682_vm0 }
 0x6c6   : > { %6305 = vmatprep.mubr.msk.bf16.mxu1 %vm9704_vm14, %v7632_v7  ;;  %vm9711_vm14 = vmmov %vm9682_vm0 }
 0x6cc   : > { %5671 = vmatmul.mubr.msk.bf16.gmra.mrb[84].mxu0 %vm9682_vm0, %v1745_v3 }
 0x6cd   : > { %2179 = vmatprep.mubr.bf16.mxu0 %v9690_v43  ;;  %6306 = vmatmul.mubr.msk.bf16.gmra.mrb[72].mxu1 %vm9705_vm1, %v7632_v7  ;;  %vm9712_vm1 = vmmov %vm9682_vm0 }
 0x6ce   : > { %6309 = vmatprep.mubr.msk.bf16.mxu1 %vm9706_vm15, %v7632_v7  ;;  %vm9713_vm15 = vmmov %vm9682_vm0 }
 0x6d4   : > { %5672 = vmatmul.mubr.msk.bf16.gmra.mrb[88].mxu0 %vm9707_vm12, %v1746_v44  ;;  %vm9714_vm12 = vmmov %vm9682_vm0 }
 0x6d5   : > { %2423 = vmatprep.mubr.bf16.mxu0 %v9690_v43  ;;  %6310 = vmatmul.mubr.msk.bf16.gmra.mrb[76].mxu1 %vm9708_vm13, %v7632_v7  ;;  %vm9715_vm13 = vmmov %vm9682_vm0 }
 0x6dc   : > { %5687 = vmatmul.mubr.msk.bf16.vlgmr.msra.gmra.mrb[60].mxu0 %vm9709_vm10, %v7632_v7  ;;  %vm9720_vm10 = vmmov %vm9682_vm0 }
 0x6dd   : > { %2433 = vmatprep.mubr.bf16.mxu0 %v9690_v43  ;;  %3301 = vmatpush1.bf16.msra.mxu0 %v7506_v1 }
 0x6de   : > { %3302 = vmatprep.subr.bf16.mxu0 %v7507_v28 }
 0x6e1   : > { %3303 = vmatpush1.bf16.msra.mxu0 %v7508_v14 }
 0x6e2   : > { %3438 = vmatprep.subr.bf16.mxu0 %v7509_v26 }
 0x6e4   : > { %5688 = vmatmul.mubr.msk.bf16.gmra.mrb[64].mxu0 %vm9710_vm11, %v7632_v7  ;;  %vm9721_vm11 = vmmov %vm9682_vm0 }
 0x6e5   : > { %2443 = vmatprep.mubr.bf16.mxu0 %v9690_v43 }
 0x6ec   : > { %5689 = vmatmul.mubr.msk.bf16.gmra.mrb[68].mxu0 %vm9711_vm14, %v7632_v7  ;;  %vm9722_vm14 = vmmov %vm9682_vm0 }
 0x6ed   : > { %2453 = vmatprep.mubr.bf16.mxu0 %v9690_v43 }
 0x6f4   : > { %5690 = vmatmul.mubr.msk.bf16.gmra.mrb[72].mxu0 %vm9682_vm0, %v7632_v7 }
 0x6f5   : > { %2463 = vmatprep.mubr.bf16.mxu0 %v9690_v43 }
 0x6fc   : > { %5691 = vmatmul.mubr.msk.bf16.gmra.mrb[76].mxu0 %vm9712_vm1, %v7632_v7  ;;  %vm9723_vm1 = vmmov %vm9682_vm0 }
 0x6fd   : > { %2473 = vmatprep.mubr.bf16.mxu0 %v9690_v43 }
 0x704   : > { %5692 = vmatmul.mubr.msk.bf16.gmra.mrb[80].mxu0 %vm9713_vm15, %v7632_v7  ;;  %vm9725_vm15 = vmmov %vm9682_vm0 }
 0x705   : > { %2483 = vmatprep.mubr.bf16.mxu0 %v9690_v43 }
 0x70c   : > { %5693 = vmatmul.mubr.msk.bf16.gmra.mrb[84].mxu0 %vm9714_vm12, %v7632_v7  ;;  %vm9729_vm12 = vmmov %vm9682_vm0 }
 0x70d   : > { %2493 = vmatprep.mubr.bf16.mxu0 %v9690_v43 }
 0x714   : > { %5694 = vmatmul.mubr.msk.bf16.gmra.mrb[88].mxu0 %vm9715_vm13, %v7632_v7  ;;  %vm9732_vm13 = vmmov %vm9682_vm0 }
 0x715   : > { %3332 = vmatprep.mubr.bf16.mxu0 %v9690_v43 }
 0x770   : > { %v8378_v60 = vpop.f32.mrb[48].mxu1 }
 0x771   : > { %v8380_v57 = vpop.f32.mrb[49].mxu1 }
 0x772   : > { %v8382_v45 = vpop.f32.mrb[50].mxu1 }
 0x773   : > { %v8384_v41 = vpop.f32.mrb[51].mxu1 }
 0x778   : > { %v8386_v52 = vpop.f32.mrb[52].mxu1 }
 0x779   : > { %v8388_v38 = vpop.f32.mrb[53].mxu1 }
 0x77a   : > { %v8390_v33 = vpop.f32.mrb[54].mxu1 }
 0x77b   : > { %v8392_v39 = vpop.f32.mrb[55].mxu1 }
 0x780   : > { %v8394_v30 = vpop.f32.mrb[56].mxu1 }
 0x781   : > { %v8396_v7 = vpop.f32.mrb[57].mxu1 }
 0x782   : > { %v8398_v37 = vpop.f32.mrb[58].mxu1 }
 0x783   : > { %v8400_v34 = vpop.f32.mrb[59].mxu1 }
 0x788   : > { %v8402_v29 = vpop.f32.mrb[60].mxu1 }
 0x789   : > { %v8404_v44 = vpop.f32.mrb[61].mxu1 }
 0x78a   : > { %v8406_v21 = vpop.f32.mrb[62].mxu1 }
 0x78b   : > { %v8408_v3 = vpop.f32.mrb[63].mxu1 }
 0x790   : > { %v8410_v11 = vpop.f32.mrb[64].mxu1 }
 0x791   : > { %v8412_v1 = vpop.f32.mrb[65].mxu1 }
 0x792   : > { %v8414_v28 = vpop.f32.mrb[66].mxu1 }
 0x793   : > { %v8416_v14 = vpop.f32.mrb[67].mxu1 }
 0x798   : > { %v8418_v26 = vpop.f32.mrb[68].mxu1 }
 0x799   : > { %v8420_v10 = vpop.f32.mrb[69].mxu1 }
 0x79a   : > { %v8422_v5 = vpop.f32.mrb[70].mxu1 }
 0x79b   : > { %v8424_v2 = vpop.f32.mrb[71].mxu1 }
 0x7a0   : > { %v8426_v50 = vpop.f32.mrb[72].mxu1 }
 0x7a1   : > { %v8428_v47 = vpop.f32.mrb[73].mxu1 }
 0x7a2   : > { %v8430_v48 = vpop.f32.mrb[74].mxu1 }
 0x7a3   : > { %v8432_v24 = vpop.f32.mrb[75].mxu1 }
 0x7a8   : > { %v8444_v9 = vpop.f32.mrb[76].mxu1 }
 0x7a9   : > { %v8451_v42 = vpop.f32.mrb[77].mxu1 }
 0x7aa   : > { %v8453_v31 = vpop.f32.mrb[78].mxu1 }
 0x7ab   : > { %v8455_v8 = vpop.f32.mrb[79].mxu1 }
 0x7af   : > { %v2425_v62 = vpop.f32.mrb[60].mxu0 }
 0x7b0   : > { %v6598_v22 = vadd.f32 %v8457_v27, %v2425_v62  ;;  %v2427_v16 = vpop.f32.mrb[61].mxu0 }
 0x7b1   : > { %v6600_v15 = vadd.f32 %v8459_v4, %v2427_v16  ;;  %v2429_v58 = vpop.f32.mrb[62].mxu0 }
 0x7b2   : > { %v5703_v55 = vmul.f32 -1.442695, %v6598_v22  ;;  %v6602_v13 = vadd.f32 %v8457_v27, %v2429_v58  ;;  %v2431_v49 = vpop.f32.mrb[63].mxu0 }
 0x7b3   : > { %v5719_v32 = vmul.f32 -1.442695, %v6600_v15  ;;  %v6604_v25 = vadd.f32 %v8459_v4, %v2431_v49 }
 0x7b4   : > { %7101 = vpow2.f32 %v5703_v55  ;;  %v5704_v56 = vmul.f32 -1.442695, %v6602_v13 }
 0x7b5   : > { %7103 = vpow2.f32 %v5719_v32  ;;  %v5720_v35 = vmul.f32 -1.442695, %v6604_v25 }
 0x7b6   : > { %7105 = vpow2.f32 %v5704_v56 }
 0x7b7   : > { %v2435_v53 = vpop.f32.mrb[64].mxu0  ;;  %7107 = vpow2.f32 %v5720_v35 }
 0x7b8   : > { %v6606_v54 = vadd.f32 %v8457_v27, %v2435_v53  ;;  %v2437_v36 = vpop.f32.mrb[65].mxu0 }
 0x7b9   : > { %v6608_v16 = vadd.f32 %v8459_v4, %v2437_v36  ;;  %v2439_v62 = vpop.f32.mrb[66].mxu0 }
 0x7ba   : > { %v5705_v22 = vmul.f32 -1.442695, %v6606_v54  ;;  %v6610_v58 = vadd.f32 %v8457_v27, %v2439_v62  ;;  %v2441_v18 = vpop.f32.mrb[67].mxu0 }
 0x7bb   : > { %v5721_v15 = vmul.f32 -1.442695, %v6608_v16  ;;  %v6612_v49 = vadd.f32 %v8459_v4, %v2441_v18 }
 0x7bc   : > { %7109 = vpow2.f32 %v5705_v22  ;;  %v5706_v55 = vmul.f32 -1.442695, %v6610_v58 }
 0x7bd   : > { %7111 = vpow2.f32 %v5721_v15  ;;  %v5722_v25 = vmul.f32 -1.442695, %v6612_v49 }
 0x7be   : > { %v7102_v56 = vpop.eup %7101  ;;  %7113 = vpow2.f32 %v5706_v55 }
 0x7bf   : > { %v7104_v32 = vpop.eup %7103  ;;  %v2665_v13 = vadd.f32 1.0, %v7102_v56  ;;  %v2445_v53 = vpop.f32.mrb[68].mxu0  ;;  %7115 = vpow2.f32 %v5722_v25  ;;  %v7511_v25 = vld [vmem:[%s9529_s5 + $0x10] sm:$0xff] }
 0x7c0   : > { %v7106_v35 = vpop.eup %7105  ;;  %v2777_v0 = vadd.f32 1.0, %v7104_v32  ;;  %v6614_v54 = vadd.f32 %v8457_v27, %v2445_v53  ;;  %v2447_v36 = vpop.f32.mrb[69].mxu0  ;;  %v8477_v32 = vrot.slane %v7511_v25, %v8435_v61 }
 0x7c1   : > { %7117 = vrcp.f32 %v2665_v13  ;;  %v2666_v62 = vadd.f32 1.0, %v7106_v35  ;;  %v6616_v16 = vadd.f32 %v8459_v4, %v2447_v36  ;;  %v2449_v18 = vpop.f32.mrb[70].mxu0  ;;  %v7108_v49 = vpop.eup %7107 }
 0x7c2   : > { %v5707_v22 = vmul.f32 -1.442695, %v6614_v54  ;;  %v6618_v58 = vadd.f32 %v8457_v27, %v2449_v18  ;;  %v2451_v15 = vpop.f32.mrb[71].mxu0  ;;  %9718 = vst [vmem:[#allocation39_spill] sm:$0xff] %v8477_v32  ;;  %v2778_v54 = vadd.f32 1.0, %v7108_v49 }
 0x7c3   : > { %7119 = vrcp.f32 %v2666_v62  ;;  %v5723_v55 = vmul.f32 -1.442695, %v6616_v16  ;;  %v6620_v56 = vadd.f32 %v8459_v4, %v2451_v15  ;;  %v8480_v62 = vrot.slane %v7511_v25, %v8438_v51 }
 0x7c4   : > { %7121 = vrcp.f32 %v2777_v0  ;;  %v5708_v13 = vmul.f32 -1.442695, %v6618_v58  ;;  %v2539_v0 = vadd.f32 %v8412_v1, %v8477_v32 }
 0x7c5   : > { %7123 = vpow2.f32 %v5707_v22  ;;  %v5724_v53 = vmul.f32 -1.442695, %v6620_v56  ;;  %9719 = vst [vmem:[#allocation40_spill] sm:$0xff] %v8480_v62  ;;  %v2301_v1 = vadd.f32 %v8480_v62, %v8380_v57 }
 0x7c6   : > { %v7110_v35 = vpop.eup %7109  ;;  %7125 = vpow2.f32 %v5723_v55 }
 0x7c7   : > { %v7112_v36 = vpop.eup %7111  ;;  %v2667_v16 = vadd.f32 1.0, %v7110_v35  ;;  %7127 = vpow2.f32 %v5708_v13  ;;  %v2455_v18 = vpop.f32.mrb[72].mxu0  ;;  %v2542_v13 = vadd.f32 %v8416_v14, %v8477_v32 }
 0x7c8   : > { %v7114_v15 = vpop.eup %7113  ;;  %v2779_v20 = vadd.f32 1.0, %v7112_v36  ;;  %7129 = vpow2.f32 %v5724_v53  ;;  %v6622_v61 = vadd.f32 %v8457_v27, %v2455_v18  ;;  %v2457_v17 = vpop.f32.mrb[73].mxu0 }
 0x7c9   : > { %7131 = vrcp.f32 %v2667_v16  ;;  %v2668_v22 = vadd.f32 1.0, %v7114_v15  ;;  %v6624_v58 = vadd.f32 %v8459_v4, %v2457_v17  ;;  %v2459_v49 = vpop.f32.mrb[74].mxu0  ;;  %v7116_v55 = vpop.eup %7115 }
 0x7ca   : > { %7133 = vrcp.f32 %v2778_v54  ;;  %v5709_v51 = vmul.f32 -1.442695, %v6622_v61  ;;  %v6626_v56 = vadd.f32 %v8457_v27, %v2459_v49  ;;  %v2461_v25 = vpop.f32.mrb[75].mxu0  ;;  %v2780_v54 = vadd.f32 1.0, %v7116_v55 }
 0x7cb   : > { %v7118_v53 = vpop.eup %7117  ;;  %7135 = vrcp.f32 %v2668_v22  ;;  %v5725_v35 = vmul.f32 -1.442695, %v6624_v58  ;;  %v6628_v36 = vadd.f32 %v8459_v4, %v2461_v25  ;;  %v2304_v61 = vadd.f32 %v8480_v62, %v8384_v41 }
 0x7cc   : > { %7137 = vrcp.f32 %v2779_v20  ;;  %v5710_v17 = vmul.f32 -1.442695, %v6626_v56  ;;  %v2825_v16 = vmul.f32 %v7118_v53, %v2539_v0  ;;  %v2547_v49 = vadd.f32 %v8410_v11, %v8477_v32 }
 0x7cd   : > { %v7120_v18 = vpop.eup %7119  ;;  %7139 = vpow2.f32 %v5709_v51  ;;  %v5726_v57 = vmul.f32 -1.442695, %v6628_v36  ;;  %v2550_v11 = vadd.f32 %v8414_v28, %v8477_v32 }
 0x7ce   : > { %v8492_v15 = vpop.eup %7121  ;;  %7141 = vpow2.f32 %v5725_v35  ;;  %v2841_v14 = vadd.f32 %v2825_v16, %v2301_v1  ;;  %v2826_v22 = vmul.f32 %v7120_v18, %v2542_v13 }
 0x7cf   : > { %v7124_v58 = vpop.eup %7123  ;;  %7143 = vpow2.f32 %v5710_v17  ;;  %v2465_v20 = vpop.f32.mrb[76].mxu0 }
 0x7d0   : > { %v7126_v56 = vpop.eup %7125  ;;  %v2669_v0 = vadd.f32 1.0, %v7124_v58  ;;  %7145 = vtanh.f32 %v2841_v14  ;;  %v2842_v55 = vadd.f32 %v2826_v22, %v2304_v61  ;;  %v6630_v51 = vadd.f32 %v8457_v27, %v2465_v20  ;;  %v2467_v25 = vpop.f32.mrb[77].mxu0 }
 0x7d1   : > { %v7128_v53 = vpop.eup %7127  ;;  %7147 = vrcp.f32 %v2780_v54  ;;  %v2781_v41 = vadd.f32 1.0, %v7126_v56  ;;  %v2469_v35 = vpop.f32.mrb[78].mxu0  ;;  %v6632_v18 = vadd.f32 %v8459_v4, %v2467_v25  ;;  %v2307_v14 = vadd.f32 %v8378_v60, %v8480_v62 }
 0x7d2   : > { %v7130_v1 = vpop.eup %7129  ;;  %7149 = vrcp.f32 %v2669_v0  ;;  %v2670_v13 = vadd.f32 1.0, %v7128_v53  ;;  %v2471_v17 = vpop.f32.mrb[79].mxu0  ;;  %v5711_v16 = vmul.f32 -1.442695, %v6630_v51  ;;  %v2310_v58 = vadd.f32 %v8382_v45, %v8480_v62 }
 0x7d3   : > { %v7132_v36 = vpop.eup %7131  ;;  %7151 = vpow2.f32 %v5726_v57  ;;  %v2782_v20 = vadd.f32 1.0, %v7130_v1  ;;  %v2555_v0 = vadd.f32 %v8420_v10, %v8477_v32  ;;  %v5727_v25 = vmul.f32 -1.442695, %v6632_v18 }
 0x7d4   : > { %v8502_v61 = vpop.eup %7133  ;;  %7153 = vrcp.f32 %v2670_v13  ;;  %v2827_v54 = vmul.f32 %v7132_v36, %v2547_v49  ;;  %v6634_v60 = vadd.f32 %v8457_v27, %v2469_v35  ;;  %v2558_v53 = vadd.f32 %v8424_v2, %v8477_v32 }
 0x7d5   : > { %v7136_v22 = vpop.eup %7135  ;;  %7155 = vrcp.f32 %v2781_v41  ;;  %v6636_v13 = vadd.f32 %v8459_v4, %v2471_v17  ;;  %v2873_v36 = vsub.f32 1.0, %v8492_v15  ;;  %v2905_v10 = vmul.f32 %v8492_v15, %v7628_v6 }
 0x7d6   : > { %v8508_v28 = vpop.eup %7137  ;;  %v2843_v56 = vadd.f32 %v2827_v54, %v2307_v14  ;;  %v2828_v57 = vmul.f32 %v7136_v22, %v2550_v11  ;;  %7157 = vtanh.f32 %v2842_v55  ;;  %v2313_v15 = vadd.f32 %v8480_v62, %v8388_v38 }
 0x7d7   : > { %v7140_v51 = vpop.eup %7139  ;;  %7159 = vpow2.f32 %v5711_v16  ;;  %v2475_v49 = vpop.f32.mrb[80].mxu0 }
 0x7d8   : > { %v7142_v45 = vpop.eup %7141  ;;  %v2671_v41 = vadd.f32 1.0, %v7140_v51  ;;  %7161 = vtanh.f32 %v2843_v56  ;;  %v2844_v1 = vadd.f32 %v2828_v57, %v2310_v58  ;;  %v2477_v11 = vpop.f32.mrb[81].mxu0  ;;  %v6638_v35 = vadd.f32 %v8457_v27, %v2475_v49 }
 0x7d9   : > { %v7144_v55 = vpop.eup %7143  ;;  %7163 = vrcp.f32 %v2782_v20  ;;  %v2479_v16 = vpop.f32.mrb[82].mxu0  ;;  %v2783_v2 = vadd.f32 1.0, %v7142_v45  ;;  %v6640_v54 = vadd.f32 %v8459_v4, %v2477_v11  ;;  %v5712_v56 = vmul.f32 -1.442695, %v6634_v60 }
 0x7da   : > { %v7146_v18 = vpop.eup %7145  ;;  %7165 = vrcp.f32 %v2671_v41  ;;  %v2672_v14 = vadd.f32 1.0, %v7144_v55  ;;  %v2481_v22 = vpop.f32.mrb[83].mxu0  ;;  %v6642_v57 = vadd.f32 %v8457_v27, %v2479_v16  ;;  %v2316_v20 = vadd.f32 %v8480_v62, %v8392_v39 }
 0x7db   : > { %v8521_v58 = vpop.eup %7147  ;;  %v2889_v17 = vmul.f32 %v7146_v18, %v2873_v36  ;;  %7167 = vpow2.f32 %v5727_v25  ;;  %v5728_v49 = vmul.f32 -1.442695, %v6636_v13  ;;  %v5713_v41 = vmul.f32 -1.442695, %v6638_v35 }
 0x7dc   : > { %v7150_v51 = vpop.eup %7149  ;;  %7169 = vrcp.f32 %v2672_v14  ;;  %v2874_v25 = vsub.f32 1.0, %v8502_v61  ;;  %v5729_v60 = vmul.f32 -1.442695, %v6640_v54  ;;  %v6644_v16 = vadd.f32 %v8459_v4, %v2481_v22 }
 0x7dd   : > { %v7152_v45 = vpop.eup %7151  ;;  %7171 = vtanh.f32 %v2844_v1  ;;  %v2829_v11 = vmul.f32 %v7150_v51, %v2555_v0  ;;  %v8528_v55 = vadd.f32 %v2905_v10, %v2889_v17  ;;  %v5714_v38 = vmul.f32 -1.442695, %v6642_v57 }
 0x7de   : > { %v7154_v36 = vpop.eup %7153  ;;  %7173 = vrcp.f32 %v2783_v2  ;;  %v2906_v0 = vmul.f32 %v8502_v61, %v7628_v6  ;;  %v2563_v1 = vadd.f32 %v8418_v26, %v8477_v32  ;;  %v2566_v10 = vadd.f32 %v8422_v5, %v8477_v32 }
 0x7df   : > { %v8532_v18 = vpop.eup %7155  ;;  %7175 = vpow2.f32 %v5712_v56  ;;  %v2845_v39 = vadd.f32 %v2829_v11, %v2313_v15  ;;  %v2830_v14 = vmul.f32 %v7154_v36, %v2558_v53  ;;  %v2485_v13 = vpop.f32.mrb[84].mxu0  ;;  %v2875_v54 = vsub.f32 1.0, %v8508_v28 }
 0x7e0   : > { %v7158_v40 = vpop.eup %7157  ;;  %7177 = vpow2.f32 %v5728_v49  ;;  %v2487_v35 = vpop.f32.mrb[85].mxu0  ;;  %v2784_v57 = vadd.f32 1.0, %v7152_v45  ;;  %v6646_v61 = vadd.f32 %v8457_v27, %v2485_v13  ;;  %v2907_v5 = vmul.f32 %v8508_v28, %v7628_v6 }
 0x7e1   : > { %v7160_v2 = vpop.eup %7159  ;;  %v2890_v22 = vmul.f32 %v7158_v40, %v2874_v25  ;;  %7179 = vpow2.f32 %v5713_v41  ;;  %v2846_v17 = vadd.f32 %v2830_v14, %v2316_v20  ;;  %v2489_v53 = vpop.f32.mrb[86].mxu0  ;;  %v5730_v11 = vmul.f32 -1.442695, %v6644_v16 }
 0x7e2   : > { %v7162_v56 = vpop.eup %7161  ;;  %v2673_v51 = vadd.f32 1.0, %v7160_v2  ;;  %7181 = vpow2.f32 %v5729_v60  ;;  %v2491_v15 = vpop.f32.mrb[87].mxu0  ;;  %v2319_v40 = vadd.f32 %v8386_v52, %v8480_v62  ;;  %v2322_v41 = vadd.f32 %v8390_v33, %v8480_v62 }
 0x7e3   : > { %v8542_v49 = vpop.eup %7163  ;;  %v2891_v26 = vmul.f32 %v7162_v56, %v2875_v54  ;;  %7183 = vpow2.f32 %v5714_v38  ;;  %v8548_v20 = vadd.f32 %v2906_v0, %v2890_v22  ;;  %v2876_v28 = vsub.f32 1.0, %v8521_v58 }
 0x7e4   : > { %v7166_v36 = vpop.eup %7165  ;;  %7185 = vrcp.f32 %v2673_v51  ;;  %v5715_v16 = vmul.f32 -1.442695, %v6646_v61  ;;  %v2325_v13 = vadd.f32 %v8480_v62, %v8396_v7  ;;  %v8576_v51 = vadd.f32 %v8426_v50, %v8477_v32 }
 0x7e5   : > { %v7168_v45 = vpop.eup %7167  ;;  %v8552_v25 = vadd.f32 %v2907_v5, %v2891_v26  ;;  %v2831_v60 = vmul.f32 %v7166_v36, %v2563_v1  ;;  %7187 = vtanh.f32 %v2845_v39  ;;  %v8557_v38 = vpack.c.bf16 %v8548_v20, %v8528_v55 }
 0x7e6   : > { %v7170_v14 = vpop.eup %7169  ;;  %7189 = vrcp.f32 %v2784_v57  ;;  %v8565_v39 = vadd.f32 %v8480_v62, %v8400_v34  ;;  %v2908_v1 = vmul.f32 %v8521_v58, %v7628_v6  ;;  %v6648_v57 = vadd.f32 %v8459_v4, %v2487_v35 }
 0x7e7   : > { %v7172_v52 = vpop.eup %7171  ;;  %v2847_v0 = vadd.f32 %v2831_v60, %v2319_v40  ;;  %7191 = vpow2.f32 %v5730_v11  ;;  %v2832_v33 = vmul.f32 %v7170_v14, %v2566_v10  ;;  %v2495_v2 = vpop.f32.mrb[88].mxu0  ;;  %6317 = vmatprep.mubr.msk.bf16.mxu1 %vm9720_vm10, %v8557_v38  ;;  %v2785_v36 = vadd.f32 1.0, %v7168_v45  ;;  %vm9733_vm10 = vmmov %vm9682_vm0 }
 0x7e8   : > { %v8561_v54 = vpop.eup %7173  ;;  %v2892_v22 = vmul.f32 %v7172_v52, %v2876_v28  ;;  %7193 = vtanh.f32 %v2846_v17  ;;  %v8571_v56 = vpop.f32.mrb[89].mxu0  ;;  %v6650_v17 = vadd.f32 %v8457_v27, %v2489_v53  ;;  %v2571_v40 = vadd.f32 %v8428_v47, %v8477_v32 }
 0x7e9   : > { %v7176_v7 = vpop.eup %7175  ;;  %7195 = vtanh.f32 %v2847_v0  ;;  %v2848_v10 = vadd.f32 %v2832_v33, %v2322_v41  ;;  %v2499_v34 = vpop.f32.mrb[90].mxu0  ;;  %v8585_v35 = vadd.f32 %v8432_v24, %v8477_v32  ;;  %v2877_v41 = vsub.f32 1.0, %v8532_v18 }
 0x7ea   : > { %v7178_v61 = vpop.eup %7177  ;;  %v8578_v5 = vadd.f32 %v2908_v1, %v2892_v22  ;;  %v2674_v58 = vadd.f32 1.0, %v7176_v7  ;;  %7197 = vpow2.f32 %v5715_v16  ;;  %v2501_v26 = vpop.f32.mrb[91].mxu0  ;;  %v2909_v60 = vmul.f32 %v8532_v18, %v7628_v6 }
 0x7eb   : > { %v7180_v11 = vpop.eup %7179  ;;  %7199 = vtanh.f32 %v2848_v10  ;;  %v2878_v28 = vsub.f32 1.0, %v8542_v49  ;;  %v5731_v45 = vmul.f32 -1.442695, %v6648_v57  ;;  %v6652_v16 = vadd.f32 %v8459_v4, %v2491_v15 }
 0x7ec   : > { %v7182_v50 = vpop.eup %7181  ;;  %7201 = vrcp.f32 %v2674_v58  ;;  %v2675_v14 = vadd.f32 1.0, %v7180_v11  ;;  %v6654_v47 = vadd.f32 %v8457_v27, %v2495_v2  ;;  %v5716_v0 = vmul.f32 -1.442695, %v6650_v17 }
 0x7ed   : > { %v7184_v53 = vpop.eup %7183  ;;  %v8595_v33 = vpack.c.bf16 %v8578_v5, %v8552_v25  ;;  %v2910_v18 = vmul.f32 %v8542_v49, %v7628_v6  ;;  %v2786_v22 = vadd.f32 1.0, %v7178_v61  ;;  %v2787_v57 = vadd.f32 1.0, %v7182_v50 }
 0x7ee   : > { %v7186_v52 = vpop.eup %7185  ;;  %7203 = vrcp.f32 %v2675_v14  ;;  %v2676_v24 = vadd.f32 1.0, %v7184_v53  ;;  %v6658_v2 = vadd.f32 %v8457_v27, %v2499_v34  ;;  %v5732_v17 = vmul.f32 -1.442695, %v6652_v16  ;;  %v7512_v34 = vld [vmem:[%s9528_s4 + $0x18] sm:$0xff]  }
 0x7ef   : > { %v7188_v1 = vpop.eup %7187  ;;  %7205 = vrcp.f32 %v2785_v36  ;;  %v2833_v7 = vmul.f32 %v7186_v52, %v2571_v40  ;;  %6318 = vmatmul.mubr.msk.bf16.vlgmr.msra.gmra.mrb[80].mxu1 %vm9721_vm11, %v8595_v33  ;;  %v5717_v11 = vmul.f32 -1.442695, %v6654_v47  ;;  %v2879_v61 = vsub.f32 1.0, %v8561_v54  ;;  %vm9734_vm11 = vmmov %vm9682_vm0 }
 0x7f0   : > { %v7190_v10 = vpop.eup %7189  ;;  %7207 = vrcp.f32 %v2676_v24  ;;  %v2893_v15 = vmul.f32 %v7188_v1, %v2877_v41  ;;  %6334 = vmatpush3.bf16.msra.mxu1 %v8323_v63  ;;  %v2911_v36 = vmul.f32 %v8561_v54, %v7628_v6  ;;  %v6656_v54 = vadd.f32 %v8459_v4, %v8571_v56 }
 0x7f1   : > { %v7192_v58 = vpop.eup %7191  ;;  %7209 = vpow2.f32 %v5731_v45  ;;  %v2849_v14 = vadd.f32 %v2833_v7, %v2325_v13  ;;  %6335 = vmatprep.subr.bf16.mxu1 %v7512_v34  ;;  %v2880_v41 = vsub.f32 1.0, %v7190_v10  ;;  %v2912_v13 = vmul.f32 %v7190_v10, %v7628_v6 }
 0x7f2   : > { %v7194_v49 = vpop.eup %7193  ;;  %7211 = vpow2.f32 %v5716_v0  ;;  %v8606_v40 = vadd.f32 %v2909_v60, %v2893_v15  ;;  %v5718_v16 = vmul.f32 -1.442695, %v6658_v2  ;;  %v6660_v52 = vadd.f32 %v8459_v4, %v2501_v26 }
 0x7f3   : > { %v7196_v50 = vpop.eup %7195  ;;  %7213 = vrcp.f32 %v2786_v22  ;;  %v2894_v63 = vmul.f32 %v7194_v49, %v2878_v28  ;;  %v2788_v1 = vadd.f32 1.0, %v7192_v58  ;;  %v2582_v22 = vadd.f32 %v8430_v48, %v8477_v32 }
 0x7f4   : > { %v7198_v53 = vpop.eup %7197  ;;  %7215 = vrcp.f32 %v2787_v57  ;;  %v2895_v45 = vmul.f32 %v7196_v50, %v2879_v61  ;;  %6336 = vmatpush3.bf16.msra.mxu1 %v7512_v34  ;;  %v2331_v2 = vadd.f32 %v8394_v30, %v8480_v62  ;;  %v2334_v61 = vadd.f32 %v8398_v37, %v8480_v62 }
 0x7f5   : > { %v7200_v60 = vpop.eup %7199  ;;  %v2677_v47 = vadd.f32 1.0, %v7198_v53  ;;  %7217 = vpow2.f32 %v5717_v11  ;;  %v8615_v24 = vadd.f32 %v2910_v18, %v2894_v63  ;;  %v5733_v18 = vmul.f32 -1.442695, %v6656_v54 }
 0x7f6   : > { %v7202_v0 = vpop.eup %7201  ;;  %v2896_v7 = vmul.f32 %v7200_v60, %v2880_v41  ;;  %7219 = vpow2.f32 %v5732_v17  ;;  %v8617_v28 = vadd.f32 %v2911_v36, %v2895_v45  ;;  %v5734_v17 = vmul.f32 -1.442695, %v6660_v52 }
 0x7f7   : > { %7221 = vrcp.f32 %v2677_v47  ;;  %v2834_v56 = vmul.f32 %v7202_v0, %v8585_v35  ;;  %v8624_v10 = vpack.c.bf16 %v8615_v24, %v8606_v40 }
 0x7f8   : > { %v7204_v26 = vpop.eup %7203  ;;  %7223 = vpow2.f32 %v5718_v16  ;;  %v8626_v57 = vadd.f32 %v2912_v13, %v2896_v7  ;;  %v2587_v13 = vadd.f32 %v8451_v42, %v8477_v32  ;;  %v2337_v16 = vadd.f32 %v8480_v62, %v8404_v44 }
 0x7f9   : > { %v7206_v15 = vpop.eup %7205  ;;  %v2835_v58 = vmul.f32 %v7204_v26, %v8576_v51  ;;  %7225 = vtanh.f32 %v2849_v14  ;;  %v2850_v48 = vadd.f32 %v2834_v56, %v8565_v39  ;;  %6321 = vmatprep.mubr.msk.bf16.mxu1 %vm9722_vm14, %v8624_v10  ;;  %vm9735_vm14 = vmmov %vm9682_vm0 }
 0x7fa   : > { %v7208_v35 = vpop.eup %7207  ;;  %7227 = vrcp.f32 %v2788_v1  ;;  %v8636_v11 = vpack.c.bf16 %v8626_v57, %v8617_v28  ;;  %v2881_v60 = vsub.f32 1.0, %v7206_v15  ;;  %v2913_v7 = vmul.f32 %v7206_v15, %v7628_v6 }
 0x7fb   : > { %v7210_v49 = vpop.eup %7209  ;;  %v2851_v30 = vadd.f32 %v2835_v58, %v2331_v2  ;;  %v2836_v36 = vmul.f32 %v7208_v35, %v2582_v22  ;;  %7229 = vtanh.f32 %v2850_v48  ;;  %v2590_v58 = vadd.f32 %v8455_v8, %v8477_v32 }
 0x7fc   : > { %v7212_v51 = vpop.eup %7211  ;;  %v2789_v14 = vadd.f32 1.0, %v7210_v49  ;;  %7231 = vpow2.f32 %v5733_v18  ;;  %6322 = vmatmul.mubr.msk.bf16.gmra.mrb[84].mxu1 %vm9682_vm0, %v8636_v11 }
 0x7fd   : > { %v7214_v39 = vpop.eup %7213  ;;  %v2678_v34 = vadd.f32 1.0, %v7212_v51  ;;  %7233 = vtanh.f32 %v2851_v30  ;;  %v2852_v50 = vadd.f32 %v2836_v36, %v2334_v61 }
 0x7fe   : > { %v7216_v41 = vpop.eup %7215  ;;  %7235 = vpow2.f32 %v5734_v17  ;;  %v2882_v42 = vsub.f32 1.0, %v7214_v39  ;;  %v2914_v18 = vmul.f32 %v7214_v39, %v7628_v6 }
 0x7ff   : > { %v7218_v63 = vpop.eup %7217  ;;  %7237 = vrcp.f32 %v2678_v34  ;;  %v2883_v2 = vsub.f32 1.0, %v7216_v41  ;;  %v2915_v15 = vmul.f32 %v7216_v41, %v7628_v6  ;;  %v2595_v41 = vadd.f32 %v8444_v9, %v8477_v32 }
 0x800   : > { %v7220_v37 = vpop.eup %7219  ;;  %7239 = vrcp.f32 %v2789_v14  ;;  %v2679_v53 = vadd.f32 1.0, %v7218_v63  ;;  %v2340_v14 = vadd.f32 %v8480_v62, %v8408_v3 }
 0x801   : > { %v7222_v45 = vpop.eup %7221  ;;  %7241 = vtanh.f32 %v2852_v50  ;;  %v2790_v48 = vadd.f32 1.0, %v7220_v37 }
 0x802   : > { %v7224_v54 = vpop.eup %7223  ;;  %7243 = vrcp.f32 %v2679_v53  ;;  %v2837_v47 = vmul.f32 %v7222_v45, %v2587_v13 }
 0x803   : > { %v7226_v52 = vpop.eup %7225  ;;  %v2680_v0 = vadd.f32 1.0, %v7224_v54 }
 0x804   : > { %v7228_v1 = vpop.eup %7227  ;;  %v2897_v22 = vmul.f32 %v7226_v52, %v2881_v60  ;;  %v2853_v56 = vadd.f32 %v2837_v47, %v2337_v16  ;;  %v2343_v60 = vadd.f32 %v8402_v29, %v8480_v62  ;;  %v2598_v52 = vadd.f32 %v8453_v31, %v8477_v32 }
 0x805   : > { %v7230_v26 = vpop.eup %7229  ;;  %7245 = vrcp.f32 %v2680_v0  ;;  %v2884_v39 = vsub.f32 1.0, %v7228_v1  ;;  %v2916_v45 = vmul.f32 %v7228_v1, %v7628_v6 }
 0x806   : > { %v7232_v44 = vpop.eup %7231  ;;  %v2898_v35 = vmul.f32 %v7230_v26, %v2882_v42  ;;  %7247 = vtanh.f32 %v2853_v56  ;;  %v8650_v17 = vadd.f32 %v2913_v7, %v2897_v22  ;;  %v2346_v22 = vadd.f32 %v8406_v21, %v8480_v62 }
 0x807   : > { %v7234_v49 = vpop.eup %7233  ;;  %v2791_v34 = vadd.f32 1.0, %v7232_v44  ;;  %7249 = vrcp.f32 %v2790_v48 }
 0x808   : > { %v7236_v61 = vpop.eup %7235  ;;  %v2899_v30 = vmul.f32 %v7234_v49, %v2883_v2  ;;  %v8653_v36 = vadd.f32 %v2914_v18, %v2898_v35 }
 0x809   : > { %v7238_v51 = vpop.eup %7237  ;;  %v2792_v54 = vadd.f32 1.0, %v7236_v61  ;;  %7251 = vrcp.f32 %v2791_v34 }
 0x80a   : > { %v7240_v8 = vpop.eup %7239  ;;  %v2838_v50 = vmul.f32 %v7238_v51, %v2590_v58  ;;  %v8659_v13 = vpack.c.bf16 %v8653_v36, %v8650_v17  ;;  %v8661_v63 = vadd.f32 %v2915_v15, %v2899_v30 }
 0x80b   : > { %v7242_v37 = vpop.eup %7241  ;;  %v2885_v7 = vsub.f32 1.0, %v7240_v8  ;;  %v2917_v26 = vmul.f32 %v7240_v8, %v7628_v6 }
 0x80c   : > { %v7244_v53 = vpop.eup %7243  ;;  %v2900_v3 = vmul.f32 %v7242_v37, %v2884_v39  ;;  %v2854_v16 = vadd.f32 %v2838_v50, %v2340_v14  ;;  %6325 = vmatprep.mubr.msk.bf16.mxu1 %vm9723_vm1, %v8659_v13  ;;  %vm9736_vm1 = vmmov %vm9682_vm0 }
 0x80d   : > { %v2839_v47 = vmul.f32 %v7244_v53, %v2595_v41 }
 0x80e   : > { %7253 = vtanh.f32 %v2854_v16  ;;  %v8672_v0 = vadd.f32 %v2916_v45, %v2900_v3 }
 0x80f   : > { %v7246_v9 = vpop.eup %7245  ;;  %v2855_v1 = vadd.f32 %v2839_v47, %v2343_v60  ;;  %7255 = vrcp.f32 %v2792_v54 }
 0x810   : > { %9724 = vst [vmem:[#allocation41_spill] sm:$0xff] %v8672_v0  ;;  %v7248_v42 = vpop.eup %7247  ;;  %v2840_v56 = vmul.f32 %v7246_v9, %v2598_v52  ;;  %v8678_v29 = vpack.c.bf16 %v8672_v0, %v8661_v63 }
 0x811   : > { %7257 = vtanh.f32 %v2855_v1  ;;  %v2901_v31 = vmul.f32 %v7248_v42, %v2885_v7  ;;  %v7250_v58 = vpop.eup %7249 }
 0x812   : > { %v2856_v18 = vadd.f32 %v2840_v56, %v2346_v22  ;;  %6326 = vmatmul.mubr.msk.bf16.gmra.mrb[88].mxu1 %vm9725_vm15, %v8678_v29  ;;  %v2886_v21 = vsub.f32 1.0, %v7250_v58  ;;  %v2918_v35 = vmul.f32 %v7250_v58, %v7628_v6  ;;  %vm9737_vm15 = vmmov %vm9682_vm0 }
 0x813   : > { %v8683_v2 = vadd.f32 %v2917_v26, %v2901_v31  ;;  %v7252_v44 = vpop.eup %7251 }
 0x814   : > { %7259 = vtanh.f32 %v2856_v18  ;;  %v2887_v15 = vsub.f32 1.0, %v7252_v44  ;;  %v2919_v14 = vmul.f32 %v7252_v44, %v7628_v6 }
 0x815   : > { %9726 = vst [vmem:[#allocation42_spill] sm:$0xff] %v8683_v2 }
 0x818   : > { %v7254_v48 = vpop.eup %7253 }
 0x819   : > { %v2902_v49 = vmul.f32 %v7254_v48, %v2886_v21  ;;  %v7256_v61 = vpop.eup %7255 }
 0x81a   : > { %v2888_v34 = vsub.f32 1.0, %v7256_v61  ;;  %v2920_v41 = vmul.f32 %v7256_v61, %v7628_v6 }
 0x81b   : > { %v7258_v30 = vpop.eup %7257  ;;  %v8686_v51 = vadd.f32 %v2918_v35, %v2902_v49 }
 0x81c   : > { %v2903_v39 = vmul.f32 %v7258_v30, %v2887_v15 }
 0x81d   : > { %9727 = vst [vmem:[#allocation43_spill] sm:$0xff] %v8686_v51  ;;  %v8691_v8 = vpack.c.bf16 %v8686_v51, %v8683_v2 }
 0x81e   : > { %v7260_v50 = vpop.eup %7259  ;;  %v8693_v37 = vadd.f32 %v2919_v14, %v2903_v39 }
 0x81f   : > { %v2904_v53 = vmul.f32 %v7260_v50, %v2888_v34  ;;  %6329 = vmatprep.mubr.msk.bf16.mxu1 %vm9729_vm12, %v8691_v8  ;;  %vm9738_vm12 = vmmov %vm9682_vm0 }
 0x820   : > { %9728 = vst [vmem:[#allocation44_spill] sm:$0xff] %v8693_v37 }
 0x821   : > { %v8698_v45 = vadd.f32 %v2920_v41, %v2904_v53 }
 0x823   : > { %9730 = vst [vmem:[#allocation45_spill] sm:$0xff] %v8698_v45  ;;  %v8702_v54 = vpack.c.bf16 %v8698_v45, %v8693_v37 }
 0x825   : > { %9731 = vst [vmem:[#allocation46_spill] sm:$0xff] %v8702_v54  ;;  %6330 = vmatmul.mubr.msk.bf16.gmra.mrb[92].mxu1 %vm9732_vm13, %v8702_v54  ;;  %vm9739_vm13 = vmmov %vm9682_vm0  ;;  %v9759_v54 = vld [vmem:[#allocation8_spill] sm:$0xff] }
 0x8c2   : > { %v6319_v3 = vpop.f32.mrb[80].mxu1 }
 0x8c3   : > { %v3012_v16 = vadd.f32 %v6319_v3, %v7663_v12  ;;  %v3003_v60 = vpop.f32.mrb[81].mxu1 }
 0x8c4   : > { %v3004_v47 = vadd.f32 %v3003_v60, %v7663_v12  ;;  %v6320_v6 = vpop.f32.mrb[82].mxu1 }
 0x8c5   : > { %v3015_v52 = vadd.f32 %v6320_v6, %v7663_v12  ;;  %v3006_v9 = vpop.f32.mrb[83].mxu1  ;;  %v3068_v1 = vmax.f32 %v3012_v16, 0.0 }
 0x8c6   : > { %v3007_v7 = vadd.f32 %v3006_v9, %v7663_v12  ;;  %v3066_v22 = vmax.f32 %v3004_v47, 0.0 }
 0x8c7   : > { %v3069_v42 = vmax.f32 %v3015_v52, 0.0 }
 0x8c8   : > { %v3067_v56 = vmax.f32 %v3007_v7, 0.0 }
 0x8c9   : > { %v3083_v26 = vpack.c.bf16 %v3069_v42, %v3068_v1 }
 0x8ca   : > { %v3082_v31 = vpack.c.bf16 %v3067_v56, %v3066_v22 }
 0x8cc   : > { %6337 = vmatprep.mubr.msk.bf16.mxu1 %vm9733_vm10, %v3082_v31  ;;  %vm9740_vm10 = vmmov %vm9682_vm0 }
 0x8cd   : > { %6338 = vmatmul.mubr.msk.bf16.vlgmr.msra.gmra.mrb[96].mxu1 %vm9734_vm11, %v3083_v26  ;;  %vm9741_vm11 = vmmov %vm9682_vm0 }
 0x8cf   : > { %v6323_v18 = vpop.f32.mrb[84].mxu1 }
 0x8d0   : > { %v3028_v58 = vadd.f32 %v6323_v18, %v7663_v12  ;;  %v3019_v44 = vpop.f32.mrb[85].mxu1 }
 0x8d1   : > { %v3020_v21 = vadd.f32 %v3019_v44, %v7663_v12  ;;  %v6324_v48 = vpop.f32.mrb[86].mxu1 }
 0x8d2   : > { %v3031_v35 = vadd.f32 %v6324_v48, %v7663_v12  ;;  %v3022_v49 = vpop.f32.mrb[87].mxu1  ;;  %v3072_v15 = vmax.f32 %v3028_v58, 0.0 }
 0x8d3   : > { %v3023_v61 = vadd.f32 %v3022_v49, %v7663_v12  ;;  %v3070_v14 = vmax.f32 %v3020_v21, 0.0 }
 0x8d4   : > { %v3073_v30 = vmax.f32 %v3031_v35, 0.0 }
 0x8d5   : > { %v3071_v39 = vmax.f32 %v3023_v61, 0.0 }
 0x8d6   : > { %v3085_v34 = vpack.c.bf16 %v3073_v30, %v3072_v15 }
 0x8d7   : > { %v3084_v50 = vpack.c.bf16 %v3071_v39, %v3070_v14 }
 0x8d9   : > { %6341 = vmatprep.mubr.msk.bf16.mxu1 %vm9735_vm14, %v3084_v50  ;;  %vm9742_vm14 = vmmov %vm9682_vm0 }
 0x8da   : > { %6342 = vmatmul.mubr.msk.bf16.gmra.mrb[100].mxu1 %vm9682_vm0, %v3085_v34  ;;  %v7513_v34 = vld [vmem:[%s7699_s14] sm:$0xff]  }
 0x8e5   : > { %v6327_v41 = vpop.f32.mrb[88].mxu1 }
 0x8e6   : > { %v3044_v53 = vadd.f32 %v6327_v41, %v7663_v12  ;;  %v3035_v3 = vpop.f32.mrb[89].mxu1 }
 0x8e7   : > { %v3036_v16 = vadd.f32 %v3035_v3, %v7663_v12  ;;  %v6328_v60 = vpop.f32.mrb[90].mxu1 }
 0x8e8   : > { %v3047_v47 = vadd.f32 %v6328_v60, %v7663_v12  ;;  %v3038_v6 = vpop.f32.mrb[91].mxu1  ;;  %v3076_v9 = vmax.f32 %v3044_v53, 0.0 }
 0x8e9   : > { %v3039_v52 = vadd.f32 %v3038_v6, %v7663_v12  ;;  %v3074_v1 = vmax.f32 %v3036_v16, 0.0 }
 0x8ea   : > { %v3077_v7 = vmax.f32 %v3047_v47, 0.0 }
 0x8eb   : > { %v3075_v42 = vmax.f32 %v3039_v52, 0.0 }
 0x8ec   : > { %v3087_v22 = vpack.c.bf16 %v3077_v7, %v3076_v9 }
 0x8ed   : > { %v3086_v56 = vpack.c.bf16 %v3075_v42, %v3074_v1 }
 0x8ef   : > { %6345 = vmatprep.mubr.msk.bf16.mxu1 %vm9736_vm1, %v3086_v56  ;;  %vm9743_vm1 = vmmov %vm9682_vm0 }
 0x8f0   : > { %6346 = vmatmul.mubr.msk.bf16.gmra.mrb[104].mxu1 %vm9737_vm15, %v3087_v22  ;;  %vm9744_vm15 = vmmov %vm9682_vm0 }
 0x8f8   : > { %v6331_v26 = vpop.f32.mrb[92].mxu1 }
 0x8f9   : > { %v3060_v31 = vadd.f32 %v6331_v26, %v7663_v12  ;;  %v3051_v18 = vpop.f32.mrb[93].mxu1 }
 0x8fa   : > { %v3052_v58 = vadd.f32 %v3051_v18, %v7663_v12  ;;  %v6332_v44 = vpop.f32.mrb[94].mxu1 }
 0x8fb   : > { %v3063_v21 = vadd.f32 %v6332_v44, %v7663_v12  ;;  %v3054_v48 = vpop.f32.mrb[95].mxu1  ;;  %v3080_v49 = vmax.f32 %v3060_v31, 0.0 }
 0x8fc   : > { %v3055_v35 = vadd.f32 %v3054_v48, %v7663_v12  ;;  %v3078_v15 = vmax.f32 %v3052_v58, 0.0 }
 0x8fd   : > { %v3081_v61 = vmax.f32 %v3063_v21, 0.0 }
 0x8fe   : > { %v3079_v30 = vmax.f32 %v3055_v35, 0.0 }
 0x8ff   : > { %v3089_v14 = vpack.c.bf16 %v3081_v61, %v3080_v49 }
 0x900   : > { %v3088_v39 = vpack.c.bf16 %v3079_v30, %v3078_v15 }
 0x902   : > { %6349 = vmatprep.mubr.msk.bf16.mxu1 %vm9738_vm12, %v3088_v39  ;;  %vm9745_vm12 = vmmov %vm9682_vm0 }
 0x903   : > { %6350 = vmatmul.mubr.msk.bf16.gmra.mrb[108].mxu1 %vm9739_vm13, %v3089_v14  ;;  %vm9746_vm13 = vmmov %vm9682_vm0 }
 0x904   : > { %6369 = vmatprep.mubr.bf16.mxu1 %v7513_v34 }
 0x9a0   : > { %v6339_v50 = vpop.f32.mrb[96].mxu1 }
 0x9a1   : > { %v3148_v41 = vpop.f32.mrb[97].mxu1  ;;  %v3157_v3 = vadd.f32 %v6339_v50, %v7734_v19 }
 0x9a2   : > { %v6340_v53 = vpop.f32.mrb[98].mxu1  ;;  %v3149_v60 = vadd.f32 %v3148_v41, %v7734_v19 }
 0x9a3   : > { %v3160_v16 = vadd.f32 %v6340_v53, %v7734_v19  ;;  %v3151_v12 = vpop.f32.mrb[99].mxu1 }
 0x9a4   : > { %v3152_v47 = vadd.f32 %v3151_v12, %v7734_v19 }
 0x9a5   : > { %v3212_v6 = vpack.c.bf16 %v3160_v16, %v3157_v3 }
 0x9a6   : > { %v3211_v52 = vpack.c.bf16 %v3152_v47, %v3149_v60 }
 0x9a8   : > { %6353 = vmatprep.subr.bf16.mxu1 %v3211_v52 }
 0x9a9   : > { %6354 = vmatpush3.bf16.msra.mxu1 %v3211_v52  ;;  %v7514_v52 = vld [vmem:[%s9527_s3 + $0x8] ss:$12 sps:$4 sm:$0xff]  }
 0x9aa   : > { %6355 = vmatprep.subr.bf16.mxu1 %v3212_v6 }
 0x9ad   : > { %v6343_v9 = vpop.f32.mrb[100].mxu1  ;;  %6356 = vmatpush3.bf16.msra.mxu1 %v3212_v6 }
 0x9ae   : > { %v3164_v7 = vpop.f32.mrb[101].mxu1  ;;  %v3173_v42 = vadd.f32 %v6343_v9, %v7734_v19  ;;  %v7515_v9 = vld [vmem:[%s7699_s14 + $0x8] sm:$0xff]  }
 0x9af   : > { %v6344_v1 = vpop.f32.mrb[102].mxu1  ;;  %v3165_v26 = vadd.f32 %v3164_v7, %v7734_v19  ;;  %v7516_v7 = vld [vmem:[%s7699_s14 + $0x10] sm:$0xff]  }
 0x9b0   : > { %v3176_v22 = vadd.f32 %v6344_v1, %v7734_v19  ;;  %v3167_v56 = vpop.f32.mrb[103].mxu1  ;;  %v7518_v1 = vld [vmem:[%s9527_s3 + $0x38] ss:$12 sps:$4 sm:$0xff]  }
 0x9b1   : > { %v3168_v31 = vadd.f32 %v3167_v56, %v7734_v19 }
 0x9b2   : > { %v3214_v18 = vpack.c.bf16 %v3176_v22, %v3173_v42  ;;  %v7519_v42 = vld [vmem:[%s7699_s14 + $0x18] sm:$0xff]  }
 0x9b3   : > { %v3213_v58 = vpack.c.bf16 %v3168_v31, %v3165_v26 }
 0x9b5   : > { %6357 = vmatprep.subr.bf16.mxu1 %v3213_v58 }
 0x9b6   : > { %6358 = vmatpush3.bf16.msra.mxu1 %v3213_v58 }
 0x9b7   : > { %6359 = vmatprep.subr.bf16.mxu1 %v3214_v18 }
 0x9ba   : > { %6360 = vmatpush3.bf16.msra.mxu1 %v3214_v18 }
 0x9c3   : > { %v6347_v44 = vpop.f32.mrb[104].mxu1 }
 0x9c4   : > { %v3180_v21 = vpop.f32.mrb[105].mxu1  ;;  %v3189_v35 = vadd.f32 %v6347_v44, %v7734_v19 }
 0x9c5   : > { %v6348_v48 = vpop.f32.mrb[106].mxu1  ;;  %v3181_v15 = vadd.f32 %v3180_v21, %v7734_v19  ;;  %v7520_v21 = vld [vmem:[%s9527_s3 + $0x30] ss:$12 sps:$4 sm:$0xff]  }
 0x9c6   : > { %v3192_v49 = vadd.f32 %v6348_v48, %v7734_v19  ;;  %v3183_v61 = vpop.f32.mrb[107].mxu1 }
 0x9c7   : > { %v3184_v30 = vadd.f32 %v3183_v61, %v7734_v19 }
 0x9c8   : > { %v3216_v14 = vpack.c.bf16 %v3192_v49, %v3189_v35  ;;  %v7521_v35 = vld [vmem:[%s9527_s3 + $0x50] ss:$12 sps:$4 sm:$0xff]   ;;  %v7522_v49 = vld [vmem:[%s9527_s3 + $0x4c] ss:$12 sps:$4 sm:$0xff]  }
 0x9c9   : > { %v3215_v39 = vpack.c.bf16 %v3184_v30, %v3181_v15 }
 0x9cb   : > { %6361 = vmatprep.subr.bf16.mxu1 %v3215_v39 }
 0x9cc   : > { %6362 = vmatpush3.bf16.msra.mxu1 %v3215_v39  ;;  %v7523_v39 = vld [vmem:[%s9527_s3 + $0x48] ss:$12 sps:$4 sm:$0xff]  }
 0x9cd   : > { %6363 = vmatprep.subr.bf16.mxu1 %v3216_v14 }
 0x9d0   : > { %6364 = vmatpush3.bf16.msra.mxu1 %v3216_v14 }
 0x9d6   : > { %v6351_v34 = vpop.f32.mrb[108].mxu1 }
 0x9d7   : > { %v3196_v50 = vpop.f32.mrb[109].mxu1  ;;  %v3205_v53 = vadd.f32 %v6351_v34, %v7734_v19  ;;  %v7524_v34 = vld [vmem:[%s9528_s4 + $0x20] sm:$0xff]  }
 0x9d8   : > { %v6352_v41 = vpop.f32.mrb[110].mxu1  ;;  %v3197_v12 = vadd.f32 %v3196_v50, %v7734_v19  ;;  %v7525_v50 = vld [vmem:[%s9528_s4 + $0x28] sm:$0xff]  }
 0x9d9   : > { %v3208_v3 = vadd.f32 %v6352_v41, %v7734_v19  ;;  %v3199_v16 = vpop.f32.mrb[111].mxu1  ;;  %v8796_v41 = vld [vmem:[%s9528_s4 + $0x30] sm:$0xff]  }
 0x9da   : > { %v3200_v60 = vadd.f32 %v3199_v16, %v7734_v19  ;;  %v7517_v19 = vld [vmem:[%s9527_s3 + $0x20] ss:$12 sps:$4 sm:$0xff]  }
 0x9db   : > { %v3218_v47 = vpack.c.bf16 %v3208_v3, %v3205_v53  ;;  %v9750_v53 = vld [vmem:[#allocation17_spill] sm:$0xff]  ;;  %v7527_v3 = vld [vmem:[%s7706_s18] sm:$0xff]  }
 0x9dc   : > { %v3217_v6 = vpack.c.bf16 %v3200_v60, %v3197_v12 }
 0x9de   : > { %6365 = vmatprep.subr.bf16.mxu1 %v3217_v6 }
 0x9df   : > { %6366 = vmatpush3.bf16.msra.mxu1 %v3217_v6 }
 0x9e0   : > { %6367 = vmatprep.subr.bf16.mxu1 %v3218_v47 }
 0x9e3   : > { %6368 = vmatpush3.bf16.msra.mxu1 %v3218_v47 }
 0x9e4   : > { %6377 = vmatprep.subr.bf16.mxu1 %v7514_v52 }
 0x9e6   : > { %6370 = vmatmul.mubr.bf16.vlgmr.msra.gmra.mrb[112].mxu1 %v7515_v9 }
 0x9e7   : > { %6373 = vmatprep.mubr.bf16.mxu1 %v7516_v7  ;;  %6378 = vmatpush3.bf16.msra.mxu1 %v7514_v52 }
 0x9e8   : > { %6379 = vmatprep.subr.bf16.mxu1 %v7517_v19 }
 0x9eb   : > { %6380 = vmatpush3.bf16.msra.mxu1 %v7517_v19 }
 0x9ec   : > { %6389 = vmatprep.subr.bf16.mxu1 %v7518_v1 }
 0x9ee   : > { %6374 = vmatmul.mubr.bf16.gmra.mrb[116].mxu1 %v7519_v42 }
 0xab9   : > { %v6371_v22 = vpop.f32.mrb[112].mxu1 }
 0xaba   : > { %v3253_v56 = vpop.f32.mrb[113].mxu1 }
 0xabb   : > { %v6372_v26 = vpop.f32.mrb[114].mxu1 }
 0xabc   : > { %v3285_v31 = vpack.c.bf16 %v6372_v26, %v6371_v22  ;;  %v3256_v18 = vpop.f32.mrb[115].mxu1 }
 0xabd   : > { %v3284_v58 = vpack.c.bf16 %v3256_v18, %v3253_v56 }
 0xabf   : > { %5751 = vmatmul.mubr.msk.bf16.vlgmr.msra.gmra.mrb[92].mxu0 %vm9740_vm10, %v3284_v58  ;;  %6381 = vmatprep.mubr.msk.bf16.mxu1 %vm9741_vm11, %v3284_v58  ;;  %vm9747_vm10 = vmmov %vm9682_vm0 }
 0xac0   : > { %6382 = vmatmul.mubr.msk.bf16.vlgmr.msra.gmra.mrb[120].mxu1 %vm9742_vm14, %v3285_v31  ;;  %3342 = vmatprep.mubr.bf16.mxu0 %v9690_v43  ;;  %vm9748_vm11 = vmmov %vm9682_vm0 }
 0xac1   : > { %v6375_v44 = vpop.f32.mrb[116].mxu1  ;;  %3439 = vmatpush1.bf16.msra.mxu0 %v7520_v21  ;;  %6390 = vmatpush3.bf16.msra.mxu1 %v7518_v1  ;;  %vm9749_vm14 = vmmov %vm9682_vm0 }
 0xac2   : > { %v3269_v48 = vpop.f32.mrb[117].mxu1  ;;  %6391 = vmatprep.subr.bf16.mxu1 %v7521_v35  ;;  %3440 = vmatprep.subr.bf16.mxu0 %v7522_v49 }
 0xac3   : > { %v6376_v61 = vpop.f32.mrb[118].mxu1 }
 0xac4   : > { %v3287_v15 = vpack.c.bf16 %v6376_v61, %v6375_v44  ;;  %v3272_v30 = vpop.f32.mrb[119].mxu1  ;;  %v9757_v44 = vld [vmem:[#allocation6_spill] sm:$0xff] }
 0xac5   : > { %v3286_v14 = vpack.c.bf16 %v3272_v30, %v3269_v48  ;;  %6392 = vmatpush3.bf16.msra.mxu1 %v7521_v35  ;;  %3441 = vmatpush1.bf16.msra.mxu0 %v7523_v39 }
 0xac6   : > { %6401 = vmatprep.subr.bf16.mxu1 %v7524_v34 }
 0xac7   : > { %5752 = vmatmul.mubr.msk.bf16.gmra.mrb[96].mxu0 %vm9682_vm0, %v3285_v31  ;;  %6385 = vmatprep.mubr.msk.bf16.mxu1 %vm9743_vm1, %v3286_v14  ;;  %vm9751_vm1 = vmmov %vm9682_vm0  ;;  %v9756_v31 = vld [vmem:[#allocation5_spill] sm:$0xff] }
 0xac8   : > { %6386 = vmatmul.mubr.msk.bf16.gmra.mrb[124].mxu1 %vm9744_vm15, %v3287_v15  ;;  %3352 = vmatprep.mubr.bf16.mxu0 %v9690_v43  ;;  %vm9752_vm15 = vmmov %vm9682_vm0 }
 0xac9   : > { %6393 = vmatprep.mubr.msk.bf16.mxu1 %vm9745_vm12, %v7929_v23  ;;  %vm9753_vm12 = vmmov %vm9682_vm0 }
 0xacf   : > { %5753 = vmatmul.mubr.msk.bf16.gmra.mrb[100].mxu0 %vm9746_vm13, %v3286_v14  ;;  %vm9754_vm13 = vmmov %vm9682_vm0 }
 0xad0   : > { %6394 = vmatmul.mubr.msk.bf16.vlgmr.msra.gmra.mrb[128].mxu1 %vm9747_vm10, %v7940_v46  ;;  %3362 = vmatprep.mubr.bf16.mxu0 %v9690_v43  ;;  %vm9755_vm10 = vcmask 523264  }
 0xad1   : > { %6397 = vmatprep.mubr.msk.bf16.mxu1 %vm9748_vm11, %v7952_v59  ;;  %6402 = vmatpush3.bf16.msra.mxu1 %v7524_v34  ;;  %vm9763_vm11 = vmmov %vm9682_vm0 }
 0xad2   : > { %6403 = vmatprep.subr.bf16.mxu1 %v7525_v50 }
 0xad5   : > { %6404 = vmatpush3.bf16.msra.mxu1 %v7525_v50 }
 0xad6   : > { %6413 = vmatprep.subr.bf16.mxu1 %v8796_v41 }
 0xad7   : > { %5754 = vmatmul.mubr.msk.bf16.gmra.mrb[104].mxu0 %vm9749_vm14, %v3287_v15  ;;  %vm9765_vm14 = vmmov %vm9682_vm0 }
 0xad8   : > { %6398 = vmatmul.mubr.msk.bf16.gmra.mrb[132].mxu1 %vm9682_vm0, %v9750_v53  ;;  %3470 = vmatprep.mubr.bf16.mxu0 %v9690_v43 }
 0xadf   : > { %5759 = vmatmul.mubr.msk.bf16.vlgmr.msra.gmra.mrb[92].mxu0 %vm9751_vm1, %v7929_v23  ;;  %vm9770_vm1 = vmmov %vm9682_vm0 }
 0xae0   : > { %3480 = vmatprep.mubr.bf16.mxu0 %v9690_v43 }
 0xae7   : > { %5760 = vmatmul.mubr.msk.bf16.gmra.mrb[96].mxu0 %vm9752_vm15, %v7940_v46  ;;  %vm9772_vm15 = vmmov %vm9682_vm0 }
 0xae8   : > { %3490 = vmatprep.mubr.bf16.mxu0 %v9690_v43 }
 0xaef   : > { %5761 = vmatmul.mubr.msk.bf16.gmra.mrb[100].mxu0 %vm9753_vm12, %v7952_v59  ;;  %vm9773_vm12 = vmmov %vm9682_vm0 }
 0xaf0   : > { %3500 = vmatprep.mubr.bf16.mxu0 %v9690_v43 }
 0xaf7   : > { %5762 = vmatmul.mubr.msk.bf16.gmra.mrb[104].mxu0 %vm9754_vm13, %v9750_v53  ;;  %vm9774_vm13 = vmmov %vm9682_vm0 }
 0xaf8   : > { %6433 = vmatprep.mubr.msk.bf16.mxu0 %vm9755_vm10, %v7527_v3 }
 0xb93   : > { %v8816_v16 = vpop.f32.mrb[120].mxu1 }
 0xb94   : > { %v8818_v23 = vpop.f32.mrb[121].mxu1 }
 0xb95   : > { %v8820_v12 = vpop.f32.mrb[122].mxu1 }
 0xb96   : > { %v8822_v46 = vpop.f32.mrb[123].mxu1 }
 0xb9b   : > { %v8824_v60 = vpop.f32.mrb[124].mxu1 }
 0xb9c   : > { %v8826_v47 = vpop.f32.mrb[125].mxu1 }
 0xb9d   : > { %v8828_v59 = vpop.f32.mrb[126].mxu1 }
 0xb9e   : > { %v8830_v6 = vpop.f32.mrb[127].mxu1 }
 0xba3   : > { %v8832_v52 = vpop.f32.mrb[128].mxu1 }
 0xba4   : > { %v8834_v9 = vpop.f32.mrb[129].mxu1 }
 0xba5   : > { %v8836_v7 = vpop.f32.mrb[130].mxu1 }
 0xba6   : > { %v8838_v19 = vpop.f32.mrb[131].mxu1 }
 0xbab   : > { %v8840_v1 = vpop.f32.mrb[132].mxu1 }
 0xbac   : > { %v8842_v42 = vpop.f32.mrb[133].mxu1 }
 0xbad   : > { %v8844_v22 = vpop.f32.mrb[134].mxu1 }
 0xbae   : > { %v8846_v56 = vpop.f32.mrb[135].mxu1 }
 0xbb2   : > { %v3472_v26 = vpop.f32.mrb[92].mxu0 }
 0xbb3   : > { %v6662_v18 = vadd.f32 %v9756_v31, %v3472_v26  ;;  %v3474_v58 = vpop.f32.mrb[93].mxu0 }
 0xbb4   : > { %v6664_v21 = vadd.f32 %v9757_v44, %v3474_v58  ;;  %v3476_v48 = vpop.f32.mrb[94].mxu0 }
 0xbb5   : > { %v5767_v35 = vmul.f32 -1.442695, %v6662_v18  ;;  %v6666_v49 = vadd.f32 %v9756_v31, %v3476_v48  ;;  %v3478_v61 = vpop.f32.mrb[95].mxu0 }
 0xbb6   : > { %v5775_v15 = vmul.f32 -1.442695, %v6664_v21  ;;  %v6668_v30 = vadd.f32 %v9757_v44, %v3478_v61 }
 0xbb7   : > { %7261 = vpow2.f32 %v5767_v35  ;;  %v5768_v14 = vmul.f32 -1.442695, %v6666_v49 }
 0xbb8   : > { %v5776_v39 = vmul.f32 -1.442695, %v6668_v30 }
 0xbb9   : > { %7263 = vpow2.f32 %v5768_v14 }
 0xbba   : > { %7265 = vpow2.f32 %v5775_v15  ;;  %v3482_v34 = vpop.f32.mrb[96].mxu0 }
 0xbbb   : > { %v6670_v50 = vadd.f32 %v9756_v31, %v3482_v34  ;;  %v3484_v53 = vpop.f32.mrb[97].mxu0  ;;  %7267 = vpow2.f32 %v5776_v39 }
 0xbbc   : > { %v6672_v3 = vadd.f32 %v9757_v44, %v3484_v53  ;;  %v3486_v26 = vpop.f32.mrb[98].mxu0 }
 0xbbd   : > { %v5769_v18 = vmul.f32 -1.442695, %v6670_v50  ;;  %v6674_v58 = vadd.f32 %v9756_v31, %v3486_v26  ;;  %v3488_v48 = vpop.f32.mrb[99].mxu0 }
 0xbbe   : > { %v5777_v21 = vmul.f32 -1.442695, %v6672_v3  ;;  %v6676_v35 = vadd.f32 %v9757_v44, %v3488_v48 }
 0xbbf   : > { %7269 = vpow2.f32 %v5769_v18  ;;  %v5770_v61 = vmul.f32 -1.442695, %v6674_v58 }
 0xbc0   : > { %v5778_v34 = vmul.f32 -1.442695, %v6676_v35 }
 0xbc1   : > { %v7262_v49 = vpop.eup %7261  ;;  %7271 = vpow2.f32 %v5770_v61 }
 0xbc2   : > { %v3608_v15 = vadd.f32 1.0, %v7262_v49  ;;  %v3492_v30 = vpop.f32.mrb[100].mxu0  ;;  %7273 = vpow2.f32 %v5777_v21 }
 0xbc3   : > { %v7264_v14 = vpop.eup %7263  ;;  %v6678_v39 = vadd.f32 %v9756_v31, %v3492_v30  ;;  %v3494_v53 = vpop.f32.mrb[101].mxu0 }
 0xbc4   : > { %v7266_v62 = vpop.eup %7265  ;;  %7275 = vrcp.f32 %v3608_v15  ;;  %v3609_v50 = vadd.f32 1.0, %v7264_v14  ;;  %v3496_v26 = vpop.f32.mrb[102].mxu0  ;;  %v6680_v61 = vadd.f32 %v9757_v44, %v3494_v53 }
 0xbc5   : > { %v5771_v32 = vmul.f32 -1.442695, %v6678_v39  ;;  %v6682_v3 = vadd.f32 %v9756_v31, %v3496_v26  ;;  %v3498_v18 = vpop.f32.mrb[103].mxu0  ;;  %v7268_v58 = vpop.eup %7267  ;;  %v3664_v48 = vadd.f32 1.0, %v7266_v62 }
 0xbc6   : > { %7277 = vrcp.f32 %v3609_v50  ;;  %v3665_v35 = vadd.f32 1.0, %v7268_v58  ;;  %v6684_v30 = vadd.f32 %v9757_v44, %v3498_v18  ;;  %v5779_v39 = vmul.f32 -1.442695, %v6680_v61  ;;  %v9758_v50 = vld [vmem:[#allocation7_spill] sm:$0xff] }
 0xbc7   : > { %7279 = vpow2.f32 %v5778_v34  ;;  %v5772_v49 = vmul.f32 -1.442695, %v6682_v3  ;;  %v3546_v62 = vadd.f32 %v8834_v9, %v9758_v50  ;;  %v3549_v61 = vadd.f32 %v8838_v19, %v9758_v50 }
 0xbc8   : > { %7281 = vpow2.f32 %v5771_v32  ;;  %v5780_v3 = vmul.f32 -1.442695, %v6684_v30 }
 0xbc9   : > { %v7270_v21 = vpop.eup %7269  ;;  %7283 = vpow2.f32 %v5772_v49 }
 0xbca   : > { %v3610_v4 = vadd.f32 1.0, %v7270_v21  ;;  %v3502_v15 = vpop.f32.mrb[104].mxu0  ;;  %7285 = vrcp.f32 %v3664_v48  ;;  %v3408_v48 = vadd.f32 %v8818_v23, %v9759_v54 }
 0xbcb   : > { %v7272_v14 = vpop.eup %7271  ;;  %v6686_v26 = vadd.f32 %v9756_v31, %v3502_v15  ;;  %v3504_v27 = vpop.f32.mrb[105].mxu0 }
 0xbcc   : > { %7287 = vrcp.f32 %v3610_v4  ;;  %v3611_v34 = vadd.f32 1.0, %v7272_v14  ;;  %v3506_v53 = vpop.f32.mrb[106].mxu0  ;;  %v7274_v32 = vpop.eup %7273  ;;  %v6688_v4 = vadd.f32 %v9757_v44, %v3504_v27 }
 0xbcd   : > { %7289 = vrcp.f32 %v3665_v35  ;;  %v5773_v58 = vmul.f32 -1.442695, %v6686_v26  ;;  %v6690_v18 = vadd.f32 %v9756_v31, %v3506_v53  ;;  %v3508_v49 = vpop.f32.mrb[107].mxu0  ;;  %v3666_v35 = vadd.f32 1.0, %v7274_v32 }
 0xbce   : > { %v7276_v21 = vpop.eup %7275  ;;  %7291 = vrcp.f32 %v3611_v34  ;;  %v3411_v31 = vadd.f32 %v8822_v46, %v9759_v54  ;;  %v6692_v19 = vadd.f32 %v9757_v44, %v3508_v49  ;;  %v5781_v34 = vmul.f32 -1.442695, %v6688_v4 }
 0xbcf   : > { %v3688_v15 = vmul.f32 %v7276_v21, %v3546_v62  ;;  %7293 = vpow2.f32 %v5779_v39  ;;  %v5774_v9 = vmul.f32 -1.442695, %v6690_v18  ;;  %v3554_v32 = vadd.f32 %v8832_v52, %v9758_v50 }
 0xbd0   : > { %v7278_v14 = vpop.eup %7277  ;;  %7295 = vpow2.f32 %v5773_v58  ;;  %v3416_v44 = vadd.f32 %v8816_v16, %v9759_v54  ;;  %v3557_v49 = vadd.f32 %v8836_v7, %v9758_v50  ;;  %v3419_v52 = vadd.f32 %v8820_v12, %v9759_v54  ;;  %v9760_v12 = vld [vmem:[#allocation9_spill] sm:$0xff] }
 0xbd1   : > { %v7280_v30 = vpop.eup %7279  ;;  %v3696_v26 = vadd.f32 %v3688_v15, %v3408_v48  ;;  %v3689_v53 = vmul.f32 %v7278_v14, %v3549_v61  ;;  %7297 = vpow2.f32 %v5780_v3  ;;  %v5782_v3 = vmul.f32 -1.442695, %v6692_v19 }
 0xbd2   : > { %v7282_v23 = vpop.eup %7281  ;;  %7299 = vpow2.f32 %v5774_v9  ;;  %v3667_v58 = vadd.f32 1.0, %v7280_v30 }
 0xbd3   : > { %7301 = vtanh.f32 %v3696_v26  ;;  %v3697_v62 = vadd.f32 %v3689_v53, %v3411_v31  ;;  %v3612_v39 = vadd.f32 1.0, %v7282_v23  ;;  %v7284_v27 = vpop.eup %7283 }
 0xbd4   : > { %7303 = vrcp.f32 %v3666_v35  ;;  %v7286_v18 = vpop.eup %7285  ;;  %v3613_v46 = vadd.f32 1.0, %v7284_v27 }
 0xbd5   : > { %7305 = vtanh.f32 %v3697_v62  ;;  %v3712_v53 = vsub.f32 1.0, %v7286_v18  ;;  %v3728_v27 = vmul.f32 %v7286_v18, %v9760_v12 }
 0xbd6   : > { %v7288_v21 = vpop.eup %7287  ;;  %7307 = vrcp.f32 %v3612_v39 }
 0xbd7   : > { %v7290_v48 = vpop.eup %7289  ;;  %v3690_v61 = vmul.f32 %v7288_v21, %v3554_v32  ;;  %7309 = vpow2.f32 %v5781_v34 }
 0xbd8   : > { %v7292_v15 = vpop.eup %7291  ;;  %7311 = vrcp.f32 %v3613_v46  ;;  %v3713_v39 = vsub.f32 1.0, %v7290_v48 }
 0xbd9   : > { %v7294_v4 = vpop.eup %7293  ;;  %v3698_v9 = vadd.f32 %v3690_v61, %v3416_v44  ;;  %v3691_v14 = vmul.f32 %v7292_v15, %v3557_v49  ;;  %7313 = vrcp.f32 %v3667_v58  ;;  %v3562_v58 = vadd.f32 %v8842_v42, %v9758_v50  ;;  %v9761_v44 = vld [vmem:[#allocation10_spill] sm:$0xff] }
 0xbda   : > { %v7296_v35 = vpop.eup %7295  ;;  %7315 = vpow2.f32 %v5782_v3  ;;  %v3668_v23 = vadd.f32 1.0, %v7294_v4  ;;  %v3729_v49 = vmul.f32 %v7290_v48, %v9761_v44  ;;  %v3424_v4 = vadd.f32 %v8826_v47, %v9759_v54 }
 0xbdb   : > { %v7298_v30 = vpop.eup %7297  ;;  %7317 = vtanh.f32 %v3698_v9  ;;  %v3699_v31 = vadd.f32 %v3691_v14, %v3419_v52  ;;  %v3614_v16 = vadd.f32 1.0, %v7296_v35  ;;  %v3565_v52 = vadd.f32 %v8846_v56, %v9758_v50  ;;  %v9762_v56 = vld [vmem:[#allocation11_spill] sm:$0xff] }
 0xbdc   : > { %v7300_v26 = vpop.eup %7299  ;;  %v3669_v46 = vadd.f32 1.0, %v7298_v30  ;;  %v3427_v42 = vadd.f32 %v8830_v6, %v9759_v54  ;;  %v3570_v6 = vadd.f32 %v8840_v1, %v9758_v50  ;;  %v3435_v1 = vadd.f32 %v8828_v59, %v9759_v54 }
 0xbdd   : > { %v7302_v7 = vpop.eup %7301  ;;  %7319 = vtanh.f32 %v3699_v31  ;;  %v3615_v19 = vadd.f32 1.0, %v7300_v26 }
 0xbde   : > { %v7304_v62 = vpop.eup %7303  ;;  %7321 = vrcp.f32 %v3614_v16  ;;  %v3720_v34 = vmul.f32 %v7302_v7, %v3712_v53 }
 0xbdf   : > { %v7306_v32 = vpop.eup %7305  ;;  %7323 = vrcp.f32 %v3615_v19  ;;  %v3714_v16 = vsub.f32 1.0, %v7304_v62 }
 0xbe0   : > { %v7308_v21 = vpop.eup %7307  ;;  %v3721_v3 = vmul.f32 %v7306_v32, %v3713_v39  ;;  %v3736_v61 = vadd.f32 %v3728_v27, %v3720_v34  ;;  %7325 = vrcp.f32 %v3668_v23  ;;  %v3730_v39 = vmul.f32 %v7304_v62, %v9762_v56 }
 0xbe1   : > { %v7310_v15 = vpop.eup %7309  ;;  %v3692_v9 = vmul.f32 %v7308_v21, %v3562_v58  ;;  %7327 = vrcp.f32 %v3669_v46  ;;  %v9764_v46 = vld [vmem:[#allocation12_spill] sm:$0xff]  ;;  %v3573_v62 = vadd.f32 %v8844_v22, %v9758_v50 }
 0xbe2   : > { %v7312_v18 = vpop.eup %7311  ;;  %v3737_v14 = vadd.f32 %v3729_v49, %v3721_v3  ;;  %v3670_v7 = vadd.f32 1.0, %v7310_v15  ;;  %v3432_v3 = vadd.f32 %v8824_v60, %v9759_v54  ;;  %v7528_v54 = vld [vmem:[%s9528_s4 + $0x38] sm:$0xff]  }
 0xbe3   : > { %v7314_v35 = vpop.eup %7313  ;;  %v3700_v30 = vadd.f32 %v3692_v9, %v3424_v4  ;;  %v3693_v31 = vmul.f32 %v7312_v18, %v3565_v52 }
 0xbe4   : > { %v7316_v48 = vpop.eup %7315  ;;  %v3744_v26 = vpack.c.bf16 %v3737_v14, %v3736_v61  ;;  %v3715_v23 = vsub.f32 1.0, %v7314_v35  ;;  %v3731_v21 = vmul.f32 %v7314_v35, %v9764_v46 }
 0xbe5   : > { %v7318_v53 = vpop.eup %7317  ;;  %7329 = vtanh.f32 %v3700_v30  ;;  %v3701_v47 = vadd.f32 %v3693_v31, %v3427_v42  ;;  %v3671_v12 = vadd.f32 1.0, %v7316_v48  ;;  %v9766_v42 = vld [vmem:[#allocation13_spill] sm:$0xff]  ;;  %v9767_v48 = vld [vmem:[#allocation14_spill] sm:$0xff] }
 0xbe6   : > { %v3722_v19 = vmul.f32 %v7318_v53, %v3714_v16  ;;  %6405 = vmatprep.mubr.msk.bf16.mxu1 %vm9763_vm11, %v3744_v26 }
 0xbe7   : > { %v7320_v34 = vpop.eup %7319  ;;  %7331 = vtanh.f32 %v3701_v47 }
 0xbe8   : > { %v7322_v27 = vpop.eup %7321  ;;  %v3738_v32 = vadd.f32 %v3730_v39, %v3722_v19  ;;  %v3723_v58 = vmul.f32 %v7320_v34, %v3715_v23  ;;  %7333 = vrcp.f32 %v3670_v7 }
 0xbe9   : > { %v3694_v44 = vmul.f32 %v7322_v27, %v3570_v6  ;;  %v7324_v49 = vpop.eup %7323  ;;  %7335 = vrcp.f32 %v3671_v12  ;;  %v9768_v6 = vld [vmem:[#allocation15_spill] sm:$0xff] }
 0xbea   : > { %v3739_v61 = vadd.f32 %v3731_v21, %v3723_v58  ;;  %v7326_v15 = vpop.eup %7325  ;;  %v3695_v52 = vmul.f32 %v7324_v49, %v3573_v62  ;;  %v9769_v58 = vld [vmem:[#allocation16_spill] sm:$0xff]  ;;  %v9771_v49 = vld [vmem:[#allocation18_spill] sm:$0xff] }
 0xbeb   : > { %v3702_v4 = vadd.f32 %v3694_v44, %v3432_v3  ;;  %v7328_v18 = vpop.eup %7327  ;;  %v3716_v60 = vsub.f32 1.0, %v7326_v15  ;;  %v3732_v30 = vmul.f32 %v7326_v15, %v9766_v42 }
 0xbec   : > { %v3745_v9 = vpack.c.bf16 %v3739_v61, %v3738_v32  ;;  %v3703_v14 = vadd.f32 %v3695_v52, %v3435_v1  ;;  %v3717_v22 = vsub.f32 1.0, %v7328_v18  ;;  %v3733_v16 = vmul.f32 %v7328_v18, %v9767_v48 }
 0xbed   : > { %7337 = vtanh.f32 %v3702_v4 }
 0xbee   : > { %6406 = vmatmul.mubr.msk.bf16.vlgmr.msra.gmra.mrb[136].mxu1 %vm9765_vm14, %v3745_v9  ;;  %7339 = vtanh.f32 %v3703_v14  ;;  %vm9776_vm14 = vmmov %vm9682_vm0 }
 0xbef   : > { %v7330_v35 = vpop.eup %7329  ;;  %6414 = vmatpush3.bf16.msra.mxu1 %v8796_v41  ;;  %v7529_v41 = vld [vmem:[%s9527_s3 + $0x94] ss:$12 sps:$4 sm:$0xff]  }
 0xbf0   : > { %v3724_v50 = vmul.f32 %v7330_v35, %v3716_v60  ;;  %6415 = vmatprep.subr.bf16.mxu1 %v7528_v54 }
 0xbf1   : > { %v7332_v59 = vpop.eup %7331 }
 0xbf2   : > { %v3725_v31 = vmul.f32 %v7332_v59, %v3717_v22  ;;  %v3740_v26 = vadd.f32 %v3732_v30, %v3724_v50  ;;  %v7334_v53 = vpop.eup %7333  ;;  %v7530_v30 = vld [vmem:[%s9527_s3 + $0x90] ss:$12 sps:$4 sm:$0xff]   ;;  %v7532_v59 = vld [vmem:[%s9527_s3 + $0xa8] ss:$12 sps:$4 sm:$0xff]  }
 0xbf3   : > { %6416 = vmatpush3.bf16.msra.mxu1 %v7528_v54  ;;  %v7336_v7 = vpop.eup %7335  ;;  %v3718_v56 = vsub.f32 1.0, %v7334_v53  ;;  %v3734_v12 = vmul.f32 %v7334_v53, %v9768_v6  ;;  %v7531_v54 = vld [vmem:[%s9527_s3 + $0xac] ss:$12 sps:$4 sm:$0xff]   ;;  %v4062_v6 = vrot.slane %v8698_v45, 7 }
 0xbf4   : > { %v3741_v47 = vadd.f32 %v3733_v16, %v3725_v31  ;;  %4135 = vmatprep.subr.bf16.mxu1 %v7529_v41  ;;  %v3719_v23 = vsub.f32 1.0, %v7336_v7  ;;  %v3735_v46 = vmul.f32 %v7336_v7, %v9769_v58  ;;  %v7533_v31 = vld [vmem:[%s9527_s3 + $0x64] ss:$12 sps:$4 sm:$0xff]   ;;  %v4047_v58 = vrot.slane %v8528_v55, 7 }
 0xbf6   : > { %v3746_v19 = vpack.c.bf16 %v3741_v47, %v3740_v26 }
 0xbf7   : > { %v7338_v39 = vpop.eup %7337 }
 0xbf8   : > { %6409 = vmatprep.mubr.msk.bf16.mxu1 %vm9682_vm0, %v3746_v19  ;;  %v3726_v34 = vmul.f32 %v7338_v39, %v3718_v56  ;;  %v7340_v27 = vpop.eup %7339 }
 0xbf9   : > { %v3727_v32 = vmul.f32 %v7340_v27, %v3719_v23 }
 0xbfa   : > { %v3742_v21 = vadd.f32 %v3734_v12, %v3726_v34 }
 0xbfb   : > { %v3743_v3 = vadd.f32 %v3735_v46, %v3727_v32  ;;  %v4016_v32 = vrot.slane %v8548_v20, 1  ;;  %v4017_v46 = vrot.slane %v8552_v25, 1 }
 0xbfd   : > { %v3747_v62 = vpack.c.bf16 %v3743_v3, %v3742_v21  ;;  %v9775_v21 = vld [vmem:[#allocation2_spill] sm:$0xff]  ;;  %v4015_v3 = vrot.slane %v8528_v55, 1 }
 0xbfe   : > { %vm1720_vm10 = vcmp.lt.s32.totalorder %v9775_v21, 7  ;;  %vm1722_vm11 = vcmp.lt.s32.totalorder %v9775_v21, 1 }
 0xbff   : > { %6410 = vmatmul.mubr.msk.bf16.gmra.mrb[140].mxu1 %vm9770_vm1, %v3747_v62  ;;  %v4048_v62 = vrot.slane %v8548_v20, 7  ;;  %vm9797_vm1 = vmmov %vm9682_vm0 }
 0xcc1   : > { %v6407_v44 = vpop.f32.mrb[136].mxu1 }
 0xcc2   : > { %v3803_v61 = vadd.f32 %v6407_v44, %v9771_v49  ;;  %v3794_v15 = vpop.f32.mrb[137].mxu1  ;;  %v4078_v44 = vsel %vm1722_vm11, %v4062_v6, %v4047_v58 }
 0xcc3   : > { %v3795_v1 = vadd.f32 %v3794_v15, %v9771_v49  ;;  %v6408_v4 = vpop.f32.mrb[138].mxu1  ;;  %v4022_v15 = vrot.slane %v8626_v57, 1 }
 0xcc4   : > { %v3806_v52 = vadd.f32 %v6408_v4, %v9771_v49  ;;  %v3797_v9 = vpop.f32.mrb[139].mxu1  ;;  %v3827_v14 = vmax.f32 %v3803_v61, 0.0  ;;  %v4045_v61 = vsel %vm1720_vm10, %v4015_v3, %v4016_v32  ;;  %v4077_v4 = vsel %vm1722_vm11, %v4047_v58, %v4048_v62 }
 0xcc5   : > { %v3798_v18 = vadd.f32 %v3797_v9, %v9771_v49  ;;  %v3825_v35 = vmax.f32 %v3795_v1, 0.0  ;;  %v4079_v1 = vsel %vm8018_vm2, %v4045_v61, %v4078_v44  ;;  %vm9781_vm2 = vmmov %vm9682_vm0  ;;  %v9793_v44 = vld [vmem:[#allocation31_spill] sm:$0xff] }
 0xcc6   : > { %v3828_v60 = vmax.f32 %v3806_v52, 0.0  ;;  %v4019_v52 = vrot.slane %v8606_v40, 1 }
 0xcc7   : > { %v3826_v22 = vmax.f32 %v3798_v18, 0.0 }
 0xcc8   : > { %v3834_v50 = vpack.c.bf16 %v3828_v60, %v3827_v14  ;;  %v4018_v60 = vrot.slane %v8578_v5, 1 }
 0xcc9   : > { %v3833_v42 = vpack.c.bf16 %v3826_v22, %v3825_v35  ;;  %v4050_v35 = vrot.slane %v8578_v5, 7 }
 0xcca   : > { %v4042_v22 = vsel %vm1720_vm10, %v4018_v60, %v4019_v52 }
 0xccb   : > { %6417 = vmatprep.mubr.msk.bf16.mxu1 %vm9772_vm15, %v3833_v42  ;;  %v7534_v42 = vld [vmem:[%s9527_s3 + $0x60] ss:$12 sps:$4 sm:$0xff]  }
 0xccc   : > { %6418 = vmatmul.mubr.msk.bf16.vlgmr.msra.gmra.mrb[144].mxu1 %vm9773_vm12, %v3834_v50  ;;  %v4049_v50 = vrot.slane %v8552_v25, 7 }
 0xccd   : > { %4136 = vmatpush1.bf16.msra.mxu1 %v7530_v30  ;;  %v4043_v30 = vsel %vm1720_vm10, %v4017_v46, %v4018_v60  ;;  %v4060_v60 = vrot.slane %v8686_v51, 7 }
 0xcce   : > { %4137 = vmatprep.subr.bf16.mxu1 %v7531_v54  ;;  %v4075_v54 = vsel %vm1722_vm11, %v4049_v50, %v4050_v35 }
 0xcd1   : > { %4138 = vmatpush1.bf16.msra.mxu1 %v7532_v59  ;;  %v7535_v59 = vld [vmem:[%s9527_s3 + $0x7c] ss:$12 sps:$4 sm:$0xff]  }
 0xcd2   : > { %4369 = vmatprep.subr.bf16.mxu1 %v7533_v31  ;;  %v6411_v48 = vpop.f32.mrb[140].mxu1  ;;  %v4056_v31 = vrot.slane %v8653_v36, 7 }
 0xcd3   : > { %v3819_v16 = vadd.f32 %v6411_v48, %v9771_v49  ;;  %v3810_v26 = vpop.f32.mrb[141].mxu1  ;;  %v4082_v48 = vsel %vm8046_vm5, %v4042_v22, %v4075_v54 }
 0xcd4   : > { %v3811_v53 = vadd.f32 %v3810_v26, %v9771_v49  ;;  %v6412_v47 = vpop.f32.mrb[142].mxu1  ;;  %v4021_v26 = vrot.slane %v8617_v28, 1 }
 0xcd5   : > { %v3822_v41 = vadd.f32 %v6412_v47, %v9771_v49  ;;  %v3813_v7 = vpop.f32.mrb[143].mxu1  ;;  %v3831_v56 = vmax.f32 %v3819_v16, 0.0  ;;  %v4076_v16 = vsel %vm1722_vm11, %v4048_v62, %v4049_v50  ;;  %v4023_v62 = vrot.slane %v8650_v17, 1 }
 0xcd6   : > { %v3814_v19 = vadd.f32 %v3813_v7, %v9771_v49  ;;  %v3829_v23 = vmax.f32 %v3811_v53, 0.0  ;;  %v4044_v49 = vsel %vm1720_vm10, %v4016_v32, %v4017_v46  ;;  %v4081_v47 = vsel %vm8042_vm4, %v4043_v30, %v4076_v16  ;;  %vm9787_vm4 = vmmov %vm9682_vm0 }
 0xcd7   : > { %v3832_v39 = vmax.f32 %v3822_v41, 0.0  ;;  %v4080_v18 = vsel %vm8029_vm3, %v4044_v49, %v4077_v4  ;;  %v7536_v41 = vld [vmem:[%s9527_s3 + $0x78] ss:$12 sps:$4 sm:$0xff]   ;;  %v8995_v7 = vpack.c.bf16 %v4082_v48, %v4081_v47  ;;  %vm9784_vm3 = vmmov %vm9682_vm0  ;;  %v4038_v4 = vsel %vm1720_vm10, %v4022_v15, %v4023_v62 }
 0xcd8   : > { %v3830_v34 = vmax.f32 %v3814_v19, 0.0  ;;  %v8965_v14 = vpack.c.bf16 %v4080_v18, %v4079_v1  ;;  %v4020_v19 = vrot.slane %v8615_v24, 1  ;;  %v4054_v1 = vrot.slane %v8626_v57, 7  ;;  %v9788_v47 = vld [vmem:[#allocation29_spill] sm:$0xff] }
 0xcd9   : > { %v3836_v12 = vpack.c.bf16 %v3832_v39, %v3831_v56  ;;  %v4052_v56 = vrot.slane %v8615_v24, 7  ;;  %v7537_v39 = vld [vmem:[%s9527_s3 + $0xc4] ss:$12 sps:$4 sm:$0xff]   ;;  %v4039_v9 = vsel %vm1720_vm10, %v4021_v26, %v4022_v15  ;;  %v4025_v50 = vrot.slane %v8661_v63, 1 }
 0xcda   : > { %v3835_v27 = vpack.c.bf16 %v3830_v34, %v3829_v23  ;;  %v4040_v23 = vsel %vm1720_vm10, %v4020_v19, %v4021_v26  ;;  %v4051_v34 = vrot.slane %v8606_v40, 7  ;;  %v4055_v16 = vrot.slane %v8650_v17, 7 }
 0xcdb   : > { %vm9789_vm5 = vnez %v9788_v47  ;;  %v4061_v47 = vrot.slane %v8693_v37, 7 }
 0xcdc   : > { %6421 = vmatprep.mubr.msk.bf16.mxu1 %vm9774_vm13, %v3835_v27  ;;  %v4073_v27 = vsel %vm1722_vm11, %v4051_v34, %v4052_v56  ;;  %v4074_v46 = vsel %vm1722_vm11, %v4050_v35, %v4051_v34  ;;  %v4069_v53 = vsel %vm1722_vm11, %v4055_v16, %v4056_v31  ;;  %vm9802_vm13 = vmmov %vm9682_vm0 }
 0xcdd   : > { %6422 = vmatmul.mubr.msk.bf16.gmra.mrb[148].mxu1 %vm9776_vm14, %v3836_v12  ;;  %v4041_v12 = vsel %vm1720_vm10, %v4019_v52, %v4020_v19  ;;  %v4084_v58 = vsel %vm8075_vm7, %v4040_v23, %v4073_v27  ;;  %v4053_v52 = vrot.slane %v8617_v28, 7  ;;  %v4070_v19 = vsel %vm1722_vm11, %v4054_v1, %v4055_v16  ;;  %vm9792_vm7 = vmmov %vm9682_vm0  ;;  %v9800_v16 = vld [vmem:[#allocation32_spill] sm:$0xff] }
 0xcde   : > { %4167 = vmatprep.mubr.bf16.mxu1 %v9690_v43  ;;  %v4083_v49 = vsel %vm8071_vm6, %v4041_v12, %v4074_v46  ;;  %v4026_v12 = vrot.slane %v8672_v0, 1  ;;  %v4058_v27 = vrot.slane %v8672_v0, 7  ;;  %vm9801_vm12 = vnez %v9800_v16 }
 0xcdf   : > { %v9019_v61 = vpack.c.bf16 %v4084_v58, %v4083_v49  ;;  %v4071_v18 = vsel %vm1722_vm11, %v4053_v52, %v4054_v1  ;;  %v4072_v22 = vsel %vm1722_vm11, %v4052_v56, %v4053_v52  ;;  %v4027_v56 = vrot.slane %v8683_v2, 1 }
 0xce0   : > { %v4086_v35 = vsel %vm8098_vm9, %v4038_v4, %v4071_v18  ;;  %v4085_v30 = vsel %vm8094_vm8, %v4039_v9, %v4072_v22  ;;  %v4057_v58 = vrot.slane %v8661_v63, 7  ;;  %v4035_v46 = vsel %vm1720_vm10, %v4025_v50, %v4026_v12  ;;  %v9795_v4 = vld [vmem:[#allocation30_spill] sm:$0xff] }
 0xce1   : > { %v9040_v54 = vpack.c.bf16 %v4086_v35, %v4085_v30  ;;  %v4034_v32 = vsel %vm1720_vm10, %v4026_v12, %v4027_v56  ;;  %vm9794_vm8 = vnez %v9793_v44  ;;  %v4029_v1 = vrot.slane %v8693_v37, 1  ;;  %v9798_v30 = vld [vmem:[#allocation33_spill] sm:$0xff] }
 0xce2   : > { %v4068_v15 = vsel %vm1722_vm11, %v4056_v31, %v4057_v58  ;;  %vm9796_vm9 = vnez %v9795_v4  ;;  %v4028_v18 = vrot.slane %v8686_v51, 1  ;;  %v4059_v22 = vrot.slane %v8683_v2, 7 }
 0xce3   : > { %v4089_v52 = vsel %vm9796_vm9, %v4035_v46, %v4068_v15  ;;  %vm9799_vm15 = vnez %v9798_v30  ;;  %vm9817_vm9 = vmmov %vm9797_vm1 }
 0xce4   : > { %v4032_v35 = vsel %vm1720_vm10, %v4028_v18, %v4029_v1  ;;  %v4066_v31 = vsel %vm1722_vm11, %v4058_v27, %v4059_v22 }
 0xce5   : > { %5799 = vmatmul.mubr.msk.bf16.vlgmr.msra.gmra.mrb[152].mxu1 %vm9682_vm0, %v8965_v14 }
 0xce6   : > { %4177 = vmatprep.mubr.bf16.mxu1 %v9690_v43  ;;  %4370 = vmatpush1.bf16.msra.mxu1 %v7534_v42  ;;  %v4065_v42 = vsel %vm1722_vm11, %v4059_v22, %v4060_v60 }
 0xce7   : > { %4371 = vmatprep.subr.bf16.mxu1 %v7535_v59  ;;  %v4024_v59 = vrot.slane %v8653_v36, 1 }
 0xce9   : > { %v4036_v48 = vsel %vm1720_vm10, %v4024_v59, %v4025_v50  ;;  %v4037_v26 = vsel %vm1720_vm10, %v4023_v62, %v4024_v59  ;;  %v4067_v62 = vsel %vm1722_vm11, %v4057_v58, %v4058_v27  ;;  %v4033_v50 = vsel %vm1720_vm10, %v4027_v56, %v4028_v18  ;;  %v9805_v27 = vld [vmem:[#allocation35_spill] sm:$0xff] }
 0xcea   : > { %4372 = vmatpush1.bf16.msra.mxu1 %v7536_v41  ;;  %v4088_v41 = vsel %vm9789_vm5, %v4036_v48, %v4069_v53  ;;  %v4090_v49 = vsel %vm9794_vm8, %v4034_v32, %v4067_v62  ;;  %v4092_v59 = vsel %vm9799_vm15, %v4032_v35, %v4065_v42  ;;  %v4030_v48 = vrot.slane %v8698_v45, 1  ;;  %v9808_v62 = vld [vmem:[#allocation36_spill] sm:$0xff]  ;;  %vm9816_vm8 = vmmov %vm9797_vm1 }
 0xceb   : > { %4627 = vmatprep.subr.bf16.mxu1 %v7537_v39  ;;  %v9790_v39 = vld [vmem:[#allocation28_spill] sm:$0xff]  ;;  %v9082_v9 = vpack.c.bf16 %v4090_v49, %v4089_v52  ;;  %v4063_v56 = vsel %vm1722_vm11, %v4061_v47, %v4062_v6  ;;  %vm9806_vm0 = vnez %v9805_v27  ;;  %vm9818_vm15 = vmmov %vm9797_vm1 }
 0xcec   : > { %vm9791_vm6 = vnez %v9790_v39  ;;  %v4064_v39 = vsel %vm1722_vm11, %v4060_v60, %v4061_v47  ;;  %v7539_v47 = vld [vmem:[%s7706_s18 + $0x8] sm:$0xff]   ;;  %vm9809_vm11 = vcmask 523264   ;;  %v7546_v27 = vld [vmem:[%s7706_s18 + $0x30] sm:$0xff]  }
 0xced   : > { %5800 = vmatmul.mubr.msk.bf16.gmra.mrb[156].mxu1 %vm9781_vm2, %v8995_v7  ;;  %v4087_v23 = vsel %vm9791_vm6, %v4037_v26, %v4070_v19  ;;  %v4091_v26 = vsel %vm9801_vm12, %v4033_v50, %v4066_v31  ;;  %v4046_v19 = vsel %vm1720_vm10, %v4030_v48, %v4015_v3  ;;  %vm9810_vm2 = vmmov %vm9809_vm11 }
 0xcee   : > { %4187 = vmatprep.mubr.bf16.mxu1 %v9690_v43  ;;  %v9061_v34 = vpack.c.bf16 %v4088_v41, %v4087_v23  ;;  %v9103_v53 = vpack.c.bf16 %v4092_v59, %v4091_v26  ;;  %v4031_v41 = vsel %vm1720_vm10, %v4029_v1, %v4030_v48  ;;  %v9803_v23 = vld [vmem:[#allocation34_spill] sm:$0xff]  ;;  %v4094_v32 = vsel %vm9806_vm0, %v4046_v19, %v4063_v56  ;;  %vm9807_vm10 = vmmov %vm9797_vm1  ;;  %v7541_v19 = vld [vmem:[%s9527_s3 + $0xb0] ss:$12 sps:$4 sm:$0xff]  }
 0xcef   : > { %vm9804_vm14 = vnez %v9803_v23  ;;  %v7538_v26 = vld [vmem:[%s9527_s3 + $0x98] ss:$12 sps:$4 sm:$0xff]   ;;  %v7542_v56 = vld [vmem:[%s9527_s3 + $0x68] ss:$12 sps:$4 sm:$0xff]   ;;  %vm9813_vm5 = vmmov %vm9810_vm2 }
 0xcf0   : > { %v4093_v12 = vsel %vm9804_vm14, %v4031_v41, %v4064_v39  ;;  %v7540_v41 = vld [vmem:[%s7706_s18 + $0x10] sm:$0xff]   ;;  %v7543_v39 = vld [vmem:[%s7706_s18 + $0x18] sm:$0xff]   ;;  %v7544_v23 = vld [vmem:[%s7706_s18 + $0x20] sm:$0xff]  }
 0xcf1   : > { %v9125_v58 = vpack.c.bf16 %v4094_v32, %v4093_v12  ;;  %v7545_v12 = vld [vmem:[%s7706_s18 + $0x28] sm:$0xff]   ;;  %vm9814_vm6 = vmmov %vm9810_vm2  ;;  %v7547_v32 = vld [vmem:[%s7706_s18 + $0x38] sm:$0xff]   ;;  %s271_s18 = scalar_lea.vmem %s9530_s6, %s5898_s19 }
 0xcf2   : > { %vm9819_vm12 = vmmov %vm9797_vm1 }
 0xcf3   : > { %vm9821_vm14 = vmmov %vm9797_vm1 }
 0xcf4   : > { %vm9822_vm0 = vmmov %vm9797_vm1 }
 0xcf5   : > { %5801 = vmatmul.mubr.msk.bf16.gmra.mrb[160].mxu1 %vm9784_vm3, %v9019_v61  ;;  %vm9811_vm3 = vmmov %vm9810_vm2 }
 0xcf6   : > { %4197 = vmatprep.mubr.bf16.mxu1 %v9690_v43 }
 0xcfd   : > { %5802 = vmatmul.mubr.msk.bf16.gmra.mrb[164].mxu1 %vm9787_vm4, %v9040_v54  ;;  %vm9812_vm4 = vmmov %vm9810_vm2 }
 0xcfe   : > { %4207 = vmatprep.mubr.bf16.mxu1 %v9690_v43 }
 0xd05   : > { %5803 = vmatmul.mubr.msk.bf16.gmra.mrb[168].mxu1 %vm9792_vm7, %v9061_v34  ;;  %vm9815_vm7 = vmmov %vm9810_vm2 }
 0xd06   : > { %4217 = vmatprep.mubr.bf16.mxu1 %v9690_v43 }
 0xd0d   : > { %5804 = vmatmul.mubr.msk.bf16.gmra.mrb[172].mxu1 %vm9797_vm1, %v9082_v9 }
 0xd0e   : > { %4227 = vmatprep.mubr.bf16.mxu1 %v9690_v43 }
 0xd15   : > { %5805 = vmatmul.mubr.msk.bf16.gmra.mrb[176].mxu1 %vm9802_vm13, %v9103_v53  ;;  %vm9820_vm13 = vmmov %vm9797_vm1 }
 0xd16   : > { %4237 = vmatprep.mubr.bf16.mxu1 %v9690_v43 }
 0xd1d   : > { %5806 = vmatmul.mubr.msk.bf16.gmra.mrb[180].mxu1 %vm9807_vm10, %v9125_v58  ;;  %vm9823_vm10 = vmmov %vm9822_vm0 }
 0xd1e   : > { %4401 = vmatprep.mubr.bf16.mxu1 %v9690_v43 }
 0xd9f   : > { %v6419_v3 = vpop.f32.mrb[144].mxu1 }
 0xda0   : > { %v3883_v6 = vpop.f32.mrb[145].mxu1  ;;  %v3892_v44 = vadd.f32 %v6419_v3, %v9808_v62  ;;  %v7548_v3 = vld [vmem:[%s9527_s3 + $0x80] ss:$12 sps:$4 sm:$0xff]  }
 0xda1   : > { %v6420_v46 = vpop.f32.mrb[146].mxu1  ;;  %v3884_v1 = vadd.f32 %v3883_v6, %v9808_v62  ;;  %v7549_v6 = vld [vmem:[%s9527_s3 + $0xc8] ss:$12 sps:$4 sm:$0xff]  }
 0xda2   : > { %v3895_v49 = vadd.f32 %v6420_v46, %v9808_v62  ;;  %v3886_v15 = vpop.f32.mrb[147].mxu1 }
 0xda3   : > { %v3887_v4 = vadd.f32 %v3886_v15, %v9808_v62 }
 0xda4   : > { %v3915_v52 = vpack.c.bf16 %v3895_v49, %v3892_v44 }
 0xda5   : > { %v3914_v18 = vpack.c.bf16 %v3887_v4, %v3884_v1 }
 0xda7   : > { %6425 = vmatprep.subr.bf16.mxu0 %v3914_v18 }
 0xda8   : > { %6426 = vmatpush3.bf16.msra.mxu0 %v3914_v18 }
 0xda9   : > { %6427 = vmatprep.subr.bf16.mxu0 %v3915_v52 }
 0xdac   : > { %6428 = vmatpush3.bf16.msra.mxu0 %v3915_v52  ;;  %v7553_v52 = vld [vmem:[%s9527_s3 + $0xd8] ss:$12 sps:$4 sm:$0xff]  }
 0xdb0   : > { %v6423_v60 = vpop.f32.mrb[148].mxu1 }
 0xdb1   : > { %v3899_v35 = vpop.f32.mrb[149].mxu1  ;;  %v3908_v50 = vadd.f32 %v6423_v60, %v9808_v62 }
 0xdb2   : > { %v6424_v22 = vpop.f32.mrb[150].mxu1  ;;  %v3900_v59 = vadd.f32 %v3899_v35, %v9808_v62 }
 0xdb3   : > { %v3911_v42 = vadd.f32 %v6424_v22, %v9808_v62  ;;  %v3902_v30 = vpop.f32.mrb[151].mxu1 }
 0xdb4   : > { %v3903_v31 = vadd.f32 %v3902_v30, %v9808_v62 }
 0xdb5   : > { %v3917_v48 = vpack.c.bf16 %v3911_v42, %v3908_v50 }
 0xdb6   : > { %v3916_v16 = vpack.c.bf16 %v3903_v31, %v3900_v59 }
 0xdb8   : > { %6429 = vmatprep.subr.bf16.mxu0 %v3916_v16 }
 0xdb9   : > { %6430 = vmatpush3.bf16.msra.mxu0 %v3916_v16 }
 0xdba   : > { %6431 = vmatprep.subr.bf16.mxu0 %v3917_v48 }
 0xdbd   : > { %6432 = vmatpush3.bf16.msra.mxu0 %v3917_v48 }
 0xdbe   : > { %6449 = vmatprep.subr.bf16.mxu0 %v7538_v26 }
 0xdc0   : > { %6434 = vmatmul.mubr.msk.bf16.vlgmr.msra.gmra.mrb[108].mxu0 %vm9809_vm11, %v7539_v47  ;;  %vm9824_vm11 = vmmov %vm9822_vm0  ;;  %v9845_v47 = vld [vmem:[#allocation46_spill] sm:$0xff] }
 0xdc1   : > { %6437 = vmatprep.mubr.msk.bf16.mxu0 %vm9810_vm2, %v7540_v41  ;;  %6450 = vmatpush3.bf16.msra.mxu0 %v7538_v26  ;;  %vm9825_vm2 = vmmov %vm9822_vm0 }
 0xdc2   : > { %6451 = vmatprep.subr.bf16.mxu0 %v7541_v19 }
 0xdc5   : > { %6452 = vmatpush3.bf16.msra.mxu0 %v7541_v19 }
 0xdc6   : > { %6469 = vmatprep.subr.bf16.mxu0 %v7542_v56 }
 0xdc8   : > { %6438 = vmatmul.mubr.msk.bf16.gmra.mrb[112].mxu0 %vm9811_vm3, %v7543_v39  ;;  %vm9826_vm3 = vmmov %vm9822_vm0 }
 0xdc9   : > { %6441 = vmatprep.mubr.msk.bf16.mxu0 %vm9812_vm4, %v7544_v23  ;;  %vm9827_vm4 = vmmov %vm9822_vm0 }
 0xdd0   : > { %6442 = vmatmul.mubr.msk.bf16.gmra.mrb[116].mxu0 %vm9813_vm5, %v7545_v12  ;;  %vm9828_vm5 = vmmov %vm9822_vm0 }
 0xdd1   : > { %6445 = vmatprep.mubr.msk.bf16.mxu0 %vm9814_vm6, %v7546_v27  ;;  %vm9829_vm6 = vmmov %vm9822_vm0 }
 0xdd8   : > { %6446 = vmatmul.mubr.msk.bf16.gmra.mrb[120].mxu0 %vm9815_vm7, %v7547_v32  ;;  %vm9830_vm7 = vmmov %vm9822_vm0 }
 0xdd9   : > { %6453 = vmatprep.mubr.msk.bf16.mxu0 %vm9816_vm8, %v8965_v14  ;;  %vm9831_vm8 = vmmov %vm9822_vm0 }
 0xde0   : > { %6454 = vmatmul.mubr.msk.bf16.vlgmr.msra.gmra.mrb[124].mxu0 %vm9817_vm9, %v8995_v7  ;;  %vm9832_vm9 = vmmov %vm9822_vm0 }
 0xde1   : > { %6457 = vmatprep.mubr.msk.bf16.mxu0 %vm9797_vm1, %v9019_v61  ;;  %6470 = vmatpush3.bf16.msra.mxu0 %v7542_v56  ;;  %vm9833_vm1 = vmmov %vm9822_vm0 }
 0xde2   : > { %6471 = vmatprep.subr.bf16.mxu0 %v7548_v3 }
 0xde5   : > { %6472 = vmatpush3.bf16.msra.mxu0 %v7548_v3 }
 0xde6   : > { %6489 = vmatprep.subr.bf16.mxu0 %v7549_v6 }
 0xde8   : > { %6458 = vmatmul.mubr.msk.bf16.gmra.mrb[128].mxu0 %vm9818_vm15, %v9040_v54  ;;  %vm9834_vm15 = vmmov %vm9822_vm0 }
 0xde9   : > { %6461 = vmatprep.mubr.msk.bf16.mxu0 %vm9819_vm12, %v9061_v34  ;;  %v7550_v34 = vld [vmem:[%s9527_s3 + $0xc0] ss:$12 sps:$4 sm:$0xff]   ;;  %vm9835_vm12 = vmmov %vm9822_vm0 }
 0xdf0   : > { %6462 = vmatmul.mubr.msk.bf16.gmra.mrb[132].mxu0 %vm9820_vm13, %v9082_v9  ;;  %vm9836_vm13 = vmmov %vm9822_vm0 }
 0xdf1   : > { %6465 = vmatprep.mubr.msk.bf16.mxu0 %vm9821_vm14, %v9103_v53  ;;  %v7551_v53 = vld [vmem:[%s9527_s3 + $0xe0] ss:$12 sps:$4 sm:$0xff]   ;;  %vm9837_vm14 = vmmov %vm9822_vm0 }
 0xdf8   : > { %6466 = vmatmul.mubr.msk.bf16.gmra.mrb[136].mxu0 %vm9822_vm0, %v9125_v58  ;;  %v7552_v58 = vld [vmem:[%s9527_s3 + $0xdc] ss:$12 sps:$4 sm:$0xff]  }
 0xe93   : > { %v6435_v14 = vpop.f32.mrb[108].mxu0 }
 0xe94   : > { %v3952_v7 = vpop.f32.mrb[109].mxu0 }
 0xe95   : > { %v6436_v61 = vpop.f32.mrb[110].mxu0 }
 0xe96   : > { %v4096_v46 = vpack.c.bf16 %v6436_v61, %v6435_v14  ;;  %v3955_v62 = vpop.f32.mrb[111].mxu0 }
 0xe97   : > { %v4095_v44 = vpack.c.bf16 %v3955_v62, %v3952_v7 }
 0xe99   : > { %5815 = vmatmul.mubr.msk.bf16.vlgmr.msra.gmra.mrb[152].mxu1 %vm9823_vm10, %v4095_v44  ;;  %6473 = vmatprep.mubr.msk.bf16.mxu0 %vm9824_vm11, %v4095_v44  ;;  %vm9838_vm10 = vmmov %vm9822_vm0 }
 0xe9a   : > { %6474 = vmatmul.mubr.msk.bf16.vlgmr.msra.gmra.mrb[124].mxu0 %vm9825_vm2, %v4096_v46  ;;  %4411 = vmatprep.mubr.bf16.mxu1 %v9690_v43  ;;  %vm9839_vm11 = vmmov %vm9822_vm0 }
 0xe9b   : > { %v6439_v54 = vpop.f32.mrb[112].mxu0  ;;  %4628 = vmatpush1.bf16.msra.mxu1 %v7550_v34  ;;  %6490 = vmatpush3.bf16.msra.mxu0 %v7549_v6  ;;  %vm9840_vm2 = vmmov %vm9822_vm0 }
 0xe9c   : > { %v3968_v9 = vpop.f32.mrb[113].mxu0  ;;  %6491 = vmatprep.subr.bf16.mxu0 %v7551_v53  ;;  %4629 = vmatprep.subr.bf16.mxu1 %v7552_v58 }
 0xe9d   : > { %v6440_v49 = vpop.f32.mrb[114].mxu0 }
 0xe9e   : > { %v4098_v15 = vpack.c.bf16 %v6440_v49, %v6439_v54  ;;  %v3971_v1 = vpop.f32.mrb[115].mxu0 }
 0xe9f   : > { %v4097_v4 = vpack.c.bf16 %v3971_v1, %v3968_v9  ;;  %6492 = vmatpush3.bf16.msra.mxu0 %v7551_v53  ;;  %4630 = vmatpush1.bf16.msra.mxu1 %v7553_v52 }
 0xea1   : > { %5816 = vmatmul.mubr.msk.bf16.gmra.mrb[156].mxu1 %vm9826_vm3, %v4096_v46  ;;  %6477 = vmatprep.mubr.msk.bf16.mxu0 %vm9827_vm4, %v4097_v4  ;;  %vm9841_vm3 = vmmov %vm9822_vm0 }
 0xea2   : > { %6478 = vmatmul.mubr.msk.bf16.gmra.mrb[128].mxu0 %vm9828_vm5, %v4098_v15  ;;  %4421 = vmatprep.mubr.bf16.mxu1 %v9690_v43  ;;  %vm9842_vm4 = vmmov %vm9822_vm0 }
 0xea3   : > { %v6443_v18 = vpop.f32.mrb[116].mxu0  ;;  %vm9843_vm5 = vmmov %vm9822_vm0 }
 0xea4   : > { %v3984_v60 = vpop.f32.mrb[117].mxu0 }
 0xea5   : > { %v6444_v35 = vpop.f32.mrb[118].mxu0 }
 0xea6   : > { %v4100_v22 = vpack.c.bf16 %v6444_v35, %v6443_v18  ;;  %v3987_v50 = vpop.f32.mrb[119].mxu0 }
 0xea7   : > { %v4099_v42 = vpack.c.bf16 %v3987_v50, %v3984_v60  ;;  %v9858_v60 = vld [vmem:[#allocation37_spill] sm:$0xff]  ;;  %v9859_v50 = vld [vmem:[#allocation38_spill] sm:$0xff] }
 0xea9   : > { %5817 = vmatmul.mubr.msk.bf16.gmra.mrb[160].mxu1 %vm9829_vm6, %v4097_v4  ;;  %6481 = vmatprep.mubr.msk.bf16.mxu0 %vm9830_vm7, %v4099_v42  ;;  %vm9844_vm6 = vmmov %vm9822_vm0 }
 0xeaa   : > { %6482 = vmatmul.mubr.msk.bf16.gmra.mrb[132].mxu0 %vm9831_vm8, %v4100_v22  ;;  %4431 = vmatprep.mubr.bf16.mxu1 %v9690_v43  ;;  %vm9846_vm7 = vmmov %vm9822_vm0 }
 0xeab   : > { %v6447_v30 = vpop.f32.mrb[120].mxu0  ;;  %vm9847_vm8 = vmmov %vm9822_vm0 }
 0xeac   : > { %v4000_v59 = vpop.f32.mrb[121].mxu0 }
 0xead   : > { %v6448_v31 = vpop.f32.mrb[122].mxu0 }
 0xeae   : > { %v4102_v48 = vpack.c.bf16 %v6448_v31, %v6447_v30  ;;  %v4003_v16 = vpop.f32.mrb[123].mxu0 }
 0xeaf   : > { %v4101_v26 = vpack.c.bf16 %v4003_v16, %v4000_v59 }
 0xeb1   : > { %5818 = vmatmul.mubr.msk.bf16.gmra.mrb[164].mxu1 %vm9832_vm9, %v4098_v15  ;;  %6485 = vmatprep.mubr.msk.bf16.mxu0 %vm9833_vm1, %v4101_v26  ;;  %vm9848_vm9 = vmmov %vm9822_vm0 }
 0xeb2   : > { %6486 = vmatmul.mubr.msk.bf16.gmra.mrb[136].mxu0 %vm9834_vm15, %v4102_v48  ;;  %4441 = vmatprep.mubr.bf16.mxu1 %v9690_v43  ;;  %vm9849_vm1 = vmmov %vm9822_vm0 }
 0xeb3   : > { %6493 = vmatprep.mubr.msk.bf16.mxu0 %vm9835_vm12, %v8557_v38  ;;  %vm9850_vm15 = vmmov %vm9822_vm0 }
 0xeb4   : > { %vm9851_vm12 = vmmov %vm9822_vm0 }
 0xeb9   : > { %5819 = vmatmul.mubr.msk.bf16.gmra.mrb[168].mxu1 %vm9836_vm13, %v4099_v42  ;;  %vm9852_vm13 = vmmov %vm9822_vm0 }
 0xeba   : > { %6494 = vmatmul.mubr.msk.bf16.vlgmr.msra.gmra.mrb[140].mxu0 %vm9837_vm14, %v8595_v33  ;;  %4451 = vmatprep.mubr.bf16.mxu1 %v9690_v43  ;;  %vm9853_vm14 = vmmov %vm9822_vm0 }
 0xebb   : > { %6497 = vmatprep.mubr.msk.bf16.mxu0 %vm9822_vm0, %v8624_v10 }
 0xec1   : > { %5820 = vmatmul.mubr.msk.bf16.gmra.mrb[172].mxu1 %vm9838_vm10, %v4100_v22  ;;  %vm9862_vm10 = vmmov %vm9822_vm0 }
 0xec2   : > { %6498 = vmatmul.mubr.msk.bf16.gmra.mrb[144].mxu0 %vm9839_vm11, %v8636_v11  ;;  %4461 = vmatprep.mubr.bf16.mxu1 %v9690_v43  ;;  %vm9863_vm11 = vmmov %vm9822_vm0 }
 0xec3   : > { %6501 = vmatprep.mubr.msk.bf16.mxu0 %vm9840_vm2, %v8659_v13  ;;  %vm9864_vm2 = vmmov %vm9822_vm0 }
 0xec9   : > { %5821 = vmatmul.mubr.msk.bf16.gmra.mrb[176].mxu1 %vm9841_vm3, %v4101_v26  ;;  %vm9865_vm3 = vmmov %vm9822_vm0 }
 0xeca   : > { %6502 = vmatmul.mubr.msk.bf16.gmra.mrb[148].mxu0 %vm9842_vm4, %v8678_v29  ;;  %4471 = vmatprep.mubr.bf16.mxu1 %v9690_v43  ;;  %vm9868_vm4 = vmmov %vm9822_vm0 }
 0xecb   : > { %6505 = vmatprep.mubr.msk.bf16.mxu0 %vm9843_vm5, %v8691_v8  ;;  %vm9873_vm5 = vmmov %vm9822_vm0 }
 0xed1   : > { %5822 = vmatmul.mubr.msk.bf16.gmra.mrb[180].mxu1 %vm9844_vm6, %v4102_v48  ;;  %vm9876_vm6 = vmmov %vm9822_vm0 }
 0xed2   : > { %6506 = vmatmul.mubr.msk.bf16.gmra.mrb[152].mxu0 %vm9846_vm7, %v9845_v47  ;;  %4659 = vmatprep.mubr.bf16.mxu1 %v9690_v43  ;;  %vm9878_vm7 = vmmov %vm9822_vm0 }
 0xed9   : > { %5831 = vmatmul.mubr.msk.bf16.vlgmr.msra.gmra.mrb[152].mxu1 %vm9847_vm8, %v8557_v38  ;;  %v7017_v38 = vld [vmem:[%s9528_s4 + $0x40] sm:$0xff]   ;;  %vm7564_vm8 = vmmov 0  }
 0xeda   : > { %4669 = vmatprep.mubr.bf16.mxu1 %v9690_v43  ;;  %6509 = vmatprep.subr.bf16.mxu0 %v7017_v38 }
 0xedb   : > { %6510 = vmatpush3.bf16.msra.mxu0 %v7017_v38 }
 0xee1   : > { %5832 = vmatmul.mubr.msk.bf16.gmra.mrb[156].mxu1 %vm9848_vm9, %v8595_v33 }
 0xee2   : > { %4679 = vmatprep.mubr.bf16.mxu1 %v9690_v43 }
 0xee9   : > { %5833 = vmatmul.mubr.msk.bf16.gmra.mrb[160].mxu1 %vm9849_vm1, %v8624_v10 }
 0xeea   : > { %4689 = vmatprep.mubr.bf16.mxu1 %v9690_v43 }
 0xef1   : > { %5834 = vmatmul.mubr.msk.bf16.gmra.mrb[164].mxu1 %vm9850_vm15, %v8636_v11  ;;  %v7018_v11 = vld [vmem:[%s9528_s4 + $0x48] sm:$0xff]  }
 0xef2   : > { %4699 = vmatprep.mubr.bf16.mxu1 %v9690_v43  ;;  %6511 = vmatprep.subr.bf16.mxu0 %v7018_v11 }
 0xef3   : > { %6512 = vmatpush3.bf16.msra.mxu0 %v7018_v11 }
 0xef9   : > { %5835 = vmatmul.mubr.msk.bf16.gmra.mrb[168].mxu1 %vm9851_vm12, %v8659_v13 }
 0xefa   : > { %4709 = vmatprep.mubr.bf16.mxu1 %v9690_v43 }
 0xf01   : > { %5836 = vmatmul.mubr.msk.bf16.gmra.mrb[172].mxu1 %vm9852_vm13, %v8678_v29 }
 0xf02   : > { %4719 = vmatprep.mubr.bf16.mxu1 %v9690_v43 }
 0xf09   : > { %5837 = vmatmul.mubr.msk.bf16.gmra.mrb[176].mxu1 %vm9853_vm14, %v8691_v8 }
 0xf0a   : > { %4729 = vmatprep.mubr.bf16.mxu1 %v9690_v43 }
 0xf11   : > { %5838 = vmatmul.mubr.msk.bf16.gmra.mrb[180].mxu1 %vm9822_vm0, %v9845_v47 }
 0xf6d   : > { %v9261_v33 = vpop.f32.mrb[124].mxu0 }
 0xf6e   : > { %v9263_v10 = vpop.f32.mrb[125].mxu0 }
 0xf6f   : > { %v9268_v13 = vpop.f32.mrb[126].mxu0 }
 0xf70   : > { %v9270_v43 = vpop.f32.mrb[127].mxu0 }
 0xf75   : > { %v9272_v29 = vpop.f32.mrb[128].mxu0 }
 0xf76   : > { %v9274_v8 = vpop.f32.mrb[129].mxu0 }
 0xf77   : > { %v9276_v41 = vpop.f32.mrb[130].mxu0 }
 0xf78   : > { %v9278_v19 = vpop.f32.mrb[131].mxu0 }
 0xf7d   : > { %v9280_v56 = vpop.f32.mrb[132].mxu0 }
 0xf7e   : > { %v9282_v39 = vpop.f32.mrb[133].mxu0 }
 0xf7f   : > { %v9284_v23 = vpop.f32.mrb[134].mxu0 }
 0xf80   : > { %v9286_v12 = vpop.f32.mrb[135].mxu0 }
 0xf85   : > { %v9288_v27 = vpop.f32.mrb[136].mxu0 }
 0xf86   : > { %9854 = vst [vmem:[#allocation17_spill] sm:$0xff] %v9288_v27  ;;  %v9290_v32 = vpop.f32.mrb[137].mxu0 }
 0xf87   : > { %v9292_v3 = vpop.f32.mrb[138].mxu0 }
 0xf88   : > { %9855 = vst [vmem:[#allocation5_spill] sm:$0xff] %v9292_v3  ;;  %v9294_v6 = vpop.f32.mrb[139].mxu0 }
 0xf8d   : > { %v9296_v14 = vpop.f32.mrb[140].mxu0 }
 0xf8e   : > { %v9298_v7 = vpop.f32.mrb[141].mxu0 }
 0xf8f   : > { %v9300_v61 = vpop.f32.mrb[142].mxu0 }
 0xf90   : > { %v9302_v46 = vpop.f32.mrb[143].mxu0 }
 0xf95   : > { %v9304_v62 = vpop.f32.mrb[144].mxu0 }
 0xf96   : > { %v9306_v44 = vpop.f32.mrb[145].mxu0 }
 0xf97   : > { %v9308_v54 = vpop.f32.mrb[146].mxu0 }
 0xf98   : > { %v9310_v34 = vpop.f32.mrb[147].mxu0 }
 0xf9d   : > { %v9312_v9 = vpop.f32.mrb[148].mxu0 }
 0xf9e   : > { %v9314_v53 = vpop.f32.mrb[149].mxu0 }
 0xf9f   : > { %v9316_v58 = vpop.f32.mrb[150].mxu0 }
 0xfa0   : > { %v9318_v49 = vpop.f32.mrb[151].mxu0 }
 0xfa5   : > { %v9320_v15 = vpop.f32.mrb[152].mxu0 }
 0xfa6   : > { %9856 = vst [vmem:[#allocation6_spill] sm:$0xff] %v9320_v15  ;;  %v9322_v1 = vpop.f32.mrb[153].mxu0 }
 0xfa7   : > { %v9324_v4 = vpop.f32.mrb[154].mxu0 }
 0xfa8   : > { %9857 = vst [vmem:[#allocation7_spill] sm:$0xff] %v9324_v4  ;;  %v9326_v52 = vpop.f32.mrb[155].mxu0 }
 0xfac   : > { %v4661_v18 = vpop.f32.mrb[152].mxu1 }
 0xfad   : > { %v6694_v35 = vadd.f32 %v9858_v60, %v4661_v18  ;;  %v4663_v22 = vpop.f32.mrb[153].mxu1 }
 0xfae   : > { %v6696_v42 = vadd.f32 %v9859_v50, %v4663_v22  ;;  %v4665_v30 = vpop.f32.mrb[154].mxu1 }
 0xfaf   : > { %v5847_v59 = vmul.f32 -1.442695, %v6694_v35  ;;  %v6698_v31 = vadd.f32 %v9858_v60, %v4665_v30  ;;  %v4667_v48 = vpop.f32.mrb[155].mxu1 }
 0xfb0   : > { %v5863_v16 = vmul.f32 -1.442695, %v6696_v42  ;;  %v6700_v26 = vadd.f32 %v9859_v50, %v4667_v48 }
 0xfb1   : > { %7341 = vpow2.f32 %v5847_v59  ;;  %v5848_v47 = vmul.f32 -1.442695, %v6698_v31 }
 0xfb2   : > { %7343 = vpow2.f32 %v5863_v16  ;;  %v5864_v38 = vmul.f32 -1.442695, %v6700_v26 }
 0xfb3   : > { %7345 = vpow2.f32 %v5848_v47 }
 0xfb4   : > { %v4671_v11 = vpop.f32.mrb[156].mxu1  ;;  %7347 = vpow2.f32 %v5864_v38 }
 0xfb5   : > { %v6702_v21 = vadd.f32 %v9858_v60, %v4671_v11  ;;  %v4673_v18 = vpop.f32.mrb[157].mxu1 }
 0xfb6   : > { %v6704_v45 = vadd.f32 %v9859_v50, %v4673_v18  ;;  %v4675_v22 = vpop.f32.mrb[158].mxu1 }
 0xfb7   : > { %v5849_v37 = vmul.f32 -1.442695, %v6702_v21  ;;  %v6706_v35 = vadd.f32 %v9858_v60, %v4675_v22  ;;  %v4677_v30 = vpop.f32.mrb[159].mxu1 }
 0xfb8   : > { %v6708_v42 = vadd.f32 %v9859_v50, %v4677_v30  ;;  %v5865_v59 = vmul.f32 -1.442695, %v6704_v45 }
 0xfb9   : > { %7349 = vpow2.f32 %v5849_v37  ;;  %v5850_v31 = vmul.f32 -1.442695, %v6706_v35 }
 0xfba   : > { %v5866_v16 = vmul.f32 -1.442695, %v6708_v42 }
 0xfbb   : > { %v7342_v48 = vpop.eup %7341  ;;  %7351 = vpow2.f32 %v5850_v31 }
 0xfbc   : > { %v7344_v26 = vpop.eup %7343  ;;  %v4901_v47 = vadd.f32 1.0, %v7342_v48  ;;  %v4681_v11 = vpop.f32.mrb[160].mxu1  ;;  %7353 = vpow2.f32 %v5865_v59 }
 0xfbd   : > { %v7346_v51 = vpop.eup %7345  ;;  %v6710_v18 = vadd.f32 %v9858_v60, %v4681_v11  ;;  %v4683_v21 = vpop.f32.mrb[161].mxu1  ;;  %v5013_v30 = vadd.f32 1.0, %v7344_v26 }
 0xfbe   : > { %7355 = vrcp.f32 %v4901_v47  ;;  %v4902_v22 = vadd.f32 1.0, %v7346_v51  ;;  %v6712_v38 = vadd.f32 %v9859_v50, %v4683_v21  ;;  %v4685_v3 = vpop.f32.mrb[162].mxu1  ;;  %v7348_v59 = vpop.eup %7347 }
 0xfbf   : > { %7357 = vpow2.f32 %v5866_v16  ;;  %v5851_v37 = vmul.f32 -1.442695, %v6710_v18  ;;  %v6714_v45 = vadd.f32 %v9858_v60, %v4685_v3  ;;  %v4687_v35 = vpop.f32.mrb[163].mxu1  ;;  %v5014_v26 = vadd.f32 1.0, %v7348_v59  ;;  %v9861_v59 = vld [vmem:[#allocation40_spill] sm:$0xff] }
 0xfc0   : > { %7359 = vrcp.f32 %v4902_v22  ;;  %v6716_v42 = vadd.f32 %v9859_v50, %v4687_v35  ;;  %v5867_v31 = vmul.f32 -1.442695, %v6712_v38  ;;  %v9860_v35 = vld [vmem:[#allocation39_spill] sm:$0xff] }
 0xfc1   : > { %v5852_v48 = vmul.f32 -1.442695, %v6714_v45  ;;  %7361 = vpow2.f32 %v5851_v37  ;;  %v4775_v37 = vadd.f32 %v9298_v7, %v9860_v35  ;;  %v4584_v7 = vadd.f32 %v9270_v43, %v9861_v59 }
 0xfc2   : > { %7363 = vrcp.f32 %v5013_v30  ;;  %v5868_v47 = vmul.f32 -1.442695, %v6716_v42 }
 0xfc3   : > { %v7350_v11 = vpop.eup %7349  ;;  %7365 = vpow2.f32 %v5852_v48 }
 0xfc4   : > { %v4903_v51 = vadd.f32 1.0, %v7350_v11  ;;  %v4691_v21 = vpop.f32.mrb[164].mxu1  ;;  %7367 = vpow2.f32 %v5867_v31  ;;  %v4581_v31 = vadd.f32 %v9263_v10, %v9861_v59 }
 0xfc5   : > { %v7352_v2 = vpop.eup %7351  ;;  %v6718_v16 = vadd.f32 %v9858_v60, %v4691_v21  ;;  %v4693_v3 = vpop.f32.mrb[165].mxu1 }
 0xfc6   : > { %7369 = vrcp.f32 %v4903_v51  ;;  %v4904_v18 = vadd.f32 1.0, %v7352_v2  ;;  %v6720_v22 = vadd.f32 %v9859_v50, %v4693_v3  ;;  %v4695_v38 = vpop.f32.mrb[166].mxu1  ;;  %v7354_v45 = vpop.eup %7353  ;;  %v4778_v2 = vadd.f32 %v9302_v46, %v9860_v35 }
 0xfc7   : > { %7371 = vpow2.f32 %v5868_v47  ;;  %v5853_v30 = vmul.f32 -1.442695, %v6718_v16  ;;  %v6722_v42 = vadd.f32 %v9858_v60, %v4695_v38  ;;  %v4697_v48 = vpop.f32.mrb[167].mxu1  ;;  %v5015_v47 = vadd.f32 1.0, %v7354_v45 }
 0xfc8   : > { %v7356_v11 = vpop.eup %7355  ;;  %7373 = vrcp.f32 %v4904_v18  ;;  %v5869_v21 = vmul.f32 -1.442695, %v6720_v22  ;;  %v6724_v10 = vadd.f32 %v9859_v50, %v4697_v48 }
 0xfc9   : > { %v7358_v51 = vpop.eup %7357  ;;  %v5061_v3 = vmul.f32 %v7356_v11, %v4775_v37  ;;  %7375 = vrcp.f32 %v5014_v26  ;;  %v5854_v4 = vmul.f32 -1.442695, %v6722_v42 }
 0xfca   : > { %v7360_v0 = vpop.eup %7359  ;;  %7377 = vpow2.f32 %v5853_v30  ;;  %v5016_v22 = vadd.f32 1.0, %v7358_v51  ;;  %v5870_v11 = vmul.f32 -1.442695, %v6724_v10 }
 0xfcb   : > { %v5077_v16 = vadd.f32 %v5061_v3, %v4581_v31  ;;  %v5062_v38 = vmul.f32 %v7360_v0, %v4778_v2  ;;  %7379 = vpow2.f32 %v5869_v21  ;;  %v7362_v18 = vpop.eup %7361  ;;  %v4783_v0 = vadd.f32 %v9296_v14, %v9860_v35 }
 0xfcc   : > { %7381 = vpow2.f32 %v5854_v4  ;;  %v4701_v27 = vpop.f32.mrb[168].mxu1  ;;  %v9352_v15 = vpop.eup %7363  ;;  %v4905_v26 = vadd.f32 1.0, %v7362_v18  ;;  %v4587_v21 = vadd.f32 %v9261_v33, %v9861_v59  ;;  %v4786_v3 = vadd.f32 %v9300_v61, %v9860_v35 }
 0xfcd   : > { %7383 = vtanh.f32 %v5077_v16  ;;  %v5078_v46 = vadd.f32 %v5062_v38, %v4584_v7  ;;  %v6726_v37 = vadd.f32 %v9858_v60, %v4701_v27  ;;  %v4703_v42 = vpop.f32.mrb[169].mxu1  ;;  %v7366_v43 = vpop.eup %7365  ;;  %v4590_v27 = vadd.f32 %v9268_v13, %v9861_v59 }
 0xfce   : > { %7385 = vrcp.f32 %v5015_v47  ;;  %v4705_v45 = vpop.f32.mrb[170].mxu1  ;;  %v7368_v30 = vpop.eup %7367  ;;  %v4906_v48 = vadd.f32 1.0, %v7366_v43  ;;  %v9365_v47 = vadd.f32 %v9272_v29, %v9861_v59  ;;  %v4593_v16 = vadd.f32 %v9274_v8, %v9861_v59 }
 0xfcf   : > { %7387 = vtanh.f32 %v5078_v46  ;;  %v4707_v4 = vpop.f32.mrb[171].mxu1  ;;  %v5855_v51 = vmul.f32 -1.442695, %v6726_v37  ;;  %v5017_v33 = vadd.f32 1.0, %v7368_v30  ;;  %v6728_v13 = vadd.f32 %v9859_v50, %v4703_v42 }
 0xfd0   : > { %v7370_v31 = vpop.eup %7369  ;;  %7389 = vrcp.f32 %v4905_v26  ;;  %v9372_v61 = vadd.f32 %v9278_v19, %v9861_v59  ;;  %v4791_v29 = vadd.f32 %v9306_v44, %v9860_v35  ;;  %v5109_v19 = vsub.f32 1.0, %v9352_v15 }
 0xfd1   : > { %v7372_v2 = vpop.eup %7371  ;;  %v5063_v7 = vmul.f32 %v7370_v31, %v4783_v0  ;;  %7391 = vrcp.f32 %v5016_v22  ;;  %v6730_v22 = vadd.f32 %v9858_v60, %v4705_v45  ;;  %v5141_v44 = vmul.f32 %v9352_v15, %v8528_v55 }
 0xfd2   : > { %v7374_v14 = vpop.eup %7373  ;;  %7393 = vrcp.f32 %v4906_v48  ;;  %v5018_v43 = vadd.f32 1.0, %v7372_v2 }
 0xfd3   : > { %v7376_v38 = vpop.eup %7375  ;;  %v5079_v10 = vadd.f32 %v5063_v7, %v4587_v21  ;;  %v5064_v18 = vmul.f32 %v7374_v14, %v4786_v3  ;;  %7395 = vpow2.f32 %v5870_v11  ;;  %v5871_v21 = vmul.f32 -1.442695, %v6728_v13 }
 0xfd4   : > { %v7378_v46 = vpop.eup %7377  ;;  %7397 = vpow2.f32 %v5855_v51  ;;  %v4711_v8 = vpop.f32.mrb[172].mxu1  ;;  %v5110_v3 = vsub.f32 1.0, %v7376_v38  ;;  %v5856_v2 = vmul.f32 -1.442695, %v6730_v22  ;;  %v6732_v7 = vadd.f32 %v9859_v50, %v4707_v4 }
 0xfd5   : > { %v7380_v26 = vpop.eup %7379  ;;  %7399 = vtanh.f32 %v5079_v10  ;;  %v5080_v37 = vadd.f32 %v5064_v18, %v4590_v27  ;;  %v4907_v30 = vadd.f32 1.0, %v7378_v46  ;;  %v4713_v0 = vpop.f32.mrb[173].mxu1  ;;  %v6734_v42 = vadd.f32 %v9858_v60, %v4711_v8 }
 0xfd6   : > { %v7382_v48 = vpop.eup %7381  ;;  %7401 = vrcp.f32 %v5017_v33  ;;  %v4715_v11 = vpop.f32.mrb[174].mxu1  ;;  %v4794_v10 = vadd.f32 %v9310_v34, %v9860_v35  ;;  %v5019_v18 = vadd.f32 1.0, %v7380_v26  ;;  %v5142_v55 = vmul.f32 %v7376_v38, %v8548_v20 }
 0xfd7   : > { %v7384_v31 = vpop.eup %7383  ;;  %7403 = vtanh.f32 %v5080_v37  ;;  %v4908_v45 = vadd.f32 1.0, %v7382_v48  ;;  %v4717_v51 = vpop.f32.mrb[175].mxu1  ;;  %v5857_v46 = vmul.f32 -1.442695, %v6734_v42  ;;  %v6736_v4 = vadd.f32 %v9859_v50, %v4713_v0 }
 0xfd8   : > { %v7386_v27 = vpop.eup %7385  ;;  %7405 = vrcp.f32 %v4907_v30  ;;  %v5125_v14 = vmul.f32 %v7384_v31, %v5109_v19  ;;  %v5872_v19 = vmul.f32 -1.442695, %v6732_v7  ;;  %v6738_v34 = vadd.f32 %v9858_v60, %v4715_v11 }
 0xfd9   : > { %v7388_v33 = vpop.eup %7387  ;;  %7407 = vrcp.f32 %v5018_v43  ;;  %v5111_v48 = vsub.f32 1.0, %v7386_v27  ;;  %v5143_v20 = vmul.f32 %v7386_v27, %v8552_v25 }
 0xfda   : > { %v7390_v15 = vpop.eup %7389  ;;  %7409 = vrcp.f32 %v4908_v45  ;;  %v5126_v13 = vmul.f32 %v7388_v33, %v5110_v3  ;;  %v5157_v8 = vadd.f32 %v5141_v44, %v5125_v14  ;;  %v5873_v14 = vmul.f32 -1.442695, %v6736_v4 }
 0xfdb   : > { %v7392_v37 = vpop.eup %7391  ;;  %v5065_v30 = vmul.f32 %v7390_v15, %v4791_v29  ;;  %7411 = vpow2.f32 %v5871_v21  ;;  %v5858_v27 = vmul.f32 -1.442695, %v6738_v34  ;;  %v4802_v4 = vadd.f32 %v9308_v54, %v9860_v35 }
 0xfdc   : > { %v7394_v22 = vpop.eup %7393  ;;  %7413 = vpow2.f32 %v5856_v2  ;;  %v4721_v43 = vpop.f32.mrb[176].mxu1  ;;  %v5158_v26 = vadd.f32 %v5142_v55, %v5126_v13  ;;  %v5112_v3 = vsub.f32 1.0, %v7392_v37  ;;  %v4799_v55 = vadd.f32 %v9304_v62, %v9860_v35 }
 0xfdd   : > { %v7396_v31 = vpop.eup %7395  ;;  %v5081_v38 = vadd.f32 %v5065_v30, %v4593_v16  ;;  %v5066_v42 = vmul.f32 %v7394_v22, %v4794_v10  ;;  %7415 = vrcp.f32 %v5019_v18  ;;  %v4723_v44 = vpop.f32.mrb[177].mxu1  ;;  %v6742_v29 = vadd.f32 %v9858_v60, %v4721_v43 }
 0xfde   : > { %v7398_v45 = vpop.eup %7397  ;;  %7417 = vpow2.f32 %v5857_v46  ;;  %v4725_v0 = vpop.f32.mrb[178].mxu1  ;;  %v5173_v21 = vpack.c.bf16 %v5158_v26, %v5157_v8  ;;  %v6740_v10 = vadd.f32 %v9859_v50, %v4717_v51  ;;  %v5144_v15 = vmul.f32 %v7392_v37, %v8578_v5 }
 0xfdf   : > { %v7400_v2 = vpop.eup %7399  ;;  %7419 = vtanh.f32 %v5081_v38  ;;  %v5082_v11 = vadd.f32 %v5066_v42, %v9372_v61  ;;  %v4909_v7 = vadd.f32 1.0, %v7398_v45  ;;  %v9390_v33 = vpop.f32.mrb[179].mxu1  ;;  %v5020_v61 = vadd.f32 1.0, %v7396_v31 }
 0xfe0   : > { %v7402_v25 = vpop.eup %7401  ;;  %v5127_v16 = vmul.f32 %v7400_v2, %v5111_v48  ;;  %7421 = vpow2.f32 %v5872_v19  ;;  %6513 = vmatprep.mubr.msk.bf16.mxu0 %vm9862_vm10, %v5173_v21  ;;  %v5859_v30 = vmul.f32 -1.442695, %v6742_v29  ;;  %v6744_v22 = vadd.f32 %v9859_v50, %v4723_v44  ;;  %vm9883_vm10 = vmmov %vm9864_vm2 }
 0xfe1   : > { %v7404_v18 = vpop.eup %7403  ;;  %7423 = vtanh.f32 %v5082_v11  ;;  %v5874_v62 = vmul.f32 -1.442695, %v6740_v10  ;;  %v4602_v43 = vadd.f32 %v9276_v41, %v9861_v59  ;;  %v6746_v54 = vadd.f32 %v9858_v60, %v4725_v0 }
 0xfe2   : > { %v7406_v46 = vpop.eup %7405  ;;  %v5159_v13 = vadd.f32 %v5143_v20, %v5127_v16  ;;  %v5128_v8 = vmul.f32 %v7404_v18, %v5112_v3  ;;  %7425 = vrcp.f32 %v4909_v7  ;;  %v5875_v21 = vmul.f32 -1.442695, %v6744_v22 }
 0xfe3   : > { %v7408_v48 = vpop.eup %7407  ;;  %v5067_v51 = vmul.f32 %v7406_v46, %v4799_v55  ;;  %7427 = vpow2.f32 %v5873_v14  ;;  %v5145_v16 = vmul.f32 %v7402_v25, %v8606_v40  ;;  %v5860_v10 = vmul.f32 -1.442695, %v6746_v54 }
 0xfe4   : > { %v7410_v19 = vpop.eup %7409  ;;  %v5160_v34 = vadd.f32 %v5144_v15, %v5128_v8  ;;  %7429 = vpow2.f32 %v5858_v27  ;;  %v4731_v5 = vpop.f32.mrb[180].mxu1  ;;  %v5114_v18 = vsub.f32 1.0, %v7408_v48  ;;  %v5146_v46 = vmul.f32 %v7408_v48, %v8615_v24 }
 0xfe5   : > { %v7412_v37 = vpop.eup %7411  ;;  %v5083_v26 = vadd.f32 %v5067_v51, %v9365_v47  ;;  %v5068_v31 = vmul.f32 %v7410_v19, %v4802_v4  ;;  %7431 = vrcp.f32 %v5020_v61  ;;  %v4733_v20 = vpop.f32.mrb[181].mxu1  ;;  %v6750_v41 = vadd.f32 %v9858_v60, %v4731_v5 }
 0xfe6   : > { %v7414_v38 = vpop.eup %7413  ;;  %7433 = vpow2.f32 %v5859_v30  ;;  %v4735_v42 = vpop.f32.mrb[182].mxu1  ;;  %v5174_v44 = vpack.c.bf16 %v5160_v34, %v5159_v13  ;;  %v5113_v47 = vsub.f32 1.0, %v7402_v25  ;;  %v5021_v14 = vadd.f32 1.0, %v7412_v37 }
 0xfe7   : > { %v7416_v45 = vpop.eup %7415  ;;  %7435 = vtanh.f32 %v5083_v26  ;;  %v5084_v3 = vadd.f32 %v5068_v31, %v4602_v43  ;;  %v4910_v29 = vadd.f32 1.0, %v7414_v38  ;;  %v9404_v2 = vpop.f32.mrb[183].mxu1  ;;  %v4807_v61 = vadd.f32 %v9314_v53, %v9860_v35 }
 0xfe8   : > { %v7418_v11 = vpop.eup %7417  ;;  %7437 = vpow2.f32 %v5874_v62  ;;  %6514 = vmatmul.mubr.msk.bf16.vlgmr.msra.gmra.mrb[156].mxu0 %vm9863_vm11, %v5174_v44  ;;  %v5861_v8 = vmul.f32 -1.442695, %v6750_v41  ;;  %v4605_v40 = vadd.f32 %v9282_v39, %v9861_v59  ;;  %v6748_v22 = vadd.f32 %v9859_v50, %v9390_v33  ;;  %vm9885_vm11 = vmmov %vm9864_vm2 }
 0xfe9   : > { %v7420_v7 = vpop.eup %7419  ;;  %7439 = vtanh.f32 %v5084_v3  ;;  %v4911_v0 = vadd.f32 1.0, %v7418_v11  ;;  %v6752_v53 = vadd.f32 %v9859_v50, %v4733_v20  ;;  %v6754_v37 = vadd.f32 %v9858_v60, %v4735_v42 }
 0xfea   : > { %v7422_v27 = vpop.eup %7421  ;;  %7441 = vrcp.f32 %v4910_v29  ;;  %v5129_v55 = vmul.f32 %v7420_v7, %v5113_v47  ;;  %v5115_v39 = vsub.f32 1.0, %v7416_v45  ;;  %v5876_v33 = vmul.f32 -1.442695, %v6748_v22 }
 0xfeb   : > { %v7424_v15 = vpop.eup %7423  ;;  %7443 = vpow2.f32 %v5875_v21  ;;  %v5022_v62 = vadd.f32 1.0, %v7422_v27  ;;  %v5147_v29 = vmul.f32 %v7416_v45, %v8617_v28  ;;  %v4810_v60 = vadd.f32 %v9318_v49, %v9860_v35 }
 0xfec   : > { %v7426_v13 = vpop.eup %7425  ;;  %7445 = vrcp.f32 %v4911_v0  ;;  %v5130_v30 = vmul.f32 %v7424_v15, %v5114_v18  ;;  %v5161_v4 = vadd.f32 %v5145_v16, %v5129_v55  ;;  %v5877_v42 = vmul.f32 -1.442695, %v6752_v53 }
 0xfed   : > { %v7428_v51 = vpop.eup %7427  ;;  %v5069_v25 = vmul.f32 %v7426_v13, %v4807_v61  ;;  %7447 = vrcp.f32 %v5021_v14  ;;  %v5862_v11 = vmul.f32 -1.442695, %v6754_v37  ;;  %v4608_v16 = vadd.f32 %v9286_v12, %v9861_v59 }
 0xfee   : > { %v7430_v19 = vpop.eup %7429  ;;  %7449 = vpow2.f32 %v5860_v10  ;;  %v5162_v34 = vadd.f32 %v5146_v46, %v5130_v30  ;;  %v5023_v38 = vadd.f32 1.0, %v7428_v51  ;;  %v4815_v28 = vadd.f32 %v9312_v9, %v9860_v35 }
 0xfef   : > { %v7432_v24 = vpop.eup %7431  ;;  %v5085_v48 = vadd.f32 %v5069_v25, %v4605_v40  ;;  %v4912_v5 = vadd.f32 1.0, %v7430_v19  ;;  %7451 = vpow2.f32 %v5861_v8  ;;  %v4611_v49 = vadd.f32 %v9280_v56, %v9861_v59 }
 0xff0   : > { %v7434_v43 = vpop.eup %7433  ;;  %v5175_v26 = vpack.c.bf16 %v5162_v34, %v5161_v4  ;;  %v5116_v20 = vsub.f32 1.0, %v7432_v24  ;;  %v5148_v7 = vmul.f32 %v7432_v24, %v8626_v57  ;;  %v6756_v61 = vadd.f32 %v9859_v50, %v9404_v2 }
 0xff1   : > { %v7436_v31 = vpop.eup %7435  ;;  %7453 = vtanh.f32 %v5085_v48  ;;  %v4913_v54 = vadd.f32 1.0, %v7434_v43  ;;  %v4818_v51 = vadd.f32 %v9316_v58, %v9860_v35  ;;  %v4614_v53 = vadd.f32 %v9284_v23, %v9861_v59 }
 0xff2   : > { %v7438_v44 = vpop.eup %7437  ;;  %7455 = vrcp.f32 %v4912_v5  ;;  %6517 = vmatprep.mubr.msk.bf16.mxu0 %vm9864_vm2, %v5175_v26  ;;  %v5131_v3 = vmul.f32 %v7436_v31, %v5115_v39  ;;  %v5878_v25 = vmul.f32 -1.442695, %v6756_v61  ;;  %v4823_v34 = vadd.f32 %v9322_v1, %v9860_v35  ;;  %v9869_v61 = vld [vmem:[#allocation41_spill] sm:$0xff] }
 0xff3   : > { %v7440_v21 = vpop.eup %7439  ;;  %7457 = vrcp.f32 %v5022_v62  ;;  %v5024_v10 = vadd.f32 1.0, %v7438_v44  ;;  %v4617_v5 = vadd.f32 %v9290_v32, %v9861_v59  ;;  %v4826_v32 = vadd.f32 %v9326_v52, %v9860_v35 }
 0xff4   : > { %v7442_v41 = vpop.eup %7441  ;;  %7459 = vrcp.f32 %v4913_v54  ;;  %v5132_v47 = vmul.f32 %v7440_v21, %v5116_v20  ;;  %v5163_v14 = vadd.f32 %v5147_v29, %v5131_v3 }
 0xff5   : > { %v7444_v0 = vpop.eup %7443  ;;  %v5070_v45 = vmul.f32 %v7442_v41, %v4810_v60  ;;  %7461 = vrcp.f32 %v5023_v38 }
 0xff6   : > { %v7446_v27 = vpop.eup %7445  ;;  %7463 = vpow2.f32 %v5876_v33  ;;  %v5164_v18 = vadd.f32 %v5148_v7, %v5132_v47  ;;  %v5025_v13 = vadd.f32 1.0, %v7444_v0  ;;  %v4620_v7 = vadd.f32 %v9294_v6, %v9861_v59 }
 0xff7   : > { %v7448_v55 = vpop.eup %7447  ;;  %v5086_v15 = vadd.f32 %v5070_v45, %v4608_v16  ;;  %v5071_v57 = vmul.f32 %v7446_v27, %v4815_v28  ;;  %7465 = vpow2.f32 %v5862_v11  ;;  %v9867_v27 = vld [vmem:[#allocation17_spill] sm:$0xff] }
 0xff8   : > { %v7450_v12 = vpop.eup %7449  ;;  %7467 = vpow2.f32 %v5877_v42  ;;  %v5176_v46 = vpack.c.bf16 %v5164_v18, %v5163_v14  ;;  %v5117_v56 = vsub.f32 1.0, %v7448_v55  ;;  %v5149_v22 = vmul.f32 %v7448_v55, %v8650_v17  ;;  %v9866_v14 = vld [vmem:[#allocation6_spill] sm:$0xff] }
 0xff9   : > { %7469 = vtanh.f32 %v5086_v15  ;;  %v5087_v9 = vadd.f32 %v5071_v57, %v4611_v49  ;;  %v4914_v8 = vadd.f32 1.0, %v7450_v12  ;;  %v7452_v30 = vpop.eup %7451  ;;  %v4831_v0 = vadd.f32 %v9866_v14, %v9860_v35 }
 0xffa   : > { %7471 = vrcp.f32 %v5024_v10  ;;  %6518 = vmatmul.mubr.msk.bf16.gmra.mrb[160].mxu0 %vm9865_vm3, %v5176_v46  ;;  %v4915_v40 = vadd.f32 1.0, %v7452_v30  ;;  %v4623_v49 = vadd.f32 %v9867_v27, %v9861_v59 }
 0xffb   : > { %v7454_v4 = vpop.eup %7453  ;;  %7473 = vtanh.f32 %v5087_v9 }
 0xffc   : > { %v7456_v50 = vpop.eup %7455  ;;  %7475 = vrcp.f32 %v4914_v8  ;;  %v5133_v2 = vmul.f32 %v7454_v4, %v5117_v56  ;;  %v9871_v4 = vld [vmem:[#allocation42_spill] sm:$0xff] }
 0xffd   : > { %v7458_v19 = vpop.eup %7457  ;;  %v5072_v24 = vmul.f32 %v7456_v50, %v4818_v51  ;;  %7477 = vrcp.f32 %v5025_v13  ;;  %v9870_v13 = vld [vmem:[#allocation7_spill] sm:$0xff] }
 0xffe   : > { %v7460_v48 = vpop.eup %7459  ;;  %7479 = vrcp.f32 %v4915_v40  ;;  %v5165_v58 = vadd.f32 %v5149_v22, %v5133_v2  ;;  %v5118_v38 = vsub.f32 1.0, %v7458_v19  ;;  %v5150_v20 = vmul.f32 %v7458_v19, %v8653_v36 }
 0xfff   : > { %v7462_v62 = vpop.eup %7461  ;;  %v5088_v37 = vadd.f32 %v5072_v24, %v4614_v53  ;;  %v5073_v43 = vmul.f32 %v7460_v48, %v4823_v34  ;;  %7481 = vpow2.f32 %v5878_v25  ;;  %v4834_v8 = vadd.f32 %v9870_v13, %v9860_v35  ;;  %v9872_v25 = vld [vmem:[#allocation5_spill] sm:$0xff] }
0x1000   : > { %v7464_v17 = vpop.eup %7463  ;;  %v5119_v3 = vsub.f32 1.0, %v7462_v62  ;;  %v5151_v41 = vmul.f32 %v7462_v62, %v8661_v63  ;;  %v4626_v50 = vadd.f32 %v9872_v25, %v9861_v59  ;;  %v9874_v62 = vld [vmem:[#allocation43_spill] sm:$0xff]  ;;  %v9875_v59 = vld [vmem:[#allocation44_spill] sm:$0xff] }
0x1001   : > { %v7466_v26 = vpop.eup %7465  ;;  %7483 = vtanh.f32 %v5088_v37  ;;  %v5089_v39 = vadd.f32 %v5073_v43, %v4617_v5  ;;  %v5026_v54 = vadd.f32 1.0, %v7464_v17 }
0x1002   : > { %v7468_v23 = vpop.eup %7467  ;;  %v4916_v31 = vadd.f32 1.0, %v7466_v26 }
0x1003   : > { %v7470_v1 = vpop.eup %7469  ;;  %7485 = vtanh.f32 %v5089_v39  ;;  %v5027_v21 = vadd.f32 1.0, %v7468_v23 }
0x1004   : > { %v7472_v33 = vpop.eup %7471  ;;  %v5134_v44 = vmul.f32 %v7470_v1, %v5118_v38  ;;  %7487 = vrcp.f32 %v4916_v31 }
0x1005   : > { %v7474_v29 = vpop.eup %7473  ;;  %7489 = vrcp.f32 %v5026_v54  ;;  %v5120_v63 = vsub.f32 1.0, %v7472_v33  ;;  %v5152_v12 = vmul.f32 %v7472_v33, %v9869_v61 }
0x1006   : > { %v7476_v60 = vpop.eup %7475  ;;  %v5166_v42 = vadd.f32 %v5150_v20, %v5134_v44  ;;  %v5135_v11 = vmul.f32 %v7474_v29, %v5119_v3  ;;  %7491 = vrcp.f32 %v5027_v21  ;;  %v9877_v44 = vld [vmem:[#allocation45_spill] sm:$0xff] }
0x1007   : > { %v7478_v47 = vpop.eup %7477  ;;  %v5074_v36 = vmul.f32 %v7476_v60, %v4826_v32  ;;  %v7563_v32 = vmov 0.0   ;;  %v9470_v21 = vld [vmem:[%s9529_s5 + $0x18] sm:$0x3]  ;;  %v9879_v60 = vld [vmem:[#allocation3_spill] sm:$0xff] }
0x1008   : > { %v7480_v16 = vpop.eup %7479  ;;  %v5177_v28 = vpack.c.bf16 %v5166_v42, %v5165_v58  ;;  %v5167_v45 = vadd.f32 %v5151_v41, %v5135_v11  ;;  %v5121_v46 = vsub.f32 1.0, %v7478_v47  ;;  %v5153_v51 = vmul.f32 %v7478_v47, %v9871_v4  ;;  %6529 = vmatprep.subr.bf16.mxu0 %v7563_v32 }
0x1009   : > { %v7482_v52 = vpop.eup %7481  ;;  %v5090_v10 = vadd.f32 %v5074_v36, %v4620_v7  ;;  %v5075_v18 = vmul.f32 %v7480_v16, %v4831_v0  ;;  %v9474_v42 = vrot.slane %v9470_v21, %v9879_v60 }
0x100a   : > { %6521 = vmatprep.mubr.msk.bf16.mxu0 %vm9868_vm4, %v5177_v28  ;;  %v5028_v15 = vadd.f32 1.0, %v7482_v52 }
0x100b   : > { %v7484_v55 = vpop.eup %7483  ;;  %7493 = vtanh.f32 %v5090_v10  ;;  %v5091_v6 = vadd.f32 %v5075_v18, %v4623_v49 }
0x100c   : > { %v5136_v57 = vmul.f32 %v7484_v55, %v5120_v63 }
0x100d   : > { %v7486_v9 = vpop.eup %7485  ;;  %7495 = vtanh.f32 %v5091_v6 }
0x100e   : > { %v5168_v30 = vadd.f32 %v5152_v12, %v5136_v57  ;;  %v5137_v56 = vmul.f32 %v7486_v9, %v5121_v46  ;;  %v7488_v40 = vpop.eup %7487  ;;  %7497 = vrcp.f32 %v5028_v15 }
0x100f   : > { %v5076_v2 = vmul.f32 %v7488_v40, %v4834_v8  ;;  %v7490_v53 = vpop.eup %7489 }
0x1010   : > { %v5178_v22 = vpack.c.bf16 %v5168_v30, %v5167_v45  ;;  %v5169_v19 = vadd.f32 %v5153_v51, %v5137_v56  ;;  %v7492_v24 = vpop.eup %7491  ;;  %v5122_v48 = vsub.f32 1.0, %v7490_v53  ;;  %v5154_v5 = vmul.f32 %v7490_v53, %v9874_v62  ;;  %v9880_v62 = vld [vmem:[#allocation2_spill] sm:$0xff] }
0x1011   : > { %v5092_v34 = vadd.f32 %v5076_v2, %v4626_v50  ;;  %v5123_v37 = vsub.f32 1.0, %v7492_v24  ;;  %v5155_v39 = vmul.f32 %v7492_v24, %v9875_v59 }
0x1012   : > { %6522 = vmatmul.mubr.msk.bf16.gmra.mrb[164].mxu0 %vm9873_vm5, %v5178_v22 }
0x1013   : > { %7499 = vtanh.f32 %v5092_v34 }
0x1015   : > { %v7494_v35 = vpop.eup %7493 }
0x1016   : > { %v5138_v58 = vmul.f32 %v7494_v35, %v5122_v48 }
0x1017   : > { %v7496_v43 = vpop.eup %7495 }
0x1018   : > { %v5170_v17 = vadd.f32 %v5154_v5, %v5138_v58  ;;  %v5139_v26 = vmul.f32 %v7496_v43, %v5123_v37  ;;  %v7498_v23 = vpop.eup %7497  ;;  %v5336_v5 = vmul.u32 8, %v9880_v62  ;;  %v9881_v43 = vld [vmem:[#allocation19_spill] sm:$0xff] }
0x1019   : > { %v5124_v1 = vsub.f32 1.0, %v7498_v23  ;;  %v5156_v20 = vmul.f32 %v7498_v23, %v9877_v44 }
0x101a   : > { %v5179_v31 = vpack.c.bf16 %v5170_v17, %v5169_v19  ;;  %v5171_v38 = vadd.f32 %v5155_v39, %v5139_v26  ;;  %v5337_v17 = vmul.u32 8, %v9881_v43 }
0x101c   : > { %6525 = vmatprep.mubr.msk.bf16.mxu0 %vm9876_vm6, %v5179_v31 }
0x101d   : > { %v7500_v54 = vpop.eup %7499 }
0x101e   : > { %v5140_v33 = vmul.f32 %v7500_v54, %v5124_v1  ;;  %v9882_v1 = vlaneseq }
0x1020   : > { %v5172_v3 = vadd.f32 %v5156_v20, %v5140_v33  ;;  %v5335_v54 = vand.u32 127, %v9882_v1  ;;  %v5340_v33 = vadd.s32 8, %v5336_v5  ;;  %v5341_v20 = vadd.s32 8, %v5337_v17 }
0x1022   : > { %v5180_v29 = vpack.c.bf16 %v5172_v3, %v5171_v38  ;;  %vm5338_vm9 = vcmp.ge.s32.totalorder %v5335_v54, %v5336_v5  ;;  %vm5342_vm1 = vcmp.lt.s32.totalorder %v5335_v54, %v5340_v33  ;;  %vm5339_vm15 = vcmp.ge.s32.totalorder %v5335_v54, %v5337_v17 }
0x1023   : > { %vm5343_vm12 = vcmp.lt.s32.totalorder %v5335_v54, %v5341_v20  ;;  %vm5344_vm13 = vmand %vm5338_vm9, %vm5342_vm1 }
0x1024   : > { %6526 = vmatmul.mubr.msk.bf16.gmra.mrb[168].mxu0 %vm9878_vm7, %v5180_v29  ;;  %vm5345_vm14 = vmand %vm5339_vm15, %vm5343_vm12 }
0x1025   : > { %6545 = vmatprep.mubr.msk.bf16.mxu0 %vm7564_vm8, %v7563_v32  ;;  %vm5889_vm0 = vmpackc.low %vm5345_vm14, %vm5344_vm13 }
0x10bb   : > { %v6515_v11 = vpop.f32.mrb[156].mxu0 }
0x10bc   : > { %v5264_v41 = vadd.f32 %v6515_v11, %v9474_v42  ;;  %v5255_v47 = vpop.f32.mrb[157].mxu0 }
0x10bd   : > { %v5256_v7 = vadd.f32 %v5255_v47, %v9474_v42  ;;  %v6516_v14 = vpop.f32.mrb[158].mxu0 }
0x10be   : > { %v5267_v0 = vadd.f32 %v6516_v14, %v9474_v42  ;;  %v5258_v36 = vpop.f32.mrb[159].mxu0  ;;  %v5320_v28 = vmax.f32 %v5264_v41, 0.0  ;;  %v7020_v14 = vld [vmem:[%s9528_s4 + $0x58] sm:$0xff]  }
0x10bf   : > { %v5259_v16 = vadd.f32 %v5258_v36, %v9474_v42  ;;  %v5318_v52 = vmax.f32 %v5256_v7, 0.0  ;;  %v7019_v7 = vld [vmem:[%s9528_s4 + $0x50] sm:$0xff]  }
0x10c0   : > { %v5321_v45 = vmax.f32 %v5267_v0, 0.0 }
0x10c1   : > { %v5319_v27 = vmax.f32 %v5259_v16, 0.0 }
0x10c2   : > { %v5350_v49 = vpack.c.bf16 %v5321_v45, %v5320_v28 }
0x10c3   : > { %v5349_v10 = vpack.c.bf16 %v5319_v27, %v5318_v52 }
0x10c5   : > { %6530 = vmatpush3.bf16.msra.mxu0 %v5349_v10 }
0x10c6   : > { %6531 = vmatprep.subr.bf16.mxu0 %v7563_v32 }
0x10c9   : > { %6532 = vmatpush3.bf16.msra.mxu0 %v5350_v49  ;;  %v9884_v49 = vld [vmem:[#allocation4_spill] sm:$0xff] }
0x10ca   : > { %6533 = vmatprep.subr.bf16.mxu0 %v7563_v32  ;;  %v5404_v10 = vrot.slane %v9470_v21, %v9884_v49 }
0x10cd   : > { %v6519_v18 = vpop.f32.mrb[160].mxu0 }
0x10ce   : > { %v5280_v63 = vadd.f32 %v6519_v18, %v9474_v42  ;;  %v5271_v55 = vpop.f32.mrb[161].mxu0 }
0x10cf   : > { %v5272_v6 = vadd.f32 %v5271_v55, %v9474_v42  ;;  %v6520_v15 = vpop.f32.mrb[162].mxu0 }
0x10d0   : > { %v5283_v57 = vadd.f32 %v6520_v15, %v9474_v42  ;;  %v5274_v61 = vpop.f32.mrb[163].mxu0  ;;  %v5324_v46 = vmax.f32 %v5280_v63, 0.0 }
0x10d1   : > { %v5275_v12 = vadd.f32 %v5274_v61, %v9474_v42  ;;  %v5322_v13 = vmax.f32 %v5272_v6, 0.0 }
0x10d2   : > { %v5325_v9 = vmax.f32 %v5283_v57, 0.0 }
0x10d3   : > { %v5323_v8 = vmax.f32 %v5275_v12, 0.0 }
0x10d4   : > { %v5352_v30 = vpack.c.bf16 %v5325_v9, %v5324_v46 }
0x10d5   : > { %v5351_v56 = vpack.c.bf16 %v5323_v8, %v5322_v13 }
0x10d7   : > { %6534 = vmatpush3.bf16.msra.mxu0 %v5351_v56 }
0x10d8   : > { %6535 = vmatprep.subr.bf16.mxu0 %v7563_v32 }
0x10db   : > { %6536 = vmatpush3.bf16.msra.mxu0 %v5352_v30 }
0x10dc   : > { %6537 = vmatprep.subr.bf16.mxu0 %v7563_v32 }
0x10e5   : > { %v6523_v4 = vpop.f32.mrb[164].mxu0 }
0x10e6   : > { %v5296_v51 = vadd.f32 %v6523_v4, %v9474_v42  ;;  %v5287_v40 = vpop.f32.mrb[165].mxu0 }
0x10e7   : > { %v5288_v25 = vadd.f32 %v5287_v40, %v9474_v42  ;;  %v6524_v50 = vpop.f32.mrb[166].mxu0 }
0x10e8   : > { %v5299_v2 = vadd.f32 %v6524_v50, %v9474_v42  ;;  %v5290_v22 = vpop.f32.mrb[167].mxu0  ;;  %v5328_v53 = vmax.f32 %v5296_v51, 0.0 }
0x10e9   : > { %v5291_v19 = vadd.f32 %v5290_v22, %v9474_v42  ;;  %v5326_v24 = vmax.f32 %v5288_v25, 0.0 }
0x10ea   : > { %v5329_v34 = vmax.f32 %v5299_v2, 0.0 }
0x10eb   : > { %v5327_v48 = vmax.f32 %v5291_v19, 0.0 }
0x10ec   : > { %v5354_v35 = vpack.c.bf16 %v5329_v34, %v5328_v53 }
0x10ed   : > { %v5353_v58 = vpack.c.bf16 %v5327_v48, %v5326_v24 }
0x10ef   : > { %6538 = vmatpush3.bf16.msra.mxu0 %v5353_v58 }
0x10f0   : > { %6539 = vmatprep.subr.bf16.mxu0 %v7563_v32 }
0x10f3   : > { %6540 = vmatpush3.bf16.msra.mxu0 %v5354_v35 }
0x10f4   : > { %6541 = vmatprep.subr.bf16.mxu0 %v7563_v32 }
0x10f7   : > { %v6527_v37 = vpop.f32.mrb[168].mxu0 }
0x10f8   : > { %v5312_v26 = vadd.f32 %v6527_v37, %v9474_v42  ;;  %v5303_v59 = vpop.f32.mrb[169].mxu0 }
0x10f9   : > { %v5304_v39 = vadd.f32 %v5303_v59, %v9474_v42  ;;  %v6528_v23 = vpop.f32.mrb[170].mxu0 }
0x10fa   : > { %v5315_v31 = vadd.f32 %v6528_v23, %v9474_v42  ;;  %v5306_v38 = vpop.f32.mrb[171].mxu0  ;;  %v5332_v3 = vmax.f32 %v5312_v26, 0.0 }
0x10fb   : > { %v5307_v44 = vadd.f32 %v5306_v38, %v9474_v42  ;;  %v5330_v60 = vmax.f32 %v5304_v39, 0.0  ;;  %v7565_v42 = vmov 1.0|1.0  }
0x10fc   : > { %v5333_v29 = vmax.f32 %v5315_v31, 0.0 }
0x10fd   : > { %v5331_v11 = vmax.f32 %v5307_v44, 0.0 }
0x10fe   : > { %v5356_v41 = vpack.c.bf16 %v5333_v29, %v5332_v3 }
0x10ff   : > { %v5355_v47 = vpack.c.bf16 %v5331_v11, %v5330_v60 }
0x1101   : > { %6542 = vmatpush3.bf16.msra.mxu0 %v5355_v47 }
0x1102   : > { %6543 = vmatprep.subr.bf16.mxu0 %v7563_v32 }
0x1105   : > { %6544 = vmatpush3.bf16.msra.mxu0 %v5356_v41 }
0x1106   : > { %6549 = vmatprep.subr.bf16.mxu0 %v7563_v32 }
0x1108   : > { %6546 = vmatmul.mubr.msk.bf16.vlgmr.msra.gmra.mrb[172].mxu0 %vm5889_vm0, %v7565_v42 }
0x1109   : > { %6553 = vmatprep.mubr.msk.bf16.mxu0 %vm7564_vm8, %v7563_v32  ;;  %6550 = vmatpush3.bf16.msra.mxu0 %v7019_v7 }
0x110a   : > { %6551 = vmatprep.subr.bf16.mxu0 %v7563_v32 }
0x110d   : > { %6552 = vmatpush3.bf16.msra.mxu0 %v7020_v14 }
0x11db   : > { %v5391_v0 = vpop.f32.mrb[172].mxu0 }
0x11dc   : > { %v6547_v36 = vpop.f32.mrb[173].mxu0  ;;  %v5398_v28 = vmul.f32 0.125, %v5391_v0 }
0x11dd   : > { %v5394_v16 = vpop.f32.mrb[174].mxu0 }
0x11de   : > { %v5399_v45 = vmul.f32 0.125, %v5394_v16  ;;  %v6548_v52 = vpop.f32.mrb[175].mxu0 }
0x11e0   : > { %v5400_v27 = vpack.c.bf16 %v5399_v45, %v5398_v28 }
0x11e2   : > { %6554 = vmatmul.mubr.msk.bf16.vlgmr.msra.gmra.mrb[176].mxu0 %vm9883_vm10, %v5400_v27 }
0x12b5   : > { %v5454_v32 = vpop.f32.mrb[176].mxu0 }
0x12b6   : > { %v5455_v18 = vadd.f32 %v5454_v32, %v5404_v10  ;;  %v6555_v63 = vpop.f32.mrb[177].mxu0 }
0x12b7   : > { %v5457_v55 = vpop.f32.mrb[178].mxu0 }
0x12b8   : > { %5461 = vst.msk [vmem:[%s271_s18] sm:$0xff] %vm9885_vm11, %v5455_v18  ;;  %v5458_v6 = vadd.f32 %v5457_v55, %v5404_v10  ;;  %v6556_v15 = vpop.f32.mrb[179].mxu0 }
0x12ba   : > { %5462 = vst.msk [vmem:[%s271_s18 + $0x8] sm:$0xff] %vm9864_vm2, %v5458_v6 }
0x12bb PF: > { %s16_s21 = sadd.s32 1, %s7560_s21  }
0x12bc   : > { %p13_p4 = scmp.ge.s32.totalorder %s16_s21, 4  }
0x12be   :  { %15 = sbr.rel (!%p13_p4) target bundleno = 1 (0x1), region = 77 }

</bundles_post_ra>
